<compile_context>
chip_gen: v7x
topology: tpu7x:2x2x1
jax: 0.10.0
libtpu: 0.0.40
codegen_flags: <defaults>
</compile_context>

<pallas_src>
import jax
import jax.numpy as jnp
from jax.experimental import pallas as pl
from jax.experimental.pallas import tpu as pltpu

EPS = 1e-5
_PARALLEL = pltpu.CompilerParams(dimension_semantics=("parallel",))


def _conv3x3_im2col(xpad_bf16, w_ref):
    """3x3 'same' conv of one zero-padded image as a single MXU contraction.

    xpad_bf16: (H+2, W+2, C) bf16 value (zero halo already in place)
    w_ref:     (9*C, Cout) bf16 ref, tap-major rows: (dy*3+dx)*C + cin
    returns:   (H*W, Cout) f32
    """
    Hp, Wp, C = xpad_bf16.shape
    H, W = Hp - 2, Wp - 2
    cols = []
    for dy in range(3):
        rows = xpad_bf16[dy:dy + H]                 # slice along the major (H) axis
        for dx in range(3):
            cols.append(rows[:, dx:dx + W, :])      # (H, W, C)
    patches = jnp.concatenate(cols, axis=-1).reshape(H * W, 9 * C)   # K = 9*C
    return jnp.dot(patches, w_ref[...], preferred_element_type=jnp.float32)


def _tile_stats(y_f32):
    """Per-tile (mean, sum of squared deviations) for two-pass BatchNorm."""
    mu = jnp.mean(y_f32, axis=0, keepdims=True)     # (1, C)
    d = y_f32 - mu
    return mu, jnp.sum(d * d, axis=0, keepdims=True)


# ---------------- kernel 1: conv1 + per-image BN1 partial stats --------------
def _conv1_kernel(xpad_ref, w1_ref, y1_ref, mu_ref, m2_ref):
    _, Hp, Wp, C = xpad_ref.shape
    H, W = Hp - 2, Wp - 2
    acc = _conv3x3_im2col(xpad_ref[0], w1_ref)      # (H*W, C) f32 accumulator
    y_bf = acc.astype(jnp.bfloat16)                 # activation as it will be stored
    mu, m2 = _tile_stats(y_bf.astype(jnp.float32))  # stats of exactly what pass 2 reads
    mu_ref[...] = mu.reshape(1, 1, C)
    m2_ref[...] = m2.reshape(1, 1, C)
    # Write the padded activation: zero only the four halo strips + one interior store.
    zrow = jnp.zeros((1, 1, Wp, C), jnp.bfloat16)
    zcol = jnp.zeros((1, H, 1, C), jnp.bfloat16)
    y1_ref[0:1, 0:1, :, :] = zrow
    y1_ref[0:1, H + 1:H + 2, :, :] = zrow
    y1_ref[0:1, 1:H + 1, 0:1, :] = zcol
    y1_ref[0:1, 1:H + 1, W + 1:W + 2, :] = zcol
    y1_ref[0:1, 1:H + 1, 1:W + 1, :] = y_bf.reshape(1, H, W, C)


# ---------- kernel 2: BN1 affine + ReLU + conv2 + per-image BN2 partials -----
def _bn1_relu_conv2_kernel(y1_ref, w2_ref, scale1_ref, shift1_ref,
                           z_ref, mu_ref, m2_ref):
    _, Hp, Wp, C = y1_ref.shape
    H, W = Hp - 2, Wp - 2
    y = y1_ref[0].astype(jnp.float32)                             # (Hp, Wp, C)
    a = jnp.maximum(y * scale1_ref[...] + shift1_ref[...], 0.0)   # BN1 (f32) + ReLU
    # conv2 pads its input with zeros: re-zero the 1-pixel halo ring after BN/ReLU.
    row = jax.lax.broadcasted_iota(jnp.int32, (Hp, Wp, 1), 0)
    col = jax.lax.broadcasted_iota(jnp.int32, (Hp, Wp, 1), 1)
    ring = ((row >= 1) & (row <= H) & (col >= 1) & (col <= W)).astype(jnp.float32)
    a = a * ring
    acc = _conv3x3_im2col(a.astype(jnp.bfloat16), w2_ref)         # (H*W, C) f32
    mu, m2 = _tile_stats(acc)
    mu_ref[...] = mu.reshape(1, 1, C)
    m2_ref[...] = m2.reshape(1, 1, C)
    z_ref[...] = acc.reshape(1, H, W, C)                          # keep f32 for pass 3


# ---------------- kernel 3: BN2 affine + residual add + ReLU -----------------
def _bn2_add_relu_kernel(z_ref, x_ref, scale2_ref, shift2_ref, o_ref):
    out = z_ref[...] * scale2_ref[...] + shift2_ref[...] + x_ref[...]
    o_ref[...] = jnp.maximum(out, 0.0)


# --------------------------- host-side helpers -------------------------------
def _fold_bn(mu_tiles, m2_tiles, gamma, beta, count_per_tile):
    """Combine per-tile (mean, M2) into per-channel BN scale/shift (training mode)."""
    n_tiles = mu_tiles.shape[0]
    total = n_tiles * count_per_tile
    mean = jnp.mean(mu_tiles, axis=0)                                     # (1, C)
    m2 = (jnp.sum(m2_tiles, axis=0)
          + count_per_tile * jnp.sum((mu_tiles - mean) ** 2, axis=0))     # Chan combine
    inv_std = jax.lax.rsqrt(m2 / total + EPS)                             # biased var
    scale = gamma.reshape(1, -1).astype(jnp.float32) * inv_std
    shift = beta.reshape(1, -1).astype(jnp.float32) - mean * scale
    return scale, shift


def _taps(w_oihw):
    """PyTorch OIHW (Cout, Cin, 3, 3) -> (9*Cin, Cout) bf16, tap-major rows."""
    cout, cin = w_oihw.shape[0], w_oihw.shape[1]
    return (jnp.transpose(w_oihw, (2, 3, 1, 0))
            .reshape(9 * cin, cout).astype(jnp.bfloat16))


def residual_block_forward_nhwc(x_nhwc, w1, g1, b1, w2, g2, b2):
    """x_nhwc: (N, H, W, C) f32; w1/w2: PyTorch OIHW (C, C, 3, 3); g/b: (C,)."""
    N, H, W, C = x_nhwc.shape
    Hp, Wp = H + 2, W + 2
    x_f32 = x_nhwc.astype(jnp.float32)
    xpad_bf = jnp.pad(x_f32, ((0, 0), (1, 1), (1, 1), (0, 0))).astype(jnp.bfloat16)
    w1t, w2t = _taps(w1), _taps(w2)

    img_spec_pad = pl.BlockSpec((1, Hp, Wp, C), lambda n: (n, 0, 0, 0))
    img_spec = pl.BlockSpec((1, H, W, C), lambda n: (n, 0, 0, 0))
    wgt_spec = pl.BlockSpec((9 * C, C), lambda n: (0, 0))
    vec_spec = pl.BlockSpec((1, C), lambda n: (0, 0))
    stat_spec = pl.BlockSpec((1, 1, C), lambda n: (n, 0, 0))

    # --- pass 1: conv1, per-image BN1 partial statistics ---------------------
    y1pad, mu1, m21 = pl.pallas_call(
        _conv1_kernel,
        grid=(N,),
        in_specs=[img_spec_pad, wgt_spec],
        out_specs=[img_spec_pad, stat_spec, stat_spec],
        out_shape=[jax.ShapeDtypeStruct((N, Hp, Wp, C), jnp.bfloat16),
                   jax.ShapeDtypeStruct((N, 1, C), jnp.float32),
                   jax.ShapeDtypeStruct((N, 1, C), jnp.float32)],
        compiler_params=_PARALLEL,
    )(xpad_bf, w1t)
    scale1, shift1 = _fold_bn(mu1, m21, g1, b1, H * W)

    # --- pass 2: BN1 + ReLU + conv2, per-image BN2 partial statistics --------
    z, mu2, m22 = pl.pallas_call(
        _bn1_relu_conv2_kernel,
        grid=(N,),
        in_specs=[img_spec_pad, wgt_spec, vec_spec, vec_spec],
        out_specs=[img_spec, stat_spec, stat_spec],
        out_shape=[jax.ShapeDtypeStruct((N, H, W, C), jnp.float32),
                   jax.ShapeDtypeStruct((N, 1, C), jnp.float32),
                   jax.ShapeDtypeStruct((N, 1, C), jnp.float32)],
        compiler_params=_PARALLEL,
    )(y1pad, w2t, scale1, shift1)
    scale2, shift2 = _fold_bn(mu2, m22, g2, b2, H * W)

    # --- pass 3: BN2 + residual add + ReLU ------------------------------------
    out = pl.pallas_call(
        _bn2_add_relu_kernel,
        grid=(N,),
        in_specs=[img_spec, img_spec, vec_spec, vec_spec],
        out_specs=img_spec,
        out_shape=jax.ShapeDtypeStruct((N, H, W, C), jnp.float32),
        compiler_params=_PARALLEL,
    )(z, x_f32, scale2, shift2)
    return out


def residual_block_forward(x_nchw, w1, g1, b1, w2, g2, b2):
    """PyTorch-layout entry point (NCHW).  In a full network keep activations in
    NHWC and call residual_block_forward_nhwc directly to avoid these boundary
    transposes (they cost a full HBM pass each)."""
    x_nhwc = jnp.transpose(x_nchw, (0, 2, 3, 1))
    out = residual_block_forward_nhwc(x_nhwc, w1, g1, b1, w2, g2, b2)
    return jnp.transpose(out, (0, 3, 1, 2))


def _ref_forward(x, w1, g1, b1, w2, g2, b2):
    # Pure-JAX f32 reference (NCHW, PyTorch training-mode semantics).
    def conv(x, w):
        return jax.lax.conv_general_dilated(
            x, w, window_strides=(1, 1), padding=((1, 1), (1, 1)),
            dimension_numbers=('NCHW', 'OIHW', 'NCHW'))

    def bn(y, g, b):
        mean = jnp.mean(y, axis=(0, 2, 3), keepdims=True)
        var = jnp.mean((y - mean) ** 2, axis=(0, 2, 3), keepdims=True)
        return ((y - mean) * jax.lax.rsqrt(var + EPS)
                * g.reshape(1, -1, 1, 1) + b.reshape(1, -1, 1, 1))

    out = jnp.maximum(bn(conv(x, w1), g1, b1), 0.0)
    out = bn(conv(out, w2), g2, b2)
    return jnp.maximum(out + x, 0.0)


if __name__ == "__main__":
    # Small but lane-dense shapes (ImageNet-GAN residual blocks use >=128 channels).
    N, C, H, W = 2, 128, 16, 16
    key = jax.random.PRNGKey(0)
    kx, k1, k2, kg1, kb1, kg2, kb2 = jax.random.split(key, 7)

    x = jax.random.normal(kx, (N, C, H, W), jnp.float32)
    w_scale = (2.0 / (9 * C)) ** 0.5
    w1 = jax.random.normal(k1, (C, C, 3, 3), jnp.float32) * w_scale
    w2 = jax.random.normal(k2, (C, C, 3, 3), jnp.float32) * w_scale
    g1 = 1.0 + 0.1 * jax.random.normal(kg1, (C,), jnp.float32)
    b1 = 0.05 * jax.random.normal(kb1, (C,), jnp.float32)
    g2 = 1.0 + 0.1 * jax.random.normal(kg2, (C,), jnp.float32)
    b2 = 0.05 * jax.random.normal(kb2, (C,), jnp.float32)

    fwd = jax.jit(residual_block_forward)
    out = jax.block_until_ready(fwd(x, w1, g1, b1, w2, g2, b2))
    assert out.shape == (N, C, H, W)

    ref = jax.block_until_ready(_ref_forward(x, w1, g1, b1, w2, g2, b2))
    max_err = float(jnp.max(jnp.abs(out - ref)))
    rel_err = float(jnp.linalg.norm(out - ref) / (jnp.linalg.norm(ref) + 1e-12))
    # bf16 MXU operands (f32 accumulation / BN math) => tolerances sized for bf16.
    assert max_err < 0.15 and rel_err < 0.03, f"max_err={max_err} rel_err={rel_err}"

    print("KERNEL_OK")
</pallas_src>

<mosaic_0001>
module attributes {stable_mosaic.version = 11 : i64} {
  func.func @_conv1_kernel(%arg0: i32, %arg1: memref<1x18x18x128xbf16, #tpu.memory_space<vmem>>, %arg2: memref<1152x128xbf16, #tpu.memory_space<vmem>>, %arg3: memref<1x18x18x128xbf16, #tpu.memory_space<vmem>>, %arg4: memref<1x1x128xf32, #tpu.memory_space<vmem>>, %arg5: memref<1x1x128xf32, #tpu.memory_space<vmem>>) attributes {dimension_semantics = [#tpu.dimension_semantics<parallel>], iteration_bounds = array<i64: 2>, scalar_prefetch = 0 : i64, scratch_operands = 0 : i64, tpu.core_type = #tpu.core_type<tc>, window_params = [{transform_indices = @transform_0, window_bounds = array<i64: 1, 18, 18, 128>}, {pipeline_mode = #tpu.pipeline_mode<synchronous>, transform_indices = @transform_1, window_bounds = array<i64: 1152, 128>}, {transform_indices = @transform_2, window_bounds = array<i64: 1, 18, 18, 128>}, {transform_indices = @transform_3, window_bounds = array<i64: 1, 1, 128>}, {transform_indices = @transform_4, window_bounds = array<i64: 1, 1, 128>}]} {
    %c0 = arith.constant 0 : index
    %c0_0 = arith.constant 0 : index
    %c0_1 = arith.constant 0 : index
    %c0_2 = arith.constant 0 : index
    %0 = vector.load %arg1[%c0, %c0_0, %c0_1, %c0_2] : memref<1x18x18x128xbf16, #tpu.memory_space<vmem>>, vector<1x18x18x128xbf16>
    %1 = vector.shape_cast %0 : vector<1x18x18x128xbf16> to vector<18x18x128xbf16>
    %2 = vector.extract_strided_slice %1 {offsets = [0, 0, 0], sizes = [16, 18, 128], strides = [1, 1, 1]} : vector<18x18x128xbf16> to vector<16x18x128xbf16>
    %3 = vector.extract_strided_slice %2 {offsets = [0, 0, 0], sizes = [16, 16, 128], strides = [1, 1, 1]} : vector<16x18x128xbf16> to vector<16x16x128xbf16>
    %4 = vector.extract_strided_slice %2 {offsets = [0, 1, 0], sizes = [16, 16, 128], strides = [1, 1, 1]} : vector<16x18x128xbf16> to vector<16x16x128xbf16>
    %5 = vector.extract_strided_slice %2 {offsets = [0, 2, 0], sizes = [16, 16, 128], strides = [1, 1, 1]} : vector<16x18x128xbf16> to vector<16x16x128xbf16>
    %6 = vector.extract_strided_slice %1 {offsets = [1, 0, 0], sizes = [16, 18, 128], strides = [1, 1, 1]} : vector<18x18x128xbf16> to vector<16x18x128xbf16>
    %7 = vector.extract_strided_slice %6 {offsets = [0, 0, 0], sizes = [16, 16, 128], strides = [1, 1, 1]} : vector<16x18x128xbf16> to vector<16x16x128xbf16>
    %8 = vector.extract_strided_slice %6 {offsets = [0, 1, 0], sizes = [16, 16, 128], strides = [1, 1, 1]} : vector<16x18x128xbf16> to vector<16x16x128xbf16>
    %9 = vector.extract_strided_slice %6 {offsets = [0, 2, 0], sizes = [16, 16, 128], strides = [1, 1, 1]} : vector<16x18x128xbf16> to vector<16x16x128xbf16>
    %10 = vector.extract_strided_slice %1 {offsets = [2, 0, 0], sizes = [16, 18, 128], strides = [1, 1, 1]} : vector<18x18x128xbf16> to vector<16x18x128xbf16>
    %11 = vector.extract_strided_slice %10 {offsets = [0, 0, 0], sizes = [16, 16, 128], strides = [1, 1, 1]} : vector<16x18x128xbf16> to vector<16x16x128xbf16>
    %12 = vector.extract_strided_slice %10 {offsets = [0, 1, 0], sizes = [16, 16, 128], strides = [1, 1, 1]} : vector<16x18x128xbf16> to vector<16x16x128xbf16>
    %13 = vector.extract_strided_slice %10 {offsets = [0, 2, 0], sizes = [16, 16, 128], strides = [1, 1, 1]} : vector<16x18x128xbf16> to vector<16x16x128xbf16>
    %14 = tpu.concatenate %3, %4, %5, %7, %8, %9, %11, %12, %13 in 2 : vector<16x16x128xbf16>, vector<16x16x128xbf16>, vector<16x16x128xbf16>, vector<16x16x128xbf16>, vector<16x16x128xbf16>, vector<16x16x128xbf16>, vector<16x16x128xbf16>, vector<16x16x128xbf16>, vector<16x16x128xbf16> -> vector<16x16x1152xbf16>
    %15 = vector.shape_cast %14 : vector<16x16x1152xbf16> to vector<256x1152xbf16>
    %c0_3 = arith.constant 0 : index
    %c0_4 = arith.constant 0 : index
    %16 = vector.load %arg2[%c0_3, %c0_4] : memref<1152x128xbf16, #tpu.memory_space<vmem>>, vector<1152x128xbf16>
    %cst = arith.constant dense<0.000000e+00> : vector<256x128xf32>
    %17 = tpu.matmul %15, %16, %cst {dimension_numbers = #tpu.dot_dimension_numbers<[1], [0], [0], [1], [0, 0, 1, 1], [], []>} : vector<256x1152xbf16>, vector<1152x128xbf16>, vector<256x128xf32> -> vector<256x128xf32>
    %18 = arith.truncf %17 : vector<256x128xf32> to vector<256x128xbf16>
    %19 = arith.extf %18 : vector<256x128xbf16> to vector<256x128xf32>
    %cst_5 = arith.constant dense<0.000000e+00> : vector<128xf32>
    %20 = vector.multi_reduction <add>, %19, %cst_5 [0] : vector<256x128xf32> to vector<128xf32>
    %21 = vector.shape_cast %20 : vector<128xf32> to vector<1x128xf32>
    %cst_6 = arith.constant 2.560000e+02 : f32
    %22 = vector.broadcast %cst_6 : f32 to vector<1x128xf32>
    %23 = arith.divf %21, %22 : vector<1x128xf32>
    %24 = vector.broadcast %23 : vector<1x128xf32> to vector<256x128xf32>
    %25 = arith.subf %19, %24 : vector<256x128xf32>
    %26 = arith.mulf %25, %25 : vector<256x128xf32>
    %cst_7 = arith.constant dense<0.000000e+00> : vector<128xf32>
    %27 = vector.multi_reduction <add>, %26, %cst_7 [0] : vector<256x128xf32> to vector<128xf32>
    %28 = vector.shape_cast %27 : vector<128xf32> to vector<1x128xf32>
    %29 = vector.shape_cast %23 : vector<1x128xf32> to vector<1x1x128xf32>
    %c0_8 = arith.constant 0 : index
    %c0_9 = arith.constant 0 : index
    %c0_10 = arith.constant 0 : index
    %30 = vector.load %arg4[%c0_8, %c0_9, %c0_10] : memref<1x1x128xf32, #tpu.memory_space<vmem>>, vector<1x1x128xf32>
    tpu.vector_store %arg4[%c0_8, %c0_9, %c0_10], %29 {strides = array<i32>} : memref<1x1x128xf32, #tpu.memory_space<vmem>>, vector<1x1x128xf32>,
    %31 = vector.shape_cast %28 : vector<1x128xf32> to vector<1x1x128xf32>
    %c0_11 = arith.constant 0 : index
    %c0_12 = arith.constant 0 : index
    %c0_13 = arith.constant 0 : index
    %32 = vector.load %arg5[%c0_11, %c0_12, %c0_13] : memref<1x1x128xf32, #tpu.memory_space<vmem>>, vector<1x1x128xf32>
    tpu.vector_store %arg5[%c0_11, %c0_12, %c0_13], %31 {strides = array<i32>} : memref<1x1x128xf32, #tpu.memory_space<vmem>>, vector<1x1x128xf32>,
    %cst_14 = arith.constant 0.000000e+00 : bf16
    %33 = vector.broadcast %cst_14 : bf16 to vector<1x1x18x128xbf16>
    %cst_15 = arith.constant 0.000000e+00 : bf16
    %34 = vector.broadcast %cst_15 : bf16 to vector<1x16x1x128xbf16>
    %c0_16 = arith.constant 0 : index
    %c0_17 = arith.constant 0 : index
    %c0_18 = arith.constant 0 : index
    %c0_19 = arith.constant 0 : index
    %35 = vector.load %arg3[%c0_16, %c0_17, %c0_18, %c0_19] : memref<1x18x18x128xbf16, #tpu.memory_space<vmem>>, vector<1x1x18x128xbf16>
    tpu.vector_store %arg3[%c0_16, %c0_17, %c0_18, %c0_19], %33 {strides = array<i32>} : memref<1x18x18x128xbf16, #tpu.memory_space<vmem>>, vector<1x1x18x128xbf16>,
    %c0_20 = arith.constant 0 : index
    %c17 = arith.constant 17 : index
    %c0_21 = arith.constant 0 : index
    %c0_22 = arith.constant 0 : index
    %36 = vector.load %arg3[%c0_20, %c17, %c0_21, %c0_22] : memref<1x18x18x128xbf16, #tpu.memory_space<vmem>>, vector<1x1x18x128xbf16>
    tpu.vector_store %arg3[%c0_20, %c17, %c0_21, %c0_22], %33 {strides = array<i32>} : memref<1x18x18x128xbf16, #tpu.memory_space<vmem>>, vector<1x1x18x128xbf16>,
    %c0_23 = arith.constant 0 : index
    %c1 = arith.constant 1 : index
    %c0_24 = arith.constant 0 : index
    %c0_25 = arith.constant 0 : index
    %37 = vector.load %arg3[%c0_23, %c1, %c0_24, %c0_25] : memref<1x18x18x128xbf16, #tpu.memory_space<vmem>>, vector<1x16x1x128xbf16>
    tpu.vector_store %arg3[%c0_23, %c1, %c0_24, %c0_25], %34 {strides = array<i32>} : memref<1x18x18x128xbf16, #tpu.memory_space<vmem>>, vector<1x16x1x128xbf16>,
    %c0_26 = arith.constant 0 : index
    %c1_27 = arith.constant 1 : index
    %c17_28 = arith.constant 17 : index
    %c0_29 = arith.constant 0 : index
    %38 = vector.load %arg3[%c0_26, %c1_27, %c17_28, %c0_29] : memref<1x18x18x128xbf16, #tpu.memory_space<vmem>>, vector<1x16x1x128xbf16>
    tpu.vector_store %arg3[%c0_26, %c1_27, %c17_28, %c0_29], %34 {strides = array<i32>} : memref<1x18x18x128xbf16, #tpu.memory_space<vmem>>, vector<1x16x1x128xbf16>,
    %39 = vector.shape_cast %18 : vector<256x128xbf16> to vector<1x16x16x128xbf16>
    %c0_30 = arith.constant 0 : index
    %c1_31 = arith.constant 1 : index
    %c1_32 = arith.constant 1 : index
    %c0_33 = arith.constant 0 : index
    %40 = vector.load %arg3[%c0_30, %c1_31, %c1_32, %c0_33] : memref<1x18x18x128xbf16, #tpu.memory_space<vmem>>, vector<1x16x16x128xbf16>
    tpu.vector_store %arg3[%c0_30, %c1_31, %c1_32, %c0_33], %39 {strides = array<i32>} : memref<1x18x18x128xbf16, #tpu.memory_space<vmem>>, vector<1x16x16x128xbf16>,
    return
  }
  func.func @transform_0(%arg0: i32) -> (i32, i32, i32, i32) {
    %c0_i32 = arith.constant 0 : i32
    %c0_i32_0 = arith.constant 0 : i32
    %c0_i32_1 = arith.constant 0 : i32
    %c0_i32_2 = arith.constant 0 : i32
    return %arg0, %c0_i32, %c0_i32_0, %c0_i32_1 : i32, i32, i32, i32
  }
  func.func @transform_1(%arg0: i32) -> (i32, i32) {
    %c0_i32 = arith.constant 0 : i32
    %c0_i32_0 = arith.constant 0 : i32
    %c0_i32_1 = arith.constant 0 : i32
    return %c0_i32, %c0_i32_0 : i32, i32
  }
  func.func @transform_2(%arg0: i32) -> (i32, i32, i32, i32) {
    %c0_i32 = arith.constant 0 : i32
    %c0_i32_0 = arith.constant 0 : i32
    %c0_i32_1 = arith.constant 0 : i32
    %c0_i32_2 = arith.constant 0 : i32
    return %arg0, %c0_i32, %c0_i32_0, %c0_i32_1 : i32, i32, i32, i32
  }
  func.func @transform_3(%arg0: i32) -> (i32, i32, i32) {
    %c0_i32 = arith.constant 0 : i32
    %c0_i32_0 = arith.constant 0 : i32
    %c0_i32_1 = arith.constant 0 : i32
    return %arg0, %c0_i32, %c0_i32_0 : i32, i32, i32
  }
  func.func @transform_4(%arg0: i32) -> (i32, i32, i32) {
    %c0_i32 = arith.constant 0 : i32
    %c0_i32_0 = arith.constant 0 : i32
    %c0_i32_1 = arith.constant 0 : i32
    return %arg0, %c0_i32, %c0_i32_0 : i32, i32, i32
  }
}

module attributes {stable_mosaic.version = 11 : i64} {
  func.func @_bn1_relu_conv2_kernel(%arg0: i32, %arg1: memref<1x18x18x128xbf16, #tpu.memory_space<vmem>>, %arg2: memref<1152x128xbf16, #tpu.memory_space<vmem>>, %arg3: memref<1x128xf32, #tpu.memory_space<vmem>>, %arg4: memref<1x128xf32, #tpu.memory_space<vmem>>, %arg5: memref<1x16x16x128xf32, #tpu.memory_space<vmem>>, %arg6: memref<1x1x128xf32, #tpu.memory_space<vmem>>, %arg7: memref<1x1x128xf32, #tpu.memory_space<vmem>>) attributes {dimension_semantics = [#tpu.dimension_semantics<parallel>], iteration_bounds = array<i64: 2>, scalar_prefetch = 0 : i64, scratch_operands = 0 : i64, tpu.core_type = #tpu.core_type<tc>, window_params = [{transform_indices = @transform_0, window_bounds = array<i64: 1, 18, 18, 128>}, {pipeline_mode = #tpu.pipeline_mode<synchronous>, transform_indices = @transform_1, window_bounds = array<i64: 1152, 128>}, {pipeline_mode = #tpu.pipeline_mode<synchronous>, transform_indices = @transform_2, window_bounds = array<i64: 1, 128>}, {pipeline_mode = #tpu.pipeline_mode<synchronous>, transform_indices = @transform_3, window_bounds = array<i64: 1, 128>}, {transform_indices = @transform_4, window_bounds = array<i64: 1, 16, 16, 128>}, {transform_indices = @transform_5, window_bounds = array<i64: 1, 1, 128>}, {transform_indices = @transform_6, window_bounds = array<i64: 1, 1, 128>}]} {
    %c0 = arith.constant 0 : index
    %c0_0 = arith.constant 0 : index
    %c0_1 = arith.constant 0 : index
    %c0_2 = arith.constant 0 : index
    %0 = vector.load %arg1[%c0, %c0_0, %c0_1, %c0_2] : memref<1x18x18x128xbf16, #tpu.memory_space<vmem>>, vector<1x18x18x128xbf16>
    %1 = vector.shape_cast %0 : vector<1x18x18x128xbf16> to vector<18x18x128xbf16>
    %2 = arith.extf %1 : vector<18x18x128xbf16> to vector<18x18x128xf32>
    %c0_3 = arith.constant 0 : index
    %c0_4 = arith.constant 0 : index
    %3 = vector.load %arg3[%c0_3, %c0_4] : memref<1x128xf32, #tpu.memory_space<vmem>>, vector<1x128xf32>
    %4 = vector.shape_cast %3 : vector<1x128xf32> to vector<1x1x128xf32>
    %5 = vector.broadcast %4 : vector<1x1x128xf32> to vector<18x18x128xf32>
    %6 = arith.mulf %2, %5 : vector<18x18x128xf32>
    %c0_5 = arith.constant 0 : index
    %c0_6 = arith.constant 0 : index
    %7 = vector.load %arg4[%c0_5, %c0_6] : memref<1x128xf32, #tpu.memory_space<vmem>>, vector<1x128xf32>
    %8 = vector.shape_cast %7 : vector<1x128xf32> to vector<1x1x128xf32>
    %9 = vector.broadcast %8 : vector<1x1x128xf32> to vector<18x18x128xf32>
    %10 = arith.addf %6, %9 : vector<18x18x128xf32>
    %cst = arith.constant 0.000000e+00 : f32
    %11 = vector.broadcast %cst : f32 to vector<18x18x128xf32>
    %12 = arith.maximumf %10, %11 : vector<18x18x128xf32>
    %13 = tpu.iota {dimensions = array<i32: 0>} : vector<18x18x1xi32>
    %14 = tpu.iota {dimensions = array<i32: 1>} : vector<18x18x1xi32>
    %c1_i32 = arith.constant 1 : i32
    %15 = vector.broadcast %c1_i32 : i32 to vector<18x18x1xi32>
    %16 = arith.cmpi sge, %13, %15 : vector<18x18x1xi32>
    %c16_i32 = arith.constant 16 : i32
    %17 = vector.broadcast %c16_i32 : i32 to vector<18x18x1xi32>
    %18 = arith.cmpi sle, %13, %17 : vector<18x18x1xi32>
    %19 = arith.andi %16, %18 : vector<18x18x1xi1>
    %c1_i32_7 = arith.constant 1 : i32
    %20 = vector.broadcast %c1_i32_7 : i32 to vector<18x18x1xi32>
    %21 = arith.cmpi sge, %14, %20 : vector<18x18x1xi32>
    %22 = arith.andi %19, %21 : vector<18x18x1xi1>
    %c16_i32_8 = arith.constant 16 : i32
    %23 = vector.broadcast %c16_i32_8 : i32 to vector<18x18x1xi32>
    %24 = arith.cmpi sle, %14, %23 : vector<18x18x1xi32>
    %25 = arith.andi %22, %24 : vector<18x18x1xi1>
    %26 = arith.extui %25 : vector<18x18x1xi1> to vector<18x18x1xi32>
    %27 = arith.sitofp %26 : vector<18x18x1xi32> to vector<18x18x1xf32>
    %28 = vector.broadcast %27 : vector<18x18x1xf32> to vector<18x18x128xf32>
    %29 = arith.mulf %12, %28 : vector<18x18x128xf32>
    %30 = arith.truncf %29 : vector<18x18x128xf32> to vector<18x18x128xbf16>
    %31 = vector.extract_strided_slice %30 {offsets = [0, 0, 0], sizes = [16, 18, 128], strides = [1, 1, 1]} : vector<18x18x128xbf16> to vector<16x18x128xbf16>
    %32 = vector.extract_strided_slice %31 {offsets = [0, 0, 0], sizes = [16, 16, 128], strides = [1, 1, 1]} : vector<16x18x128xbf16> to vector<16x16x128xbf16>
    %33 = vector.extract_strided_slice %31 {offsets = [0, 1, 0], sizes = [16, 16, 128], strides = [1, 1, 1]} : vector<16x18x128xbf16> to vector<16x16x128xbf16>
    %34 = vector.extract_strided_slice %31 {offsets = [0, 2, 0], sizes = [16, 16, 128], strides = [1, 1, 1]} : vector<16x18x128xbf16> to vector<16x16x128xbf16>
    %35 = vector.extract_strided_slice %30 {offsets = [1, 0, 0], sizes = [16, 18, 128], strides = [1, 1, 1]} : vector<18x18x128xbf16> to vector<16x18x128xbf16>
    %36 = vector.extract_strided_slice %35 {offsets = [0, 0, 0], sizes = [16, 16, 128], strides = [1, 1, 1]} : vector<16x18x128xbf16> to vector<16x16x128xbf16>
    %37 = vector.extract_strided_slice %35 {offsets = [0, 1, 0], sizes = [16, 16, 128], strides = [1, 1, 1]} : vector<16x18x128xbf16> to vector<16x16x128xbf16>
    %38 = vector.extract_strided_slice %35 {offsets = [0, 2, 0], sizes = [16, 16, 128], strides = [1, 1, 1]} : vector<16x18x128xbf16> to vector<16x16x128xbf16>
    %39 = vector.extract_strided_slice %30 {offsets = [2, 0, 0], sizes = [16, 18, 128], strides = [1, 1, 1]} : vector<18x18x128xbf16> to vector<16x18x128xbf16>
    %40 = vector.extract_strided_slice %39 {offsets = [0, 0, 0], sizes = [16, 16, 128], strides = [1, 1, 1]} : vector<16x18x128xbf16> to vector<16x16x128xbf16>
    %41 = vector.extract_strided_slice %39 {offsets = [0, 1, 0], sizes = [16, 16, 128], strides = [1, 1, 1]} : vector<16x18x128xbf16> to vector<16x16x128xbf16>
    %42 = vector.extract_strided_slice %39 {offsets = [0, 2, 0], sizes = [16, 16, 128], strides = [1, 1, 1]} : vector<16x18x128xbf16> to vector<16x16x128xbf16>
    %43 = tpu.concatenate %32, %33, %34, %36, %37, %38, %40, %41, %42 in 2 : vector<16x16x128xbf16>, vector<16x16x128xbf16>, vector<16x16x128xbf16>, vector<16x16x128xbf16>, vector<16x16x128xbf16>, vector<16x16x128xbf16>, vector<16x16x128xbf16>, vector<16x16x128xbf16>, vector<16x16x128xbf16> -> vector<16x16x1152xbf16>
    %44 = vector.shape_cast %43 : vector<16x16x1152xbf16> to vector<256x1152xbf16>
    %c0_9 = arith.constant 0 : index
    %c0_10 = arith.constant 0 : index
    %45 = vector.load %arg2[%c0_9, %c0_10] : memref<1152x128xbf16, #tpu.memory_space<vmem>>, vector<1152x128xbf16>
    %cst_11 = arith.constant dense<0.000000e+00> : vector<256x128xf32>
    %46 = tpu.matmul %44, %45, %cst_11 {dimension_numbers = #tpu.dot_dimension_numbers<[1], [0], [0], [1], [0, 0, 1, 1], [], []>} : vector<256x1152xbf16>, vector<1152x128xbf16>, vector<256x128xf32> -> vector<256x128xf32>
    %cst_12 = arith.constant dense<0.000000e+00> : vector<128xf32>
    %47 = vector.multi_reduction <add>, %46, %cst_12 [0] : vector<256x128xf32> to vector<128xf32>
    %48 = vector.shape_cast %47 : vector<128xf32> to vector<1x128xf32>
    %cst_13 = arith.constant 2.560000e+02 : f32
    %49 = vector.broadcast %cst_13 : f32 to vector<1x128xf32>
    %50 = arith.divf %48, %49 : vector<1x128xf32>
    %51 = vector.broadcast %50 : vector<1x128xf32> to vector<256x128xf32>
    %52 = arith.subf %46, %51 : vector<256x128xf32>
    %53 = arith.mulf %52, %52 : vector<256x128xf32>
    %cst_14 = arith.constant dense<0.000000e+00> : vector<128xf32>
    %54 = vector.multi_reduction <add>, %53, %cst_14 [0] : vector<256x128xf32> to vector<128xf32>
    %55 = vector.shape_cast %54 : vector<128xf32> to vector<1x128xf32>
    %56 = vector.shape_cast %50 : vector<1x128xf32> to vector<1x1x128xf32>
    %c0_15 = arith.constant 0 : index
    %c0_16 = arith.constant 0 : index
    %c0_17 = arith.constant 0 : index
    %57 = vector.load %arg6[%c0_15, %c0_16, %c0_17] : memref<1x1x128xf32, #tpu.memory_space<vmem>>, vector<1x1x128xf32>
    tpu.vector_store %arg6[%c0_15, %c0_16, %c0_17], %56 {strides = array<i32>} : memref<1x1x128xf32, #tpu.memory_space<vmem>>, vector<1x1x128xf32>,
    %58 = vector.shape_cast %55 : vector<1x128xf32> to vector<1x1x128xf32>
    %c0_18 = arith.constant 0 : index
    %c0_19 = arith.constant 0 : index
    %c0_20 = arith.constant 0 : index
    %59 = vector.load %arg7[%c0_18, %c0_19, %c0_20] : memref<1x1x128xf32, #tpu.memory_space<vmem>>, vector<1x1x128xf32>
    tpu.vector_store %arg7[%c0_18, %c0_19, %c0_20], %58 {strides = array<i32>} : memref<1x1x128xf32, #tpu.memory_space<vmem>>, vector<1x1x128xf32>,
    %60 = vector.shape_cast %46 : vector<256x128xf32> to vector<1x16x16x128xf32>
    %c0_21 = arith.constant 0 : index
    %c0_22 = arith.constant 0 : index
    %c0_23 = arith.constant 0 : index
    %c0_24 = arith.constant 0 : index
    %61 = vector.load %arg5[%c0_21, %c0_22, %c0_23, %c0_24] : memref<1x16x16x128xf32, #tpu.memory_space<vmem>>, vector<1x16x16x128xf32>
    tpu.vector_store %arg5[%c0_21, %c0_22, %c0_23, %c0_24], %60 {strides = array<i32>} : memref<1x16x16x128xf32, #tpu.memory_space<vmem>>, vector<1x16x16x128xf32>,
    return
  }
  func.func @transform_0(%arg0: i32) -> (i32, i32, i32, i32) {
    %c0_i32 = arith.constant 0 : i32
    %c0_i32_0 = arith.constant 0 : i32
    %c0_i32_1 = arith.constant 0 : i32
    %c0_i32_2 = arith.constant 0 : i32
    return %arg0, %c0_i32, %c0_i32_0, %c0_i32_1 : i32, i32, i32, i32
  }
  func.func @transform_1(%arg0: i32) -> (i32, i32) {
    %c0_i32 = arith.constant 0 : i32
    %c0_i32_0 = arith.constant 0 : i32
    %c0_i32_1 = arith.constant 0 : i32
    return %c0_i32, %c0_i32_0 : i32, i32
  }
  func.func @transform_2(%arg0: i32) -> (i32, i32) {
    %c0_i32 = arith.constant 0 : i32
    %c0_i32_0 = arith.constant 0 : i32
    %c0_i32_1 = arith.constant 0 : i32
    return %c0_i32, %c0_i32_0 : i32, i32
  }
  func.func @transform_3(%arg0: i32) -> (i32, i32) {
    %c0_i32 = arith.constant 0 : i32
    %c0_i32_0 = arith.constant 0 : i32
    %c0_i32_1 = arith.constant 0 : i32
    return %c0_i32, %c0_i32_0 : i32, i32
  }
  func.func @transform_4(%arg0: i32) -> (i32, i32, i32, i32) {
    %c0_i32 = arith.constant 0 : i32
    %c0_i32_0 = arith.constant 0 : i32
    %c0_i32_1 = arith.constant 0 : i32
    %c0_i32_2 = arith.constant 0 : i32
    return %arg0, %c0_i32, %c0_i32_0, %c0_i32_1 : i32, i32, i32, i32
  }
  func.func @transform_5(%arg0: i32) -> (i32, i32, i32) {
    %c0_i32 = arith.constant 0 : i32
    %c0_i32_0 = arith.constant 0 : i32
    %c0_i32_1 = arith.constant 0 : i32
    return %arg0, %c0_i32, %c0_i32_0 : i32, i32, i32
  }
  func.func @transform_6(%arg0: i32) -> (i32, i32, i32) {
    %c0_i32 = arith.constant 0 : i32
    %c0_i32_0 = arith.constant 0 : i32
    %c0_i32_1 = arith.constant 0 : i32
    return %arg0, %c0_i32, %c0_i32_0 : i32, i32, i32
  }
}

module attributes {stable_mosaic.version = 11 : i64} {
  func.func @_bn2_add_relu_kernel(%arg0: i32, %arg1: memref<1x16x16x128xf32, #tpu.memory_space<vmem>>, %arg2: memref<1x16x16x128xf32, #tpu.memory_space<vmem>>, %arg3: memref<1x128xf32, #tpu.memory_space<vmem>>, %arg4: memref<1x128xf32, #tpu.memory_space<vmem>>, %arg5: memref<1x16x16x128xf32, #tpu.memory_space<vmem>>) attributes {dimension_semantics = [#tpu.dimension_semantics<parallel>], iteration_bounds = array<i64: 2>, scalar_prefetch = 0 : i64, scratch_operands = 0 : i64, tpu.core_type = #tpu.core_type<tc>, window_params = [{transform_indices = @transform_0, window_bounds = array<i64: 1, 16, 16, 128>}, {transform_indices = @transform_1, window_bounds = array<i64: 1, 16, 16, 128>}, {pipeline_mode = #tpu.pipeline_mode<synchronous>, transform_indices = @transform_2, window_bounds = array<i64: 1, 128>}, {pipeline_mode = #tpu.pipeline_mode<synchronous>, transform_indices = @transform_3, window_bounds = array<i64: 1, 128>}, {transform_indices = @transform_4, window_bounds = array<i64: 1, 16, 16, 128>}]} {
    %c0 = arith.constant 0 : index
    %c0_0 = arith.constant 0 : index
    %c0_1 = arith.constant 0 : index
    %c0_2 = arith.constant 0 : index
    %0 = vector.load %arg1[%c0, %c0_0, %c0_1, %c0_2] : memref<1x16x16x128xf32, #tpu.memory_space<vmem>>, vector<1x16x16x128xf32>
    %c0_3 = arith.constant 0 : index
    %c0_4 = arith.constant 0 : index
    %1 = vector.load %arg3[%c0_3, %c0_4] : memref<1x128xf32, #tpu.memory_space<vmem>>, vector<1x128xf32>
    %2 = vector.shape_cast %1 : vector<1x128xf32> to vector<1x1x1x128xf32>
    %3 = vector.broadcast %2 : vector<1x1x1x128xf32> to vector<1x16x16x128xf32>
    %4 = arith.mulf %0, %3 : vector<1x16x16x128xf32>
    %c0_5 = arith.constant 0 : index
    %c0_6 = arith.constant 0 : index
    %5 = vector.load %arg4[%c0_5, %c0_6] : memref<1x128xf32, #tpu.memory_space<vmem>>, vector<1x128xf32>
    %6 = vector.shape_cast %5 : vector<1x128xf32> to vector<1x1x1x128xf32>
    %7 = vector.broadcast %6 : vector<1x1x1x128xf32> to vector<1x16x16x128xf32>
    %8 = arith.addf %4, %7 : vector<1x16x16x128xf32>
    %c0_7 = arith.constant 0 : index
    %c0_8 = arith.constant 0 : index
    %c0_9 = arith.constant 0 : index
    %c0_10 = arith.constant 0 : index
    %9 = vector.load %arg2[%c0_7, %c0_8, %c0_9, %c0_10] : memref<1x16x16x128xf32, #tpu.memory_space<vmem>>, vector<1x16x16x128xf32>
    %10 = arith.addf %8, %9 : vector<1x16x16x128xf32>
    %cst = arith.constant 0.000000e+00 : f32
    %11 = vector.broadcast %cst : f32 to vector<1x16x16x128xf32>
    %12 = arith.maximumf %10, %11 : vector<1x16x16x128xf32>
    %c0_11 = arith.constant 0 : index
    %c0_12 = arith.constant 0 : index
    %c0_13 = arith.constant 0 : index
    %c0_14 = arith.constant 0 : index
    %13 = vector.load %arg5[%c0_11, %c0_12, %c0_13, %c0_14] : memref<1x16x16x128xf32, #tpu.memory_space<vmem>>, vector<1x16x16x128xf32>
    tpu.vector_store %arg5[%c0_11, %c0_12, %c0_13, %c0_14], %12 {strides = array<i32>} : memref<1x16x16x128xf32, #tpu.memory_space<vmem>>, vector<1x16x16x128xf32>,
    return
  }
  func.func @transform_0(%arg0: i32) -> (i32, i32, i32, i32) {
    %c0_i32 = arith.constant 0 : i32
    %c0_i32_0 = arith.constant 0 : i32
    %c0_i32_1 = arith.constant 0 : i32
    %c0_i32_2 = arith.constant 0 : i32
    return %arg0, %c0_i32, %c0_i32_0, %c0_i32_1 : i32, i32, i32, i32
  }
  func.func @transform_1(%arg0: i32) -> (i32, i32, i32, i32) {
    %c0_i32 = arith.constant 0 : i32
    %c0_i32_0 = arith.constant 0 : i32
    %c0_i32_1 = arith.constant 0 : i32
    %c0_i32_2 = arith.constant 0 : i32
    return %arg0, %c0_i32, %c0_i32_0, %c0_i32_1 : i32, i32, i32, i32
  }
  func.func @transform_2(%arg0: i32) -> (i32, i32) {
    %c0_i32 = arith.constant 0 : i32
    %c0_i32_0 = arith.constant 0 : i32
    %c0_i32_1 = arith.constant 0 : i32
    return %c0_i32, %c0_i32_0 : i32, i32
  }
  func.func @transform_3(%arg0: i32) -> (i32, i32) {
    %c0_i32 = arith.constant 0 : i32
    %c0_i32_0 = arith.constant 0 : i32
    %c0_i32_1 = arith.constant 0 : i32
    return %c0_i32, %c0_i32_0 : i32, i32
  }
  func.func @transform_4(%arg0: i32) -> (i32, i32, i32, i32) {
    %c0_i32 = arith.constant 0 : i32
    %c0_i32_0 = arith.constant 0 : i32
    %c0_i32_1 = arith.constant 0 : i32
    %c0_i32_2 = arith.constant 0 : i32
    return %arg0, %c0_i32, %c0_i32_0, %c0_i32_1 : i32, i32, i32, i32
  }
}

</mosaic_0001>

<bundles_post_ra>
// kernel: residual_block_forward.5
= control target key start
LH: loop header
LB: loop body
LE: loop exit
PB: predicated region body
PF: predicated region fallthrough
CT: control target
= control target key end

     0   :  { %9 = vsyncpa [#allocation3], 0  ;;  %s984_s0 = inlined_call_operand.vmem [shape: f32[2,16,16,128], index: 0, kind: input, shape index: {}]   ;;  %s985_s1 = inlined_call_operand.vmem [shape: f32[2,16,16,128], index: 1, kind: input, shape index: {}]   ;;  %s986_s2 = inlined_call_operand.vmem [shape: f32[1,128], index: 2, kind: input, shape index: {}]   ;;  %s987_s3 = inlined_call_operand.vmem [shape: f32[1,128], index: 3, kind: input, shape index: {}]   ;;  %s988_s4 = inlined_call_operand.hbm [shape: f32[2,16,16,128], index: 4, kind: output, shape index: {}]  }
   0x1   :  { %11 = vsyncpa [#allocation3 + $0x1], 0  ;;  %s694_s15 = smov 0   ;;  %s696_s16 = smov 0  }
   0x2   :  { %s698_s17 = smov 0   ;;  %s700_s18 = smov 0  }
   0x3 LB: > { %s715_s19 = sadd.s32 4294967295, %s664_s18   ;;  %s542_s20 = sadd.s32 4294967294, %s664_s18   ;;  %s664_s18 = sphi %s700_s18, %s994_s18   ;;  %s660_s17 = sphi %s698_s17, %s993_s17   ;;  %s656_s16 = sphi %s696_s16, %s992_s16   ;;  %s652_s15 = sphi %s694_s15, %s991_s15  }
   0x4   : > { %s719_s21 = sadd.s32 1, %s664_s18   ;;  %s118_s22 = sadd.s32 1, %s660_s17 }
   0x5   : > { %s115_s23 = ssub.s32 %s664_s18, %s719_s21  ;;  %p128_p0 = scmp.ne.s32.totalorder %s660_s17, %s656_s16 }
   0x6   : > { %p116_p1 = scmp.eq.s32.totalorder %s115_s23, 0  ;;  %p129_p2 = scmp.eq.s32.totalorder %s715_s19, 1 }
   0x7   : > { %p134_p3 = scmp.ne.s32.totalorder %s656_s16, %s652_s15  ;;  %p135_p4 = scmp.eq.s32.totalorder %s542_s20, 1 }
   0x8   : > { %s730_s24 = scalar_select %p116_p1, %s660_s17, %s118_s22  }
   0x9   : > { %p732_p5 = por %p129_p2, %p128_p0  ;;  %p736_p6 = por %p135_p4, %p134_p3 }
   0xa   : > { %p545_p7 = scmp.ge.s32.totalorder %s664_s18, 1  ;;  %p175_p8 = scmp.lt.s32.totalorder %s664_s18, 3 }
   0xc   : > { %p176_p9 = pnand %p545_p7, %p175_p8 }
   0xd   : > { %p206_p10 = scmp.lt.s32.totalorder (!%p176_p9), %s715_s19, 1  ;;  %v747_v0 = vld [vmem:[%s986_s2] ss:$0 sm:$0xff] (!%p176_p9)  ;;  %s203_s11 = sand.u32 (!%p176_p9), 1, %s656_s16  }
   0xe   : > { %179 = sbr.rel (%p176_p9) target bundleno = 78 (0x4e), region = 36  ;;  %v764_v2 = vld [vmem:[%s987_s3] ss:$0 sm:$0xff] (!%p176_p9)  ;;  %s777_s14 = sshll.u32 (!%p176_p9), %s203_s11, 8 }
   0xf   : > { %s807_s20 = scalar_lea.vmem (!%p176_p9), [#allocation2], %s777_s14  ;;  %s560_s22 = sshll.u32 (!%p176_p9), %s715_s19, 12 }
  0x10   : > { %s468_s23 = sshll.u32 (!%p176_p9), %s807_s20, 4  ;;  %s934_s29 = scalar_lea.hbm (!%p176_p9), %s988_s4, %s560_s22  ;;  %s936_s23 = int_to_ptr.vmem [resolvable:$true] %s468_s23 }
  0x11   : > { %s602_s30 = scalar_lea.vmem (!%p176_p9), %s936_s23, 4096  ;;  %s666_s5 = smov (!%p176_p9), [#allocation2]  }
  0x12   : > { %p603_p11 = scmp.ne.s32.totalorder (!%p176_p9), %s936_s23, %s602_s30  ;;  %s606_s6 = sshll.u32 (!%p176_p9), %s666_s5, 4  ;;  %s607_s6 = int_to_ptr.vmem [resolvable:$false] %s606_s6 }
  0x13   : > { %p609_p0 = scmp.lt.s32.totalorder (!%p176_p9), %s936_s23, %s607_s6 }
  0x14   : > { %p604_p12 = pnand (!%p176_p9), %p603_p11, %p732_p5 }
  0x15   : > { %s207_s27 = scalar_select %p206_p10, %s715_s19, 1 }
  0x16   : > { %s943_s19 = scalar_lea.sflag [#allocation3], %s203_s11  ;;  %p605_p13 = pneg %p604_p12 }
  0x17   : > { %s558_s28 = sshll.u32 %s207_s27, 8 }
  0x18   : > { %s752_s7 = scalar_lea.vmem %s984_s0, %s558_s28  ;;  %s757_s10 = scalar_lea.vmem %s985_s1, %s558_s28 }
  0x19   : > { %v216_v1 = vld [vmem:[%s752_s7] sm:$0xff]  ;;  %v217_v3 = vld [vmem:[%s752_s7 + $0x8] sm:$0xff]  ;;  %v218_v7 = vld [vmem:[%s752_s7 + $0x10] sm:$0xff] }
  0x1a   : > { %v255_v4 = vmul.f32 %v747_v0, %v216_v1  ;;  %v326_v5 = vld [vmem:[%s757_s10] sm:$0xff]  ;;  %v256_v6 = vmul.f32 %v747_v0, %v217_v3  ;;  %v327_v8 = vld [vmem:[%s757_s10 + $0x8] sm:$0xff]  ;;  %v257_v9 = vmul.f32 %v747_v0, %v218_v7  ;;  %v219_v10 = vld [vmem:[%s752_s7 + $0x18] sm:$0xff] }
  0x1b   : > { %v220_v11 = vld [vmem:[%s752_s7 + $0x20] sm:$0xff]  ;;  %v328_v14 = vld [vmem:[%s757_s10 + $0x10] sm:$0xff]  ;;  %v258_v15 = vmul.f32 %v747_v0, %v219_v10  ;;  %v329_v16 = vld [vmem:[%s757_s10 + $0x18] sm:$0xff] }
  0x1c   : > { %v294_v12 = vadd.f32 %v764_v2, %v255_v4  ;;  %v295_v13 = vadd.f32 %v764_v2, %v256_v6  ;;  %v259_v17 = vmul.f32 %v747_v0, %v220_v11  ;;  %v221_v18 = vld [vmem:[%s752_s7 + $0x28] sm:$0xff]  ;;  %v296_v19 = vadd.f32 %v764_v2, %v257_v9  ;;  %v330_v20 = vld [vmem:[%s757_s10 + $0x20] sm:$0xff]  ;;  %v222_v22 = vld [vmem:[%s752_s7 + $0x30] sm:$0xff] }
  0x1d   : > { %v260_v21 = vmul.f32 %v747_v0, %v221_v18  ;;  %v223_v23 = vld [vmem:[%s752_s7 + $0x38] sm:$0xff]  ;;  %v297_v26 = vadd.f32 %v764_v2, %v258_v15  ;;  %v331_v28 = vld [vmem:[%s757_s10 + $0x28] sm:$0xff]  ;;  %v261_v31 = vmul.f32 %v747_v0, %v222_v22  ;;  %v224_v33 = vld [vmem:[%s752_s7 + $0x40] sm:$0xff] }
  0x1e   : > { %v358_v24 = vadd.f32 %v326_v5, %v294_v12  ;;  %v359_v25 = vadd.f32 %v327_v8, %v295_v13  ;;  %v298_v27 = vadd.f32 %v764_v2, %v259_v17  ;;  %v360_v29 = vadd.f32 %v328_v14, %v296_v19  ;;  %v225_v34 = vld [vmem:[%s752_s7 + $0x48] sm:$0xff]  ;;  %v332_v39 = vld [vmem:[%s757_s10 + $0x30] sm:$0xff]  ;;  %v333_v40 = vld [vmem:[%s757_s10 + $0x38] sm:$0xff] }
  0x1f   : > { %v299_v30 = vadd.f32 %v764_v2, %v260_v21  ;;  %v262_v32 = vmul.f32 %v747_v0, %v223_v23  ;;  %v361_v37 = vadd.f32 %v329_v16, %v297_v26  ;;  %v226_v41 = vld [vmem:[%s752_s7 + $0x50] sm:$0xff]  ;;  %v300_v44 = vadd.f32 %v764_v2, %v261_v31  ;;  %v227_v46 = vld [vmem:[%s752_s7 + $0x58] sm:$0xff]  ;;  %v228_v47 = vld [vmem:[%s752_s7 + $0x60] sm:$0xff] }
  0x20   : > { %v390_v35 = vmax.f32 %v358_v24, 0.0  ;;  %v391_v36 = vmax.f32 %v359_v25, 0.0  ;;  %v362_v38 = vadd.f32 %v330_v20, %v298_v27  ;;  %v392_v42 = vmax.f32 %v360_v29, 0.0  ;;  %v229_v52 = vld [vmem:[%s752_s7 + $0x68] sm:$0xff]  ;;  %v334_v56 = vld [vmem:[%s757_s10 + $0x40] sm:$0xff]  ;;  %v336_v61 = vld [vmem:[%s757_s10 + $0x50] sm:$0xff] }
  0x21   : > { %v363_v43 = vadd.f32 %v331_v28, %v299_v30  ;;  %v301_v45 = vadd.f32 %v764_v2, %v262_v32  ;;  %v393_v48 = vmax.f32 %v361_v37, 0.0  ;;  %v263_v50 = vmul.f32 %v747_v0, %v224_v33  ;;  %v335_v57 = vld [vmem:[%s757_s10 + $0x48] sm:$0xff]  ;;  %v230_v1 = vld [vmem:[%s752_s7 + $0x70] sm:$0xff]  ;;  %v231_v3 = vld [vmem:[%s752_s7 + $0x78] sm:$0xff] }
  0x22   : > { %422 = vst [vmem:[%s807_s20] sm:$0xff] %v390_v35  ;;  %423 = vst [vmem:[%s807_s20 + $0x8] sm:$0xff] %v391_v36  ;;  %v394_v49 = vmax.f32 %v362_v38, 0.0  ;;  %v264_v51 = vmul.f32 %v747_v0, %v225_v34  ;;  %v364_v54 = vadd.f32 %v332_v39, %v300_v44  ;;  %v265_v58 = vmul.f32 %v747_v0, %v226_v41  ;;  %v337_v7 = vld [vmem:[%s757_s10 + $0x58] sm:$0xff]  ;;  %v338_v8 = vld [vmem:[%s757_s10 + $0x60] sm:$0xff] }
  0x23   : > { %424 = vst [vmem:[%s807_s20 + $0x10] sm:$0xff] %v392_v42  ;;  %v395_v53 = vmax.f32 %v363_v43, 0.0  ;;  %v365_v55 = vadd.f32 %v333_v40, %v301_v45  ;;  %425 = vst [vmem:[%s807_s20 + $0x18] sm:$0xff] %v393_v48  ;;  %v302_v59 = vadd.f32 %v764_v2, %v263_v50  ;;  %v266_v62 = vmul.f32 %v747_v0, %v227_v46  ;;  %v339_v14 = vld [vmem:[%s757_s10 + $0x68] sm:$0xff]  ;;  %v232_v19 = vld [vmem:[%s752_s7 + $0x80] sm:$0xff] }
  0x24   : > { %426 = vst [vmem:[%s807_s20 + $0x20] sm:$0xff] %v394_v49  ;;  %v303_v60 = vadd.f32 %v764_v2, %v264_v51  ;;  %v267_v63 = vmul.f32 %v747_v0, %v228_v47  ;;  %v396_v4 = vmax.f32 %v364_v54, 0.0  ;;  %v304_v6 = vadd.f32 %v764_v2, %v265_v58  ;;  %v233_v20 = vld [vmem:[%s752_s7 + $0x88] sm:$0xff]  ;;  %v340_v25 = vld [vmem:[%s757_s10 + $0x70] sm:$0xff]  ;;  %v341_v26 = vld [vmem:[%s757_s10 + $0x78] sm:$0xff] }
  0x25   : > { %427 = vst [vmem:[%s807_s20 + $0x28] sm:$0xff] %v395_v53  ;;  %v397_v5 = vmax.f32 %v365_v55, 0.0  ;;  %v268_v9 = vmul.f32 %v747_v0, %v229_v52  ;;  %v366_v10 = vadd.f32 %v334_v56, %v302_v59  ;;  %v305_v12 = vadd.f32 %v764_v2, %v266_v62  ;;  %v234_v27 = vld [vmem:[%s752_s7 + $0x90] sm:$0xff]  ;;  %v235_v32 = vld [vmem:[%s752_s7 + $0x98] sm:$0xff]  ;;  %v236_v33 = vld [vmem:[%s752_s7 + $0xa0] sm:$0xff] }
  0x26   : > { %v367_v11 = vadd.f32 %v335_v57, %v303_v60  ;;  %v306_v13 = vadd.f32 %v764_v2, %v267_v63  ;;  %428 = vst [vmem:[%s807_s20 + $0x30] sm:$0xff] %v396_v4  ;;  %v368_v15 = vadd.f32 %v336_v61, %v304_v6  ;;  %v269_v17 = vmul.f32 %v747_v0, %v230_v1  ;;  %v237_v38 = vld [vmem:[%s752_s7 + $0xa8] sm:$0xff]  ;;  %v342_v42 = vld [vmem:[%s757_s10 + $0x80] sm:$0xff]  ;;  %v344_v47 = vld [vmem:[%s757_s10 + $0x90] sm:$0xff] }
  0x27   : > { %429 = vst [vmem:[%s807_s20 + $0x38] sm:$0xff] %v397_v5  ;;  %v307_v16 = vadd.f32 %v764_v2, %v268_v9  ;;  %v270_v18 = vmul.f32 %v747_v0, %v231_v3  ;;  %v398_v21 = vmax.f32 %v366_v10, 0.0  ;;  %v369_v23 = vadd.f32 %v337_v7, %v305_v12  ;;  %v343_v43 = vld [vmem:[%s757_s10 + $0x88] sm:$0xff]  ;;  %v238_v50 = vld [vmem:[%s752_s7 + $0xb0] sm:$0xff]  ;;  %v239_v51 = vld [vmem:[%s752_s7 + $0xb8] sm:$0xff] }
  0x28   : > { %v399_v22 = vmax.f32 %v367_v11, 0.0  ;;  %v370_v24 = vadd.f32 %v338_v8, %v306_v13  ;;  %v400_v28 = vmax.f32 %v368_v15, 0.0  ;;  %v308_v30 = vadd.f32 %v764_v2, %v269_v17  ;;  %v345_v55 = vld [vmem:[%s757_s10 + $0x98] sm:$0xff]  ;;  %v346_v56 = vld [vmem:[%s757_s10 + $0xa0] sm:$0xff]  ;;  %v347_v62 = vld [vmem:[%s757_s10 + $0xa8] sm:$0xff] }
  0x29   : > { %v371_v29 = vadd.f32 %v339_v14, %v307_v16  ;;  %v309_v31 = vadd.f32 %v764_v2, %v270_v18  ;;  %430 = vst [vmem:[%s807_s20 + $0x40] sm:$0xff] %v398_v21  ;;  %v401_v34 = vmax.f32 %v369_v23, 0.0  ;;  %v271_v36 = vmul.f32 %v747_v0, %v232_v19  ;;  %v240_v5 = vld [vmem:[%s752_s7 + $0xc0] sm:$0xff]  ;;  %v241_v6 = vld [vmem:[%s752_s7 + $0xc8] sm:$0xff]  ;;  %v348_v11 = vld [vmem:[%s757_s10 + $0xb0] sm:$0xff] }
  0x2a   : > { %431 = vst [vmem:[%s807_s20 + $0x48] sm:$0xff] %v399_v22  ;;  %v402_v35 = vmax.f32 %v370_v24, 0.0  ;;  %v272_v37 = vmul.f32 %v747_v0, %v233_v20  ;;  %432 = vst [vmem:[%s807_s20 + $0x50] sm:$0xff] %v400_v28  ;;  %v372_v40 = vadd.f32 %v340_v25, %v308_v30  ;;  %v273_v44 = vmul.f32 %v747_v0, %v234_v27  ;;  %v349_v12 = vld [vmem:[%s757_s10 + $0xb8] sm:$0xff]  ;;  %v242_v13 = vld [vmem:[%s752_s7 + $0xd0] sm:$0xff] }
  0x2b   : > { %v403_v39 = vmax.f32 %v371_v29, 0.0  ;;  %v373_v41 = vadd.f32 %v341_v26, %v309_v31  ;;  %433 = vst [vmem:[%s807_s20 + $0x58] sm:$0xff] %v401_v34  ;;  %v310_v45 = vadd.f32 %v764_v2, %v271_v36  ;;  %v274_v48 = vmul.f32 %v747_v0, %v235_v32  ;;  %v243_v18 = vld [vmem:[%s752_s7 + $0xd8] sm:$0xff]  ;;  %v244_v19 = vld [vmem:[%s752_s7 + $0xe0] sm:$0xff]  ;;  %v245_v24 = vld [vmem:[%s752_s7 + $0xe8] sm:$0xff] }
  0x2c   : > { %434 = vst [vmem:[%s807_s20 + $0x60] sm:$0xff] %v402_v35  ;;  %v311_v46 = vadd.f32 %v764_v2, %v272_v37  ;;  %v275_v49 = vmul.f32 %v747_v0, %v236_v33  ;;  %v404_v52 = vmax.f32 %v372_v40, 0.0  ;;  %v312_v54 = vadd.f32 %v764_v2, %v273_v44  ;;  %v350_v28 = vld [vmem:[%s757_s10 + $0xc0] sm:$0xff]  ;;  %v351_v29 = vld [vmem:[%s757_s10 + $0xc8] sm:$0xff]  ;;  %v352_v33 = vld [vmem:[%s757_s10 + $0xd0] sm:$0xff] }
  0x2d   : > { %435 = vst [vmem:[%s807_s20 + $0x68] sm:$0xff] %v403_v39  ;;  %v405_v53 = vmax.f32 %v373_v41, 0.0  ;;  %v276_v57 = vmul.f32 %v747_v0, %v237_v38  ;;  %v374_v58 = vadd.f32 %v342_v42, %v310_v45  ;;  %v313_v60 = vadd.f32 %v764_v2, %v274_v48  ;;  %v246_v36 = vld [vmem:[%s752_s7 + $0xf0] sm:$0xff]  ;;  %v247_v37 = vld [vmem:[%s752_s7 + $0xf8] sm:$0xff]  ;;  %v354_v42 = vld [vmem:[%s757_s10 + $0xe0] sm:$0xff]  ;;  %s608_s7 = scalar_lea.vmem %s607_s6, 8192 }
  0x2e   : > { %v375_v59 = vadd.f32 %v343_v43, %v311_v46  ;;  %v314_v61 = vadd.f32 %v764_v2, %v275_v49  ;;  %436 = vst [vmem:[%s807_s20 + $0x70] sm:$0xff] %v404_v52  ;;  %v376_v63 = vadd.f32 %v344_v47, %v312_v54  ;;  %v277_v3 = vmul.f32 %v747_v0, %v238_v50  ;;  %v353_v41 = vld [vmem:[%s757_s10 + $0xd8] sm:$0xff]  ;;  %v355_v48 = vld [vmem:[%s757_s10 + $0xe8] sm:$0xff]  ;;  %p610_p1 = scmp.lt.s32.totalorder %s608_s7, %s602_s30 }
  0x2f   : > { %437 = vst [vmem:[%s807_s20 + $0x78] sm:$0xff] %v405_v53  ;;  %v315_v1 = vadd.f32 %v764_v2, %v276_v57  ;;  %v278_v4 = vmul.f32 %v747_v0, %v239_v51  ;;  %v406_v7 = vmax.f32 %v374_v58, 0.0  ;;  %v377_v9 = vadd.f32 %v345_v55, %v313_v60  ;;  %v356_v57 = vld [vmem:[%s757_s10 + $0xf0] sm:$0xff]  ;;  %v357_v58 = vld [vmem:[%s757_s10 + $0xf8] sm:$0xff] }
  0x30   : > { %v407_v8 = vmax.f32 %v375_v59, 0.0  ;;  %v378_v10 = vadd.f32 %v346_v56, %v314_v61  ;;  %v408_v14 = vmax.f32 %v376_v63, 0.0  ;;  %v316_v16 = vadd.f32 %v764_v2, %v277_v3  ;;  %p611_p2 = por %p610_p1, %p609_p0 }
  0x31   : > { %v379_v15 = vadd.f32 %v347_v62, %v315_v1  ;;  %v317_v17 = vadd.f32 %v764_v2, %v278_v4  ;;  %438 = vst [vmem:[%s807_s20 + $0x80] sm:$0xff] %v406_v7  ;;  %v409_v20 = vmax.f32 %v377_v9, 0.0  ;;  %v279_v22 = vmul.f32 %v747_v0, %v240_v5 }
  0x32   : > { %439 = vst [vmem:[%s807_s20 + $0x88] sm:$0xff] %v407_v8  ;;  %v410_v21 = vmax.f32 %v378_v10, 0.0  ;;  %v280_v23 = vmul.f32 %v747_v0, %v241_v6  ;;  %440 = vst [vmem:[%s807_s20 + $0x90] sm:$0xff] %v408_v14  ;;  %v380_v26 = vadd.f32 %v348_v11, %v316_v16  ;;  %v281_v30 = vmul.f32 %v747_v0, %v242_v13  ;;  %p612_p3 = pnand %p611_p2, %p605_p13 }
  0x33   : > { %v411_v25 = vmax.f32 %v379_v15, 0.0  ;;  %v381_v27 = vadd.f32 %v349_v12, %v317_v17  ;;  %441 = vst [vmem:[%s807_s20 + $0x98] sm:$0xff] %v409_v20  ;;  %v318_v31 = vadd.f32 %v764_v2, %v279_v22  ;;  %v282_v34 = vmul.f32 %v747_v0, %v243_v18 }
  0x34   : > { %442 = vst [vmem:[%s807_s20 + $0xa0] sm:$0xff] %v410_v21  ;;  %v319_v32 = vadd.f32 %v764_v2, %v280_v23  ;;  %v283_v35 = vmul.f32 %v747_v0, %v244_v19  ;;  %v412_v38 = vmax.f32 %v380_v26, 0.0  ;;  %v320_v40 = vadd.f32 %v764_v2, %v281_v30 }
  0x35   : > { %443 = vst [vmem:[%s807_s20 + $0xa8] sm:$0xff] %v411_v25  ;;  %v413_v39 = vmax.f32 %v381_v27, 0.0  ;;  %v284_v43 = vmul.f32 %v747_v0, %v245_v24  ;;  %v382_v44 = vadd.f32 %v350_v28, %v318_v31  ;;  %v321_v46 = vadd.f32 %v764_v2, %v282_v34 }
  0x36   : > { %v383_v45 = vadd.f32 %v351_v29, %v319_v32  ;;  %v322_v47 = vadd.f32 %v764_v2, %v283_v35  ;;  %444 = vst [vmem:[%s807_s20 + $0xb0] sm:$0xff] %v412_v38  ;;  %v384_v49 = vadd.f32 %v352_v33, %v320_v40  ;;  %v285_v51 = vmul.f32 %v747_v0, %v246_v36 }
  0x37   : > { %445 = vst [vmem:[%s807_s20 + $0xb8] sm:$0xff] %v413_v39  ;;  %v323_v50 = vadd.f32 %v764_v2, %v284_v43  ;;  %v286_v52 = vmul.f32 %v747_v0, %v247_v37  ;;  %v414_v53 = vmax.f32 %v382_v44, 0.0  ;;  %v385_v55 = vadd.f32 %v353_v41, %v321_v46 }
  0x38   : > { %v415_v54 = vmax.f32 %v383_v45, 0.0  ;;  %v386_v56 = vadd.f32 %v354_v42, %v322_v47  ;;  %v416_v59 = vmax.f32 %v384_v49, 0.0  ;;  %v324_v61 = vadd.f32 %v764_v2, %v285_v51 }
  0x39   : > { %v387_v60 = vadd.f32 %v355_v48, %v323_v50  ;;  %v325_v62 = vadd.f32 %v764_v2, %v286_v52  ;;  %446 = vst [vmem:[%s807_s20 + $0xc0] sm:$0xff] %v414_v53  ;;  %v417_v0 = vmax.f32 %v385_v55, 0.0 }
  0x3a   : > { %447 = vst [vmem:[%s807_s20 + $0xc8] sm:$0xff] %v415_v54  ;;  %v418_v63 = vmax.f32 %v386_v56, 0.0  ;;  %448 = vst [vmem:[%s807_s20 + $0xd0] sm:$0xff] %v416_v59  ;;  %v388_v3 = vadd.f32 %v356_v57, %v324_v61 }
  0x3b   : > { %v419_v1 = vmax.f32 %v387_v60, 0.0  ;;  %v389_v4 = vadd.f32 %v357_v58, %v325_v62  ;;  %449 = vst [vmem:[%s807_s20 + $0xd8] sm:$0xff] %v417_v0 }
  0x3c   : > { %450 = vst [vmem:[%s807_s20 + $0xe0] sm:$0xff] %v418_v63  ;;  %v420_v2 = vmax.f32 %v388_v3, 0.0 }
  0x3d   : > { %451 = vst [vmem:[%s807_s20 + $0xe8] sm:$0xff] %v419_v1  ;;  %v421_v5 = vmax.f32 %v389_v4, 0.0 }
  0x3e   : > { %452 = vst [vmem:[%s807_s20 + $0xf0] sm:$0xff] %v420_v2 }
  0x3f   : > { %453 = vst [vmem:[%s807_s20 + $0xf8] sm:$0xff] %v421_v5 }
  0x40   : > { %615 = shalt.err (!%p612_p3)
}
  0x41   : > { %s616_s8 = scalar_lea.hbm %s934_s29, 4096  ;;  %s620_s11 = scalar_lea.hbm %s988_s4, 8192 }
  0x42   : > { %p617_p4 = scmp.ne.s32.totalorder %s934_s29, %s616_s8  ;;  %p621_p9 = scmp.lt.u32.totalorder %s934_s29, %s988_s4 }
  0x43   : > { %p622_p10 = scmp.lt.u32.totalorder %s620_s11, %s616_s8  ;;  %p624_p12 = scmp.lt.u32.totalorder %s616_s8, %s934_s29 }
  0x44   : > { %p618_p7 = pnand %p617_p4, %p732_p5 }
  0x45   : > { %p623_p11 = por %p622_p10, %p621_p9 }
  0x46   : > { %p619_p8 = pneg %p618_p7 }
  0x47   : > { %p625_p13 = por %p624_p12, %p623_p11 }
  0x49   : > { %p626_p0 = pnand %p625_p13, %p619_p8 }
  0x4b   : > { %629 = shalt.err (!%p626_p0)
}
  0x4c   : > { %s667_s14 = smov 128   ;;  %s668_s20 = smov 8  }
  0x4d   : > { %561 = dma.vmem_to_hbm [thread:$0]  (%p732_p5), %s936_s23, 4096, %s934_s29, %s943_s19, %s667_s14, %s667_s14, %s668_s20  }
  0x4e PF: > { %p567_p1 = scmp.ge.s32.totalorder %s664_s18, 2  ;;  %s483_s22 = sand.u32 1, %s652_s15  }
  0x4f   : > { %s484_s27 = scalar_lea.sflag [#allocation3], %s483_s22 }
  0x50   : > { %p564_p2 = pnand %p567_p1, %p736_p6 }
  0x52   : > { %647 = dma.done.wait (!%p564_p2), %s484_s27, 4096  }
  0x53   : > { %649 = vsyncadd (!%p564_p2), %s484_s27, 4294963200  ;;  %p14_p3 = scmp.ge.s32.totalorder %s719_s21, 4   ;;  %s991_s15 = smov %s656_s16 }
  0x54   : > { %s992_s16 = smov %s660_s17  ;;  %s993_s17 = smov %s730_s24 }
  0x55   : > { %s994_s18 = smov %s719_s21  ;;  %16 = sbr.rel (!%p14_p3) target bundleno = 3 (0x3), region = 74 }
  0x5c   :  { %489 = vsyncpa [#allocation3], 1 }
  0x5d   :  { %491 = vsyncpa [#allocation3 + $0x1], 1 }

// kernel: residual_block_forward.4
= control target key start
LH: loop header
LB: loop body
LE: loop exit
PB: predicated region body
PF: predicated region fallthrough
CT: control target
= control target key end

     0   :  { %s3477_s21 = smov 0   ;;  %s4874_s0 = inlined_call_operand.vmem [shape: bf16[2,18,18,128], index: 0, kind: input, shape index: {}]   ;;  %s4875_s1 = inlined_call_operand.vmem [shape: bf16[1152,128], index: 1, kind: input, shape index: {}]   ;;  %s4876_s2 = inlined_call_operand.vmem [shape: f32[1,128], index: 2, kind: input, shape index: {}]   ;;  %s4877_s3 = inlined_call_operand.vmem [shape: f32[1,128], index: 3, kind: input, shape index: {}]   ;;  %s4878_s4 = inlined_call_operand.vmem [shape: f32[2,16,16,128], index: 4, kind: output, shape index: {0}]   ;;  %s4879_s5 = inlined_call_operand.vmem [shape: f32[2,1,128], index: 5, kind: output, shape index: {1}]   ;;  %s4880_s6 = inlined_call_operand.vmem [shape: f32[2,1,128], index: 6, kind: output, shape index: {2}]  }
   0x1 LB: > { %s2682_s22 = sadd.s32 4294967295, %s3439_s21   ;;  %p2686_p0 = scmp.ge.s32.totalorder %s3439_s21, 1  ;;  %s3439_s21 = sphi %s3477_s21, %s17_s21  }
   0x2   : > { %p217_p1 = scmp.lt.s32.totalorder %s3439_s21, 3 }
   0x4   : > { %p218_p2 = pnand %p2686_p0, %p217_p1 }
   0x6   : > { %221 = sbr.rel (%p218_p2) target bundleno = 654 (0x28e), region = 36 }
   0xd   : > { %v3359_v0 = vld [vmem:[%s4875_s1 + $0x40] sm:$0xff]   ;;  %p253_p3 = scmp.lt.s32.totalorder %s2682_s22, 1  ;;  %v3361_v2 = vld [vmem:[%s4875_s1 + $0x48] sm:$0xff]   ;;  %v3363_v4 = vld [vmem:[%s4875_s1 + $0x50] sm:$0xff]   ;;  %v554_v5 = vlaneseq  ;;  %v3441_v33 = vmov 0.0   ;;  %vm919_vm3 = vcmask 1046528  }
   0xe   : > { %v3360_v1 = vld [vmem:[%s4875_s1] sm:$0xff]   ;;  %2813 = vmatprep.subr.bf16.mxu0 %v3359_v0  ;;  %3333 = vmatprep.subr.bf16.mxu1 %v3359_v0  ;;  %v3362_v3 = vld [vmem:[%s4875_s1 + $0x8] sm:$0xff]   ;;  %v3364_v6 = vld [vmem:[%s4875_s1 + $0x10] sm:$0xff]   ;;  %vm678_vm2 = vsmask.f32 7424 }
   0xf   : > { %2814 = vmatpush3.bf16.msra.mxu0 %v3360_v1  ;;  %3341 = vmatpush3.bf16.msra.mxu1 %v3360_v1  ;;  %s4886_s22 = smov (!%p253_p3, %s2682_s22), 1  ;;  %v3365_v7 = vld [vmem:[%s4875_s1 + $0x58] sm:$0xff]   ;;  %v555_v8 = vshrl.u32 %v554_v5, 7  ;;  %v3367_v10 = vld [vmem:[%s4875_s1 + $0x60] sm:$0xff]   ;;  %v3369_v13 = vld [vmem:[%s4875_s1 + $0x68] sm:$0xff]  }
  0x10   : > { %2815 = vmatprep.subr.bf16.mxu0 %v3361_v2  ;;  %3334 = vmatprep.subr.bf16.mxu1 %v3361_v2  ;;  %s3349_s13 = smul.u32 216, %s4886_s22  ;;  %v3366_v9 = vld [vmem:[%s4875_s1 + $0x18] sm:$0xff]   ;;  %v3368_v12 = vld [vmem:[%s4875_s1 + $0x20] sm:$0xff]   ;;  %v3370_v25 = vld [vmem:[%s4875_s1 + $0x28] sm:$0xff]   ;;  %s265_s12 = scalar_lea.vmem %s4879_s5, %s4886_s22 }
  0x11   : > { %v557_v11 = vadd.s32 16, %v555_v8  ;;  %v3531_v16 = vld [vmem:[%s4876_s2] ss:$0 sm:$0xff]  ;;  %vm558_vm0 = vcmp.ge.s32.totalorder %v555_v8, 1  ;;  %v3371_v30 = vld [vmem:[%s4875_s1 + $0x70] sm:$0xff]   ;;  %v3373_v43 = vld [vmem:[%s4875_s1 + $0x78] sm:$0xff]   ;;  %s268_s15 = scalar_lea.vmem %s4880_s6, %s4886_s22 }
  0x12   : > { %s3518_s20 = scalar_lea.vmem %s4874_s0, %s3349_s13  ;;  %v3536_v20 = vld [vmem:[%s4877_s3] ss:$0 sm:$0xff]  ;;  %v3552_v34 = vsel %vm558_vm0, 1.0, %v3441_v33  ;;  %v3372_v39 = vld [vmem:[%s4875_s1 + $0x30] sm:$0xff]   ;;  %v3374_v57 = vld [vmem:[%s4875_s1 + $0x38] sm:$0xff]  }
  0x13   : > { %2816 = vmatpush3.bf16.msra.mxu0 %v3362_v3  ;;  %3342 = vmatpush3.bf16.msra.mxu1 %v3362_v3  ;;  %v2770_v14 = vld [vmem:[%s3518_s20] sm:$0xff]   ;;  %v272_v15 = vld [vmem:[%s3518_s20 + $0x8] sm:$0x1]  ;;  %v2810_v21 = vld [vmem:[%s3518_s20 + $0x90] sm:$0xff]   ;;  %vm569_vm1 = vcmp.le.s32.totalorder %v557_v11, 16 }
  0x14   : > { %2817 = vmatprep.subr.bf16.mxu0 %v3363_v4  ;;  %3335 = vmatprep.subr.bf16.mxu1 %v3363_v4  ;;  %v2771_v17 = vunpack.c.l.bf16 %v2770_v14  ;;  %v2772_v18 = vunpack.c.h.bf16 %v2770_v14  ;;  %v326_v19 = vunpack.c.l.bf16 %v272_v15  ;;  %v2795_v22 = vunpack.c.l.bf16 %v2810_v21  ;;  %v308_v24 = vld [vmem:[%s3518_s20 + $0x98] sm:$0x1]  ;;  %v273_v50 = vld [vmem:[%s3518_s20 + $0xc] sm:$0xff]   ;;  %v309_v51 = vld [vmem:[%s3518_s20 + $0x9c] sm:$0xff]  }
  0x15   : > { %v2796_v23 = vunpack.c.h.bf16 %v2810_v21  ;;  %v362_v29 = vunpack.c.l.bf16 %v308_v24  ;;  %v3564_v42 = vsel %vm569_vm1, 1.0, %v3441_v33  ;;  %v275_v56 = vld [vmem:[%s3518_s20 + $0x14] sm:$0x1]  ;;  %v327_v59 = vunpack.c.l.bf16 %v273_v50  ;;  %v3375_v1 = vld [vmem:[%s4875_s1 + $0xc0] sm:$0xff]  }
  0x16   : > { %v385_v26 = vmul.f32 %v2771_v17, %v3531_v16  ;;  %v386_v27 = vmul.f32 %v2772_v18, %v3531_v16  ;;  %v387_v28 = vmul.f32 %v3531_v16, %v326_v19  ;;  %v421_v31 = vmul.f32 %v2795_v22, %v3531_v16  ;;  %v3376_v3 = vld [vmem:[%s4875_s1 + $0x140] sm:$0xff]  }
  0x17   : > { %2818 = vmatpush3.bf16.msra.mxu0 %v3364_v6  ;;  %3343 = vmatpush3.bf16.msra.mxu1 %v3364_v6  ;;  %v422_v32 = vmul.f32 %v2796_v23, %v3531_v16  ;;  %v423_v38 = vmul.f32 %v3531_v16, %v362_v29  ;;  %v328_v60 = vunpack.c.h.bf16 %v273_v50  ;;  %v329_v61 = vunpack.c.l.bf16 %v275_v56  ;;  %v3377_v33 = vld [vmem:[%s4875_s1 + $0x80] sm:$0xff]  }
  0x18   : > { %2819 = vmatprep.subr.bf16.mxu0 %v3365_v7  ;;  %3336 = vmatprep.subr.bf16.mxu1 %v3365_v7  ;;  %v446_v35 = vadd.f32 %v3536_v20, %v385_v26  ;;  %v447_v36 = vadd.f32 %v3536_v20, %v386_v27  ;;  %v448_v37 = vadd.f32 %v3536_v20, %v387_v28  ;;  %v363_v6 = vunpack.c.l.bf16 %v309_v51 }
  0x19   : > { %v482_v40 = vadd.f32 %v3536_v20, %v421_v31  ;;  %v483_v41 = vadd.f32 %v3536_v20, %v422_v32  ;;  %v484_v47 = vadd.f32 %v3536_v20, %v423_v38  ;;  %v388_v4 = vmul.f32 %v3531_v16, %v327_v59  ;;  %v3384_v38 = vld [vmem:[%s4875_s1 + $0x148] sm:$0xff]  }
  0x1a   : > { %v500_v44 = vmax.f32 %v446_v35, 0.0  ;;  %v501_v45 = vmax.f32 %v447_v36, 0.0  ;;  %v502_v46 = vmax.f32 %v448_v37, 0.0  ;;  %v389_v5 = vmul.f32 %v3531_v16, %v328_v60  ;;  %v3378_v35 = vld [vmem:[%s4875_s1 + $0x100] sm:$0xff]   ;;  %v2811_v59 = vld [vmem:[%s3518_s20 + $0xa8] sm:$0xff]  }
  0x1b   : > { %2820 = vmatpush3.bf16.msra.mxu0 %v3366_v9  ;;  %3344 = vmatpush3.bf16.msra.mxu1 %v3366_v9  ;;  %v536_v48 = vmax.f32 %v482_v40, 0.0  ;;  %v537_v49 = vmax.f32 %v483_v41, 0.0  ;;  %v538_v55 = vmax.f32 %v484_v47, 0.0  ;;  %v364_v11 = vunpack.c.h.bf16 %v309_v51  ;;  %v3380_v60 = vld [vmem:[%s4875_s1 + $0x88] sm:$0xff]  }
  0x1c   : > { %2821 = vmatprep.subr.bf16.mxu0 %v3367_v10  ;;  %3337 = vmatprep.subr.bf16.mxu1 %v3367_v10  ;;  %v588_v52 = vmul.f32 0.0, %v500_v44  ;;  %v589_v53 = vmul.f32 0.0, %v501_v45  ;;  %v590_v54 = vmul.f32 0.0, %v502_v46  ;;  %v311_v10 = vld [vmem:[%s3518_s20 + $0xa4] sm:$0x1]  ;;  %v390_v15 = vmul.f32 %v3531_v16, %v329_v61  ;;  %v3379_v46 = vld [vmem:[%s4875_s1 + $0xc8] sm:$0xff]  }
  0x1d   : > { %v624_v58 = vmul.f32 %v3552_v34, %v536_v48  ;;  %v626_v0 = vmul.f32 %v3564_v42, %v538_v55  ;;  %v449_v19 = vadd.f32 %v3536_v20, %v388_v4  ;;  %v450_v21 = vadd.f32 %v3536_v20, %v389_v5  ;;  %v278_v44 = vld [vmem:[%s3518_s20 + $0x20] sm:$0x1]  ;;  %v3381_v5 = vld [vmem:[%s4875_s1 + $0xd0] sm:$0xff]  }
  0x1e   : > { %v3577_v62 = vpack.c.bf16 %v589_v53, %v588_v52  ;;  %v3579_v63 = vpack.c.bf16 %v590_v54, %v590_v54  ;;  %v451_v24 = vadd.f32 %v3536_v20, %v390_v15  ;;  %v424_v29 = vmul.f32 %v3531_v16, %v363_v6  ;;  %v3386_v53 = vld [vmem:[%s4875_s1 + $0x108] sm:$0xff]  }
  0x1f   : > { %2822 = vmatpush3.bf16.msra.mxu0 %v3368_v12  ;;  %3345 = vmatpush3.bf16.msra.mxu1 %v3368_v12  ;;  %v3585_v2 = vpack.c.bf16 %v537_v49, %v624_v58  ;;  %v3596_v12 = vpack.c.bf16 %v626_v0, %v626_v0  ;;  %v503_v27 = vmax.f32 %v449_v19, 0.0  ;;  %v504_v28 = vmax.f32 %v450_v21, 0.0 }
  0x20   : > { %2823 = vmatprep.subr.bf16.mxu0 %v3369_v13  ;;  %3338 = vmatprep.subr.bf16.mxu1 %v3369_v13  ;;  %v680_v7 = vshrl.u32 %v3577_v62, 16  ;;  %v682_v8 = vshll.u32 %v3577_v62, 16  ;;  %v687_v9 = vshll.u32 %v3579_v63, 16  ;;  %v505_v36 = vmax.f32 %v451_v24, 0.0  ;;  %v3392_v24 = vld [vmem:[%s4875_s1 + $0x150] sm:$0xff]  }
  0x21   : > { %v824_v13 = vshrl.u32 %v3585_v2, 16  ;;  %v826_v14 = vshll.u32 %v3585_v2, 16  ;;  %v831_v23 = vshll.u32 %v3596_v12, 16  ;;  %v425_v37 = vmul.f32 %v3531_v16, %v364_v11 }
  0x22   : > { %v684_v17 = vrot.slane %v682_v8, 1  ;;  %v689_v18 = vrot.slane %v687_v9, 1  ;;  %v591_v40 = vmul.f32 %v3552_v34, %v503_v27  ;;  %v593_v47 = vmul.f32 %v3564_v42, %v505_v36  ;;  %v314_v9 = vld [vmem:[%s3518_s20 + $0xb0] sm:$0x1] }
  0x23   : > { %2824 = vmatpush3.bf16.msra.mxu0 %v3370_v25  ;;  %3346 = vmatpush3.bf16.msra.mxu1 %v3370_v25  ;;  %v828_v22 = vrot.slane %v826_v14, 1  ;;  %v365_v25 = vunpack.c.l.bf16 %v311_v10  ;;  %v833_v32 = vrot.slane %v831_v23, 1  ;;  %v486_v48 = vadd.f32 %v3536_v20, %v425_v37  ;;  %v3382_v14 = vld [vmem:[%s4875_s1 + $0x90] sm:$0xff]   ;;  %v279_v23 = vld [vmem:[%s3518_s20 + $0x24] sm:$0xff]  }
  0x24   : > { %2825 = vmatprep.subr.bf16.mxu0 %v3371_v30  ;;  %3339 = vmatprep.subr.bf16.mxu1 %v3371_v30  ;;  %v685_v26 = vor.u32 %v684_v17, %v680_v7  ;;  %v2805_v30 = vld [vmem:[%s3518_s20 + $0x18] sm:$0xff]   ;;  %v3632_v50 = vpack.c.bf16 %v504_v28, %v591_v40  ;;  %v3639_v55 = vpack.c.bf16 %v593_v47, %v593_v47  ;;  %v2799_v15 = vunpack.c.l.bf16 %v2811_v59 }
  0x25   : > { %v829_v31 = vor.u32 %v828_v22, %v824_v13  ;;  %v426_v41 = vmul.f32 %v3531_v16, %v365_v25  ;;  %v2775_v49 = vunpack.c.l.bf16 %v2805_v30  ;;  %v2776_v54 = vunpack.c.h.bf16 %v2805_v30  ;;  %v3385_v47 = vld [vmem:[%s4875_s1 + $0x98] sm:$0xff]  }
  0x26   : > { %v540_v56 = vmax.f32 %v486_v48, 0.0  ;;  %v692_v61 = vshrl.u32 %v3632_v50, 16  ;;  %v694_v0 = vshll.u32 %v3632_v50, 16  ;;  %v699_v4 = vshll.u32 %v3639_v55, 16 }
  0x27   : > { %2826 = vmatpush3.bf16.msra.mxu0 %v3372_v39  ;;  %3347 = vmatpush3.bf16.msra.mxu1 %v3372_v39  ;;  %v690_v39 = vsel %vm678_vm2, %v685_v26, %v689_v18  ;;  %v3623_v45 = vsel %vm678_vm2, %v829_v31, %v833_v32  ;;  %v487_v51 = vadd.f32 %v3536_v20, %v426_v41  ;;  %v3383_v18 = vld [vmem:[%s4875_s1 + $0xd8] sm:$0xff]   ;;  %v2800_v32 = vunpack.c.h.bf16 %v2811_v59 }
  0x28   : > { %2827 = vmatprep.subr.bf16.mxu0 %v3373_v43  ;;  %3340 = vmatprep.subr.bf16.mxu1 %v3373_v43  ;;  %v485_v43 = vadd.f32 %v3536_v20, %v424_v29  ;;  %v391_v58 = vmul.f32 %v2775_v49, %v3531_v16  ;;  %v392_v6 = vmul.f32 %v2776_v54, %v3531_v16  ;;  %v696_v10 = vrot.slane %v694_v0, 1  ;;  %v281_v49 = vld [vmem:[%s3518_s20 + $0x2c] sm:$0x1] }
  0x29   : > { %1630 = vmatprep.mubr.bf16.mxu0 %v690_v39  ;;  %1726 = vmatprep.mubr.bf16.mxu1 %v3623_v45  ;;  %v701_v17 = vrot.slane %v699_v4, 1  ;;  %v368_v37 = vunpack.c.l.bf16 %v314_v9  ;;  %v427_v41 = vmul.f32 %v2799_v15, %v3531_v16  ;;  %v335_v4 = vunpack.c.l.bf16 %v281_v49 }
  0x2a   : > { %v539_v52 = vmax.f32 %v485_v43, 0.0  ;;  %v452_v8 = vadd.f32 %v3536_v20, %v391_v58  ;;  %v453_v19 = vadd.f32 %v3536_v20, %v392_v6  ;;  %v697_v25 = vor.u32 %v696_v10, %v692_v61  ;;  %v317_v6 = vld [vmem:[%s3518_s20 + $0xbc] sm:$0x1] }
  0x2b   : > { %2828 = vmatpush3.bf16.msra.mxu0 %v3374_v57  ;;  %3348 = vmatpush3.bf16.msra.mxu1 %v3374_v57  ;;  %v332_v57 = vunpack.c.l.bf16 %v278_v44  ;;  %v428_v43 = vmul.f32 %v2800_v32, %v3531_v16  ;;  %v429_v48 = vmul.f32 %v3531_v16, %v368_v37  ;;  %v334_v61 = vunpack.c.h.bf16 %v279_v23 }
  0x2c   : > { %2925 = vmatprep.subr.bf16.mxu1 %v3375_v1  ;;  %3037 = vmatprep.subr.bf16.mxu0 %v3376_v3  ;;  %v541_v1 = vmax.f32 %v487_v51, 0.0  ;;  %v627_v3 = vmul.f32 %v3552_v34, %v539_v52  ;;  %v506_v22 = vmax.f32 %v452_v8, 0.0  ;;  %v507_v29 = vmax.f32 %v453_v19, 0.0  ;;  %v3388_v19 = vld [vmem:[%s4875_s1 + $0xa0] sm:$0xff]  }
  0x2d   : > { %v393_v7 = vmul.f32 %v3531_v16, %v332_v57  ;;  %v333_v51 = vunpack.c.l.bf16 %v279_v23  ;;  %v489_v58 = vadd.f32 %v3536_v20, %v428_v43  ;;  %v490_v59 = vadd.f32 %v3536_v20, %v429_v48  ;;  %v3389_v23 = vld [vmem:[%s4875_s1 + $0xe8] sm:$0xff]   ;;  %v3391_v48 = vld [vmem:[%s4875_s1 + $0xf0] sm:$0xff]  }
  0x2e   : > { %1631 = vmatmul.mubr.bf16.vlgmr.msra.gmra.mrb[0].mxu0 %v3577_v62  ;;  %1727 = vmatmul.mubr.bf16.vlgmr.msra.gmra.mrb[0].mxu1 %v3585_v2  ;;  %v629_v11 = vmul.f32 %v3564_v42, %v541_v1  ;;  %v3658_v13 = vpack.c.bf16 %v540_v56, %v627_v3  ;;  %v594_v31 = vmul.f32 %v3552_v34, %v506_v22 }
  0x2f   : > { %3038 = vmatpush3.bf16.msra.mxu0 %v3378_v35  ;;  %2926 = vmatpush3.bf16.msra.mxu1 %v3377_v33  ;;  %v454_v21 = vadd.f32 %v3536_v20, %v393_v7  ;;  %v3678_v33 = vsel %vm678_vm2, %v697_v25, %v701_v17  ;;  %v488_v56 = vadd.f32 %v3536_v20, %v427_v41  ;;  %v543_v7 = vmax.f32 %v489_v58, 0.0 }
  0x30   : > { %3039 = vmatprep.subr.bf16.mxu0 %v3384_v38  ;;  %2927 = vmatprep.subr.bf16.mxu1 %v3379_v46  ;;  %v3672_v26 = vpack.c.bf16 %v629_v11, %v629_v11  ;;  %v836_v27 = vshrl.u32 %v3658_v13, 16  ;;  %v838_v28 = vshll.u32 %v3658_v13, 16  ;;  %v3394_v38 = vld [vmem:[%s4875_s1 + $0x110] sm:$0xff]   ;;  %v3686_v40 = vpack.c.bf16 %v507_v29, %v594_v31  ;;  %v3399_v11 = vld [vmem:[%s4875_s1 + $0x158] sm:$0xff]   ;;  %v3390_v31 = vld [vmem:[%s4875_s1 + $0xa8] sm:$0xff]  }
  0x31   : > { %v508_v30 = vmax.f32 %v454_v21, 0.0  ;;  %1638 = vmatprep.mubr.bf16.mxu0 %v3678_v33  ;;  %v542_v3 = vmax.f32 %v488_v56, 0.0  ;;  %v544_v8 = vmax.f32 %v490_v59, 0.0  ;;  %v394_v9 = vmul.f32 %v3531_v16, %v333_v51  ;;  %v3403_v56 = vld [vmem:[%s4875_s1 + $0x120] sm:$0xff]  }
  0x32   : > { %v840_v35 = vrot.slane %v838_v28, 1  ;;  %v843_v36 = vshll.u32 %v3672_v26, 16  ;;  %v706_v54 = vshll.u32 %v3686_v40, 16  ;;  %v395_v10 = vmul.f32 %v3531_v16, %v334_v61  ;;  %v2806_v28 = vld [vmem:[%s3518_s20 + $0x30] sm:$0xff]  }
  0x33   : > { %3040 = vmatpush3.bf16.msra.mxu0 %v3386_v53  ;;  %2928 = vmatpush3.bf16.msra.mxu1 %v3380_v60  ;;  %v596_v39 = vmul.f32 %v3564_v42, %v508_v30  ;;  %v704_v53 = vshrl.u32 %v3686_v40, 16  ;;  %v3387_v60 = vld [vmem:[%s4875_s1 + $0xe0] sm:$0xff]   ;;  %v396_v21 = vmul.f32 %v3531_v16, %v335_v4  ;;  %v632_v22 = vmul.f32 %v3564_v42, %v544_v8 }
  0x34   : > { %2929 = vmatprep.subr.bf16.mxu1 %v3381_v5  ;;  %3041 = vmatprep.subr.bf16.mxu0 %v3392_v24  ;;  %v841_v44 = vor.u32 %v840_v35, %v836_v27  ;;  %v845_v46 = vrot.slane %v843_v36, 1  ;;  %v708_v0 = vrot.slane %v706_v54, 1  ;;  %v315_v5 = vld [vmem:[%s3518_s20 + $0xb4] sm:$0xff]   ;;  %v455_v24 = vadd.f32 %v3536_v20, %v394_v9  ;;  %v3401_v36 = vld [vmem:[%s4875_s1 + $0x160] sm:$0xff]  }
  0x35   : > { %v3696_v52 = vpack.c.bf16 %v596_v39, %v596_v39  ;;  %v456_v25 = vadd.f32 %v3536_v20, %v395_v10  ;;  %v369_v27 = vunpack.c.l.bf16 %v315_v5  ;;  %v457_v32 = vadd.f32 %v3536_v20, %v396_v21 }
  0x36   : > { %1639 = vmatmul.mubr.bf16.gmra.mrb[4].mxu0 %v3632_v50  ;;  %v3702_v57 = vsel %vm678_vm2, %v841_v44, %v845_v46  ;;  %v709_v15 = vor.u32 %v708_v0, %v704_v53  ;;  %v370_v35 = vunpack.c.h.bf16 %v315_v5  ;;  %v3747_v37 = vpack.c.bf16 %v632_v22, %v632_v22  ;;  %v3393_v5 = vld [vmem:[%s4875_s1 + $0xb0] sm:$0xff]  }
  0x37   : > { %2930 = vmatpush3.bf16.msra.mxu1 %v3382_v14  ;;  %3042 = vmatpush3.bf16.msra.mxu0 %v3394_v38  ;;  %v711_v1 = vshll.u32 %v3696_v52, 16  ;;  %v3400_v14 = vld [vmem:[%s4875_s1 + $0x118] sm:$0xff]   ;;  %v509_v38 = vmax.f32 %v455_v24, 0.0  ;;  %v510_v39 = vmax.f32 %v456_v25, 0.0  ;;  %v371_v41 = vunpack.c.l.bf16 %v317_v6 }
  0x38   : > { %2931 = vmatprep.subr.bf16.mxu1 %v3383_v18  ;;  %1734 = vmatprep.mubr.bf16.mxu1 %v3702_v57  ;;  %v630_v18 = vmul.f32 %v3552_v34, %v542_v3  ;;  %v511_v46 = vmax.f32 %v457_v32, 0.0  ;;  %v855_v49 = vshll.u32 %v3747_v37, 16  ;;  %v431_v53 = vmul.f32 %v3531_v16, %v370_v35  ;;  %v284_v6 = vld [vmem:[%s3518_s20 + $0x38] sm:$0x1] }
  0x39   : > { %1735 = vmatmul.mubr.bf16.gmra.mrb[4].mxu1 %v3658_v13  ;;  %v713_v17 = vrot.slane %v711_v1, 1  ;;  %3043 = vmatprep.subr.bf16.mxu0 %v3399_v11  ;;  %v597_v51 = vmul.f32 %v3552_v34, %v509_v38  ;;  %v432_v54 = vmul.f32 %v3531_v16, %v371_v41  ;;  %v2779_v61 = vunpack.c.l.bf16 %v2806_v28  ;;  %v3395_v24 = vld [vmem:[%s4875_s1 + $0xf8] sm:$0xff]  }
  0x3a   : > { %v3737_v30 = vpack.c.bf16 %v543_v7, %v630_v18  ;;  %v599_v59 = vmul.f32 %v3564_v42, %v511_v46  ;;  %v857_v0 = vrot.slane %v855_v49, 1  ;;  %v492_v3 = vadd.f32 %v3536_v20, %v431_v53  ;;  %v3405_v7 = vld [vmem:[%s4875_s1 + $0x168] sm:$0xff]   ;;  %v3396_v38 = vld [vmem:[%s4875_s1 + $0xb8] sm:$0xff]  }
  0x3b   : > { %2932 = vmatpush3.bf16.msra.mxu1 %v3385_v47  ;;  %v3735_v29 = vsel %vm678_vm2, %v709_v15, %v713_v17  ;;  %3044 = vmatpush3.bf16.msra.mxu0 %v3400_v14  ;;  %v430_v47 = vmul.f32 %v3531_v16, %v369_v27  ;;  %v3765_v1 = vpack.c.bf16 %v510_v39, %v597_v51  ;;  %v2780_v11 = vunpack.c.h.bf16 %v2806_v28  ;;  %v3406_v14 = vld [vmem:[%s4875_s1 + $0x128] sm:$0xff]   ;;  %v285_v41 = vld [vmem:[%s3518_s20 + $0x3c] sm:$0xff]  }
  0x3c   : > { %2933 = vmatprep.subr.bf16.mxu1 %v3387_v60  ;;  %1646 = vmatprep.mubr.bf16.mxu0 %v3735_v29  ;;  %v848_v43 = vshrl.u32 %v3737_v30, 16  ;;  %v850_v44 = vshll.u32 %v3737_v30, 16  ;;  %v493_v4 = vadd.f32 %v3536_v20, %v432_v54  ;;  %v3776_v9 = vpack.c.bf16 %v599_v59, %v599_v59  ;;  %v3397_v54 = vld [vmem:[%s4875_s1 + $0x1c0] sm:$0xff]  }
  0x3d   : > { %3045 = vmatprep.subr.bf16.mxu0 %v3401_v36  ;;  %v491_v60 = vadd.f32 %v3536_v20, %v430_v47  ;;  %v716_v15 = vshrl.u32 %v3765_v1, 16  ;;  %v718_v17 = vshll.u32 %v3765_v1, 16  ;;  %v546_v18 = vmax.f32 %v492_v3, 0.0 }
  0x3e   : > { %1647 = vmatmul.mubr.bf16.gmra.mrb[8].mxu0 %v3686_v40  ;;  %v852_v58 = vrot.slane %v850_v44, 1  ;;  %v723_v22 = vshll.u32 %v3776_v9, 16  ;;  %v338_v25 = vunpack.c.l.bf16 %v284_v6  ;;  %v398_v32 = vmul.f32 %v2780_v11, %v3531_v16 }
  0x3f   : > { %2934 = vmatpush3.bf16.msra.mxu1 %v3388_v19  ;;  %3046 = vmatpush3.bf16.msra.mxu0 %v3403_v56  ;;  %v545_v10 = vmax.f32 %v491_v60, 0.0  ;;  %v547_v19 = vmax.f32 %v493_v4, 0.0  ;;  %v720_v27 = vrot.slane %v718_v17, 1  ;;  %v3409_v56 = vld [vmem:[%s4875_s1 + $0x170] sm:$0xff]   ;;  %v340_v6 = vunpack.c.h.bf16 %v285_v41 }
  0x40   : > { %2935 = vmatprep.subr.bf16.mxu1 %v3389_v23  ;;  %v853_v8 = vor.u32 %v852_v58, %v848_v43  ;;  %3047 = vmatprep.subr.bf16.mxu0 %v3405_v7  ;;  %v725_v35 = vrot.slane %v723_v22, 1  ;;  %v399_v39 = vmul.f32 %v3531_v16, %v338_v25  ;;  %v459_v47 = vadd.f32 %v3536_v20, %v398_v32  ;;  %v2807_v7 = vld [vmem:[%s3518_s20 + $0x48] sm:$0xff]   ;;  %v3413_v25 = vld [vmem:[%s4875_s1 + $0x178] sm:$0xff]  }
  0x41   : > { %v633_v23 = vmul.f32 %v3552_v34, %v545_v10  ;;  %v635_v28 = vmul.f32 %v3564_v42, %v547_v19  ;;  %v721_v43 = vor.u32 %v720_v27, %v716_v15  ;;  %v401_v19 = vmul.f32 %v3531_v16, %v340_v6 }
  0x42   : > { %v3784_v21 = vsel %vm678_vm2, %v853_v8, %v857_v0  ;;  %v460_v53 = vadd.f32 %v3536_v20, %v399_v39  ;;  %v3410_v0 = vld [vmem:[%s4875_s1 + $0x130] sm:$0xff]   ;;  %v921_v8 = vrot.slane %v3579_v63, 1  ;;  %v920_v63 = vrot.slane %v3577_v62, 1  ;;  %v3414_v62 = vld [vmem:[%s4875_s1 + $0x138] sm:$0xff]  }
  0x43   : > { %2936 = vmatpush3.bf16.msra.mxu1 %v3390_v31  ;;  %1742 = vmatprep.mubr.bf16.mxu1 %v3784_v21  ;;  %v397_v31 = vmul.f32 %v2779_v61, %v3531_v16  ;;  %v3796_v36 = vpack.c.bf16 %v546_v18, %v633_v23  ;;  %v3803_v44 = vpack.c.bf16 %v635_v28, %v635_v28  ;;  %v513_v61 = vmax.f32 %v459_v47, 0.0 }
  0x44   : > { %2937 = vmatprep.subr.bf16.mxu1 %v3391_v48  ;;  %3048 = vmatpush3.bf16.msra.mxu0 %v3406_v14  ;;  %v287_v48 = vld [vmem:[%s3518_s20 + $0x44] sm:$0x1]  ;;  %v3818_v58 = vsel %vm678_vm2, %v721_v43, %v725_v35  ;;  %v514_v4 = vmax.f32 %v460_v53, 0.0  ;;  %v462_v32 = vadd.f32 %v3536_v20, %v401_v19  ;;  %v290_v35 = vld [vmem:[%s3518_s20 + $0x50] sm:$0x1] }
  0x45   : > { %1743 = vmatmul.mubr.bf16.gmra.mrb[8].mxu1 %v3737_v30  ;;  %v458_v46 = vadd.f32 %v3536_v20, %v397_v31  ;;  %v860_v49 = vshrl.u32 %v3796_v36, 16  ;;  %v862_v51 = vshll.u32 %v3796_v36, 16  ;;  %v867_v59 = vshll.u32 %v3803_v44, 16  ;;  %1654 = vmatprep.mubr.bf16.mxu0 %v3818_v58 }
  0x46   : > { %3049 = vmatprep.subr.bf16.mxu0 %v3409_v56  ;;  %1655 = vmatmul.mubr.bf16.gmra.mrb[12].mxu0 %v3765_v1  ;;  %v341_v14 = vunpack.c.l.bf16 %v287_v48  ;;  %v602_v17 = vmul.f32 %v3564_v42, %v514_v4  ;;  %v516_v47 = vmax.f32 %v462_v32, 0.0  ;;  %v2784_v48 = vunpack.c.h.bf16 %v2807_v7 }
  0x47   : > { %2938 = vmatpush3.bf16.msra.mxu1 %v3393_v5  ;;  %v512_v60 = vmax.f32 %v458_v46, 0.0  ;;  %v864_v3 = vrot.slane %v862_v51, 1  ;;  %v339_v5 = vunpack.c.l.bf16 %v285_v41  ;;  %v869_v10 = vrot.slane %v867_v59, 1 }
  0x48   : > { %2939 = vmatprep.subr.bf16.mxu1 %v3395_v24  ;;  %v402_v23 = vmul.f32 %v3531_v16, %v341_v14  ;;  %v2783_v24 = vunpack.c.l.bf16 %v2807_v7  ;;  %3050 = vmatpush3.bf16.msra.mxu0 %v3410_v0  ;;  %v3842_v28 = vpack.c.bf16 %v602_v17, %v602_v17  ;;  %v404_v0 = vmul.f32 %v2784_v48, %v3531_v16 }
  0x49   : > { %v600_v11 = vmul.f32 %v3552_v34, %v512_v60  ;;  %v865_v15 = vor.u32 %v864_v3, %v860_v49  ;;  %v400_v18 = vmul.f32 %v3531_v16, %v339_v5  ;;  %3051 = vmatprep.subr.bf16.mxu0 %v3413_v25  ;;  %v291_v49 = vld [vmem:[%s3518_s20 + $0x54] sm:$0xff]   ;;  %v922_v60 = vsel %vm919_vm3, %v920_v63, %v921_v8  ;;  %v3865_v3 = vld [vmem:[%s4875_s1 + $0x200] sm:$0xff]  }
  0x4a   : > { %v463_v41 = vadd.f32 %v3536_v20, %v402_v23  ;;  %v735_v43 = vshll.u32 %v3842_v28, 16  ;;  %v403_v56 = vmul.f32 %v2783_v24, %v3531_v16  ;;  %v3398_v8 = vld [vmem:[%s4875_s1 + $0x180] sm:$0xff]   ;;  %v923_v14 = vrot.slane %v3632_v50, 1  ;;  %v3402_v24 = vld [vmem:[%s4875_s1 + $0x1c8] sm:$0xff]  }
  0x4b   : > { %2940 = vmatpush3.bf16.msra.mxu1 %v3396_v38  ;;  %v3832_v22 = vpack.c.bf16 %v513_v61, %v600_v11  ;;  %v3840_v27 = vsel %vm678_vm2, %v865_v15, %v869_v10  ;;  %v461_v31 = vadd.f32 %v3536_v20, %v400_v18  ;;  %v293_v10 = vld [vmem:[%s3518_s20 + $0x5c] sm:$0x1]  ;;  %v465_v15 = vadd.f32 %v3536_v20, %v404_v0  ;;  %v3407_v0 = vld [vmem:[%s4875_s1 + $0x1d0] sm:$0xff]  }
  0x4c   : > { %3149 = vmatprep.subr.bf16.mxu1 %v3397_v54  ;;  %4883 = vst [vmem:[#allocation2_spill] sm:$0xff] %v3840_v27  ;;  %1750 = vmatprep.mubr.bf16.mxu1 %v3840_v27  ;;  %v517_v53 = vmax.f32 %v463_v41, 0.0  ;;  %v344_v54 = vunpack.c.l.bf16 %v290_v35  ;;  %v737_v59 = vrot.slane %v735_v43, 1  ;;  %v464_v7 = vadd.f32 %v3536_v20, %v403_v56  ;;  %v3404_v43 = vld [vmem:[%s4875_s1 + $0x188] sm:$0xff]  }
  0x4d   : > { %v728_v38 = vshrl.u32 %v3832_v22, 16  ;;  %v730_v39 = vshll.u32 %v3832_v22, 16  ;;  %1751 = vmatmul.mubr.bf16.gmra.mrb[12].mxu1 %v3796_v36  ;;  %v515_v46 = vmax.f32 %v461_v31, 0.0  ;;  %3052 = vmatpush3.bf16.msra.mxu0 %v3414_v62  ;;  %v345_v17 = vunpack.c.l.bf16 %v291_v49 }
  0x4e   : > { %1791 = vmatprep.mubr.bf16.mxu1 %v3632_v50  ;;  %v605_v5 = vmul.f32 %v3564_v42, %v517_v53  ;;  %v405_v6 = vmul.f32 %v3531_v16, %v344_v54  ;;  %3285 = vmatprep.subr.bf16.mxu0 %v3865_v3  ;;  %v518_v23 = vmax.f32 %v464_v7, 0.0  ;;  %v924_v31 = vrot.slane %v3639_v55, 1  ;;  %v296_v54 = vld [vmem:[%s3518_s20 + $0x68] sm:$0x1] }
  0x4f   : > { %v732_v51 = vrot.slane %v730_v39, 1  ;;  %v603_v61 = vmul.f32 %v3552_v34, %v515_v46  ;;  %v519_v32 = vmax.f32 %v465_v15, 0.0  ;;  %v346_v39 = vunpack.c.h.bf16 %v291_v49  ;;  %v2808_v49 = vld [vmem:[%s3518_s20 + $0x60] sm:$0xff]  }
  0x50   : > { %v3882_v19 = vpack.c.bf16 %v605_v5, %v605_v5  ;;  %v466_v63 = vadd.f32 %v3536_v20, %v405_v6  ;;  %v347_v46 = vunpack.c.l.bf16 %v293_v10  ;;  %v406_v55 = vmul.f32 %v3531_v16, %v345_v17 }
  0x51   : > { %v733_v4 = vor.u32 %v732_v51, %v728_v38  ;;  %v3874_v11 = vpack.c.bf16 %v516_v47, %v603_v61  ;;  %v606_v38 = vmul.f32 %v3552_v34, %v518_v23  ;;  %v407_v53 = vmul.f32 %v3531_v16, %v346_v39 }
  0x52   : > { %v747_v35 = vshll.u32 %v3882_v19, 16  ;;  %v520_v62 = vmax.f32 %v466_v63, 0.0  ;;  %v467_v61 = vadd.f32 %v3536_v20, %v406_v55  ;;  %v2787_v23 = vunpack.c.l.bf16 %v2808_v49 }
  0x53   : > { %v3880_v18 = vsel %vm678_vm2, %v733_v4, %v737_v59  ;;  %v740_v50 = vshrl.u32 %v3874_v11, 16  ;;  %v742_v25 = vshll.u32 %v3874_v11, 16  ;;  %v3901_v51 = vpack.c.bf16 %v519_v32, %v606_v38 }
  0x54   : > { %1662 = vmatprep.mubr.bf16.mxu0 %v3880_v18  ;;  %v749_v47 = vrot.slane %v747_v35, 1  ;;  %v608_v48 = vmul.f32 %v3564_v42, %v520_v62  ;;  %v3907_v59 = vsel %vm919_vm3, %v923_v14, %v924_v31  ;;  %v468_v7 = vadd.f32 %v3536_v20, %v407_v53 }
  0x55   : > { %1663 = vmatmul.mubr.bf16.gmra.mrb[16].mxu0 %v3832_v22  ;;  %1792 = vmatmul.mubr.bf16.vlgmr.msra.gmra.mrb[16].mxu1 %v922_v60  ;;  %v744_v41 = vrot.slane %v742_v25, 1  ;;  %v408_v60 = vmul.f32 %v3531_v16, %v347_v46  ;;  %v752_v5 = vshrl.u32 %v3901_v51, 16  ;;  %v754_v6 = vshll.u32 %v3901_v51, 16 }
  0x56   : > { %3150 = vmatpush3.bf16.msra.mxu1 %v3398_v8  ;;  %1799 = vmatprep.mubr.bf16.mxu1 %v3686_v40  ;;  %v3914_v4 = vpack.c.bf16 %v608_v48, %v608_v48  ;;  %v926_v16 = vrot.slane %v3686_v40, 1  ;;  %v521_v14 = vmax.f32 %v467_v61, 0.0  ;;  %v522_v63 = vmax.f32 %v468_v7, 0.0  ;;  %v3415_v7 = vld [vmem:[%s4875_s1 + $0x1e0] sm:$0xff]  }
  0x57   : > { %v745_v56 = vor.u32 %v744_v41, %v740_v50  ;;  %3151 = vmatprep.subr.bf16.mxu1 %v3402_v24  ;;  %v469_v8 = vadd.f32 %v3536_v20, %v408_v60  ;;  %v756_v15 = vrot.slane %v754_v6, 1  ;;  %v3408_v24 = vld [vmem:[%s4875_s1 + $0x190] sm:$0xff]   ;;  %v2788_v32 = vunpack.c.h.bf16 %v2808_v49  ;;  %v3411_v20 = vld [vmem:[%s4875_s1 + $0x1d8] sm:$0xff]   ;;  %v3939_v41 = vld [vmem:[%s4876_s2] ss:$0 sm:$0xff] }
  0x58   : > { %v759_v17 = vshll.u32 %v3914_v4, 16  ;;  %v297_v50 = vld [vmem:[%s3518_s20 + $0x6c] sm:$0xff]   ;;  %v609_v31 = vmul.f32 %v3552_v34, %v521_v14  ;;  %v350_v35 = vunpack.c.l.bf16 %v296_v54  ;;  %v927_v39 = vrot.slane %v3696_v52, 1  ;;  %v3955_v52 = vld [vmem:[%s4877_s3] ss:$0 sm:$0xff]  ;;  %v3412_v60 = vld [vmem:[%s4875_s1 + $0x198] sm:$0xff]  }
  0x59   : > { %v3920_v10 = vsel %vm678_vm2, %v745_v56, %v749_v47  ;;  %v523_v25 = vmax.f32 %v469_v8, 0.0  ;;  %v757_v62 = vor.u32 %v756_v15, %v752_v5  ;;  %v410_v47 = vmul.f32 %v3939_v41, %v2788_v32  ;;  %v299_v54 = vld [vmem:[%s3518_s20 + $0x74] sm:$0x1] }
  0x5a   : > { %1670 = vmatprep.mubr.bf16.mxu0 %v3920_v10  ;;  %3152 = vmatpush3.bf16.msra.mxu1 %v3404_v43  ;;  %v761_v38 = vrot.slane %v759_v17, 1  ;;  %v409_v43 = vmul.f32 %v3939_v41, %v2787_v23  ;;  %v3944_v55 = vpack.c.bf16 %v522_v63, %v609_v31  ;;  %v411_v48 = vmul.f32 %v3939_v41, %v350_v35 }
  0x5b   : > { %3153 = vmatprep.subr.bf16.mxu1 %v3407_v0  ;;  %v611_v46 = vmul.f32 %v3564_v42, %v523_v25  ;;  %v351_v56 = vunpack.c.l.bf16 %v297_v50  ;;  %v471_v6 = vadd.f32 %v3955_v52, %v410_v47  ;;  %v3972_v8 = vsel %vm919_vm3, %v926_v16, %v927_v39 }
  0x5c   : > { %v3949_v53 = vsel %vm678_vm2, %v757_v62, %v761_v38  ;;  %v470_v49 = vadd.f32 %v3955_v52, %v409_v43  ;;  %v764_v0 = vshrl.u32 %v3944_v55, 16  ;;  %v766_v5 = vshll.u32 %v3944_v55, 16  ;;  %v2809_v62 = vld [vmem:[%s3518_s20 + $0x78] sm:$0xff]   ;;  %v3417_v43 = vld [vmem:[%s4875_s1 + $0x1a0] sm:$0xff]  }
  0x5d   : > { %1671 = vmatmul.mubr.bf16.gmra.mrb[20].mxu0 %v3874_v11  ;;  %1800 = vmatmul.mubr.bf16.gmra.mrb[20].mxu1 %v3907_v59  ;;  %v3963_v61 = vpack.c.bf16 %v611_v46, %v611_v46  ;;  %v472_v14 = vadd.f32 %v3955_v52, %v411_v48  ;;  %v352_v17 = vunpack.c.h.bf16 %v297_v50  ;;  %v353_v25 = vunpack.c.l.bf16 %v299_v54  ;;  %v3418_v54 = vld [vmem:[%s4875_s1 + $0x1e8] sm:$0xff]  }
  0x5e   : > { %1807 = vmatprep.mubr.bf16.mxu1 %v3765_v1  ;;  %3154 = vmatpush3.bf16.msra.mxu1 %v3408_v24  ;;  %v524_v15 = vmax.f32 %v470_v49, 0.0  ;;  %v768_v63 = vrot.slane %v766_v5, 1  ;;  %v525_v24 = vmax.f32 %v471_v6, 0.0  ;;  %v412_v35 = vmul.f32 %v3939_v41, %v351_v56  ;;  %v302_v6 = vld [vmem:[%s3518_s20 + $0x80] sm:$0x1] }
  0x5f   : > { %1678 = vmatprep.mubr.bf16.mxu0 %v3949_v53  ;;  %3155 = vmatprep.subr.bf16.mxu1 %v3411_v20  ;;  %v771_v23 = vshll.u32 %v3963_v61, 16  ;;  %v526_v31 = vmax.f32 %v472_v14, 0.0  ;;  %v413_v20 = vmul.f32 %v3939_v41, %v352_v17  ;;  %v929_v39 = vrot.slane %v3765_v1, 1 }
  0x60   : > { %v612_v32 = vmul.f32 %v3552_v34, %v524_v15  ;;  %v769_v16 = vor.u32 %v768_v63, %v764_v0  ;;  %v414_v50 = vmul.f32 %v3939_v41, %v353_v25  ;;  %v473_v48 = vadd.f32 %v3955_v52, %v412_v35 }
  0x61   : > { %v773_v38 = vrot.slane %v771_v23, 1  ;;  %v614_v46 = vmul.f32 %v3564_v42, %v526_v31  ;;  %v474_v49 = vadd.f32 %v3955_v52, %v413_v20  ;;  %v2791_v5 = vunpack.c.l.bf16 %v2809_v62  ;;  %v3421_v20 = vld [vmem:[%s4875_s1 + $0x1f0] sm:$0xff]  }
  0x62   : > { %3156 = vmatpush3.bf16.msra.mxu1 %v3412_v60  ;;  %v3987_v47 = vpack.c.bf16 %v525_v24, %v612_v32  ;;  %v930_v60 = vrot.slane %v3776_v9, 1  ;;  %v475_v0 = vadd.f32 %v3955_v52, %v414_v50  ;;  %v527_v17 = vmax.f32 %v473_v48, 0.0  ;;  %v3420_v9 = vld [vmem:[%s4875_s1 + $0x1a8] sm:$0xff]  }
  0x63   : > { %3157 = vmatprep.subr.bf16.mxu1 %v3415_v7  ;;  %v3996_v56 = vsel %vm678_vm2, %v769_v16, %v773_v38  ;;  %v4003_v7 = vpack.c.bf16 %v614_v46, %v614_v46  ;;  %v528_v63 = vmax.f32 %v474_v49, 0.0  ;;  %v2792_v24 = vunpack.c.h.bf16 %v2809_v62 }
  0x64   : > { %v776_v14 = vshrl.u32 %v3987_v47, 16  ;;  %v778_v15 = vshll.u32 %v3987_v47, 16  ;;  %v529_v23 = vmax.f32 %v475_v0, 0.0  ;;  %v615_v32 = vmul.f32 %v3552_v34, %v527_v17 }
  0x65   : > { %1679 = vmatmul.mubr.bf16.gmra.mrb[24].mxu0 %v3901_v51  ;;  %1808 = vmatmul.mubr.bf16.gmra.mrb[24].mxu1 %v3972_v8  ;;  %v783_v31 = vshll.u32 %v4003_v7, 16  ;;  %v356_v35 = vunpack.c.l.bf16 %v302_v6  ;;  %v4016_v16 = vsel %vm919_vm3, %v929_v39, %v930_v60  ;;  %v415_v38 = vmul.f32 %v3939_v41, %v2791_v5  ;;  %v303_v6 = vld [vmem:[%s3518_s20 + $0x84] sm:$0xff]   ;;  %v3423_v5 = vld [vmem:[%s4875_s1 + $0x1b0] sm:$0xff]  }
  0x66   : > { %1686 = vmatprep.mubr.bf16.mxu0 %v3996_v56  ;;  %1815 = vmatprep.mubr.bf16.mxu1 %v3832_v22  ;;  %v780_v25 = vrot.slane %v778_v15, 1  ;;  %v617_v62 = vmul.f32 %v3564_v42, %v529_v23  ;;  %v416_v50 = vmul.f32 %v3939_v41, %v2792_v24  ;;  %v4021_v48 = vpack.c.bf16 %v528_v63, %v615_v32  ;;  %v305_v23 = vld [vmem:[%s3518_s20 + $0x8c] sm:$0x1]  ;;  %v3424_v24 = vld [vmem:[%s4875_s1 + $0x1f8] sm:$0xff]  }
  0x67   : > { %3158 = vmatpush3.bf16.msra.mxu1 %v3417_v43  ;;  %v785_v46 = vrot.slane %v783_v31, 1  ;;  %v417_v49 = vmul.f32 %v3939_v41, %v356_v35  ;;  %v476_v39 = vadd.f32 %v3955_v52, %v415_v38  ;;  %v357_v38 = vunpack.c.l.bf16 %v303_v6 }
  0x68   : > { %3159 = vmatprep.subr.bf16.mxu1 %v3418_v54  ;;  %v781_v43 = vor.u32 %v780_v25, %v776_v14  ;;  %v932_v54 = vrot.slane %v3832_v22, 1  ;;  %v4025_v0 = vpack.c.bf16 %v617_v62, %v617_v62  ;;  %v477_v60 = vadd.f32 %v3955_v52, %v416_v50 }
  0x69   : > { %v788_v15 = vshrl.u32 %v4021_v48, 16  ;;  %v790_v17 = vshll.u32 %v4021_v48, 16  ;;  %v478_v63 = vadd.f32 %v3955_v52, %v417_v49  ;;  %v530_v31 = vmax.f32 %v476_v39, 0.0  ;;  %v3426_v49 = vld [vmem:[%s4875_s1 + $0x1b8] sm:$0xff]  }
  0x6a   : > { %v4035_v14 = vsel %vm678_vm2, %v781_v43, %v785_v46  ;;  %v795_v25 = vshll.u32 %v4025_v0, 16  ;;  %v531_v32 = vmax.f32 %v477_v60, 0.0  ;;  %v359_v46 = vunpack.c.l.bf16 %v305_v23 }
  0x6b   : > { %3160 = vmatpush3.bf16.msra.mxu1 %v3420_v9  ;;  %v933_v9 = vrot.slane %v3842_v28, 1  ;;  %v792_v35 = vrot.slane %v790_v17, 1  ;;  %v532_v62 = vmax.f32 %v478_v63, 0.0  ;;  %v618_v43 = vmul.f32 %v3552_v34, %v530_v31 }
  0x6c   : > { %3161 = vmatprep.subr.bf16.mxu1 %v3421_v20  ;;  %v358_v20 = vunpack.c.h.bf16 %v303_v6  ;;  %v797_v50 = vrot.slane %v795_v25, 1  ;;  %v418_v39 = vmul.f32 %v3939_v41, %v357_v38  ;;  %v420_v63 = vmul.f32 %v3939_v41, %v359_v46 }
  0x6d   : > { %1687 = vmatmul.mubr.bf16.gmra.mrb[28].mxu0 %v3944_v55  ;;  %1816 = vmatmul.mubr.bf16.gmra.mrb[28].mxu1 %v4016_v16  ;;  %v793_v28 = vor.u32 %v792_v35, %v788_v15  ;;  %v620_v27 = vmul.f32 %v3564_v42, %v532_v62  ;;  %v4057_v17 = vsel %vm919_vm3, %v932_v54, %v933_v9  ;;  %v935_v38 = vrot.slane %v3874_v11, 1 }
  0x6e   : > { %1694 = vmatprep.mubr.bf16.mxu0 %v4035_v14  ;;  %1823 = vmatprep.mubr.bf16.mxu1 %v3874_v11  ;;  %v419_v60 = vmul.f32 %v3939_v41, %v358_v20  ;;  %v4059_v6 = vpack.c.bf16 %v531_v32, %v618_v43  ;;  %v479_v15 = vadd.f32 %v3955_v52, %v418_v39  ;;  %v936_v20 = vrot.slane %v3882_v19, 1 }
  0x6f   : > { %3162 = vmatpush3.bf16.msra.mxu1 %v3423_v5  ;;  %v4063_v5 = vsel %vm678_vm2, %v793_v28, %v797_v50  ;;  %v4065_v23 = vpack.c.bf16 %v620_v27, %v620_v27  ;;  %v481_v54 = vadd.f32 %v3955_v52, %v420_v63 }
  0x70   : > { %3163 = vmatprep.subr.bf16.mxu1 %v3424_v24  ;;  %v480_v25 = vadd.f32 %v3955_v52, %v419_v60  ;;  %v800_v31 = vshrl.u32 %v4059_v6, 16  ;;  %v802_v24 = vshll.u32 %v4059_v6, 16  ;;  %v533_v32 = vmax.f32 %v479_v15, 0.0 }
  0x71   : > { %v807_v9 = vshll.u32 %v4065_v23, 16  ;;  %v535_v62 = vmax.f32 %v481_v54, 0.0  ;;  %v4086_v60 = vsel %vm919_vm3, %v935_v38, %v936_v20  ;;  %v939_v54 = vrot.slane %v3914_v4, 1 }
  0x72   : > { %v534_v35 = vmax.f32 %v480_v25, 0.0  ;;  %v804_v27 = vrot.slane %v802_v24, 1  ;;  %v621_v43 = vmul.f32 %v3552_v34, %v533_v32  ;;  %v938_v24 = vrot.slane %v3901_v51, 1 }
  0x73   : > { %3164 = vmatpush3.bf16.msra.mxu1 %v3426_v49  ;;  %v809_v50 = vrot.slane %v807_v9, 1  ;;  %v623_v49 = vmul.f32 %v3564_v42, %v535_v62  ;;  %v941_v62 = vrot.slane %v3944_v55, 1  ;;  %v942_v4 = vrot.slane %v3963_v61, 1  ;;  %v3419_v61 = vld [vmem:[%s4875_s1 + $0x208] sm:$0xff]  }
  0x74   : > { %v805_v46 = vor.u32 %v804_v27, %v800_v31  ;;  %v4081_v28 = vpack.c.bf16 %v534_v35, %v621_v43  ;;  %v4101_v35 = vsel %vm919_vm3, %v938_v24, %v939_v54  ;;  %v944_v20 = vrot.slane %v3987_v47, 1  ;;  %v3429_v24 = vld [vmem:[%s4875_s1 + $0x230] sm:$0xff]  }
  0x75   : > { %1695 = vmatmul.mubr.bf16.gmra.mrb[32].mxu0 %v3987_v47  ;;  %1824 = vmatmul.mubr.bf16.gmra.mrb[32].mxu1 %v4057_v17  ;;  %v4083_v39 = vpack.c.bf16 %v623_v49, %v623_v49  ;;  %v4113_v38 = vsel %vm919_vm3, %v941_v62, %v942_v4  ;;  %v951_v49 = vrot.slane %v4065_v23, 1  ;;  %v957_v62 = vrot.slane %v3596_v12, 1 }
  0x76   : > { %1702 = vmatprep.mubr.bf16.mxu0 %v4063_v5  ;;  %1831 = vmatprep.mubr.bf16.mxu1 %v3901_v51  ;;  %v4089_v63 = vsel %vm678_vm2, %v805_v46, %v809_v50  ;;  %v812_v15 = vshrl.u32 %v4081_v28, 16  ;;  %v814_v19 = vshll.u32 %v4081_v28, 16  ;;  %v945_v50 = vrot.slane %v4003_v7, 1  ;;  %v3422_v46 = vld [vmem:[%s4875_s1 + $0x210] sm:$0xff]  }
  0x77   : > { %v819_v25 = vshll.u32 %v4083_v39, 16  ;;  %v948_v7 = vrot.slane %v4025_v0, 1  ;;  %v950_v0 = vrot.slane %v4059_v6, 1  ;;  %v953_v23 = vrot.slane %v4081_v28, 1 }
  0x78   : > { %v816_v31 = vrot.slane %v814_v19, 1  ;;  %v4122_v43 = vsel %vm919_vm3, %v944_v20, %v945_v50  ;;  %v959_v12 = vrot.slane %v3658_v13, 1 }
  0x79   : > { %v821_v32 = vrot.slane %v819_v25, 1  ;;  %v4153_v19 = vsel %vm919_vm3, %v950_v0, %v951_v49  ;;  %v3428_v25 = vld [vmem:[%s4875_s1 + $0x228] sm:$0xff]  }
  0x7a   : > { %v817_v9 = vor.u32 %v816_v31, %v812_v15  ;;  %v3427_v15 = vld [vmem:[%s4875_s1 + $0x220] sm:$0xff]   ;;  %v954_v31 = vrot.slane %v4083_v39, 1  ;;  %v956_v39 = vrot.slane %v3585_v2, 1 }
  0x7c   : > { %v4104_v27 = vsel %vm678_vm2, %v817_v9, %v821_v32  ;;  %v4168_v54 = vsel %vm919_vm3, %v953_v23, %v954_v31  ;;  %v2812_v9 = vld [vmem:[%s3518_s20 + $0xc0] sm:$0xff]   ;;  %v3430_v32 = vld [vmem:[%s4875_s1 + $0x238] sm:$0xff]   ;;  %v4181_v20 = vsel %vm919_vm3, %v956_v39, %v957_v62 }
  0x7d   : > { %1703 = vmatmul.mubr.bf16.gmra.mrb[36].mxu0 %v4021_v48  ;;  %1832 = vmatmul.mubr.bf16.gmra.mrb[36].mxu1 %v4086_v60  ;;  %v2803_v4 = vunpack.c.l.bf16 %v2812_v9  ;;  %v2804_v50 = vunpack.c.h.bf16 %v2812_v9  ;;  %v965_v9 = vrot.slane %v3796_v36, 1 }
  0x7e   : > { %1710 = vmatprep.mubr.bf16.mxu0 %v4089_v63  ;;  %1839 = vmatprep.mubr.bf16.mxu1 %v3944_v55 }
  0x85   : > { %1711 = vmatmul.mubr.bf16.gmra.mrb[40].mxu0 %v4059_v6  ;;  %1840 = vmatmul.mubr.bf16.gmra.mrb[40].mxu1 %v4101_v35 }
  0x86   : > { %1718 = vmatprep.mubr.bf16.mxu0 %v4104_v27  ;;  %1847 = vmatprep.mubr.bf16.mxu1 %v3987_v47 }
  0x8d   : > { %1719 = vmatmul.mubr.bf16.gmra.mrb[44].mxu0 %v4081_v28  ;;  %1848 = vmatmul.mubr.bf16.gmra.mrb[44].mxu1 %v4113_v38 }
  0x8e   : > { %1952 = vmatprep.mubr.bf16.mxu0 %v3907_v59  ;;  %1855 = vmatprep.mubr.bf16.mxu1 %v4021_v48  ;;  %v947_v59 = vrot.slane %v4021_v48, 1 }
  0x95   : > { %1953 = vmatmul.mubr.bf16.vlgmr.msra.gmra.mrb[48].mxu0 %v3678_v33  ;;  %1856 = vmatmul.mubr.bf16.gmra.mrb[48].mxu1 %v4122_v43  ;;  %v4138_v33 = vsel %vm919_vm3, %v947_v59, %v948_v7  ;;  %v960_v59 = vrot.slane %v3672_v26, 1  ;;  %v434_v7 = vmul.f32 %v3939_v41, %v2804_v50  ;;  %v962_v26 = vrot.slane %v3737_v30, 1 }
  0x96   : > { %3286 = vmatpush3.bf16.msra.mxu0 %v3865_v3  ;;  %1863 = vmatprep.mubr.bf16.mxu1 %v4059_v6  ;;  %v3425_v3 = vld [vmem:[%s4875_s1 + $0x218] sm:$0xff]  }
  0x97   : > { %1960 = vmatprep.mubr.bf16.mxu0 %v3972_v8  ;;  %3287 = vmatprep.subr.bf16.mxu0 %v3419_v61  ;;  %v495_v0 = vadd.f32 %v3955_v52, %v434_v7 }
  0x9a   : > { %3288 = vmatpush3.bf16.msra.mxu0 %v3419_v61  ;;  %v433_v61 = vmul.f32 %v3939_v41, %v2803_v4 }
  0x9b   : > { %3289 = vmatprep.subr.bf16.mxu0 %v3422_v46 }
  0x9d   : > { %1961 = vmatmul.mubr.bf16.gmra.mrb[52].mxu0 %v3735_v29  ;;  %1864 = vmatmul.mubr.bf16.gmra.mrb[52].mxu1 %v4138_v33 }
  0x9e   : > { %1968 = vmatprep.mubr.bf16.mxu0 %v4016_v16  ;;  %1871 = vmatprep.mubr.bf16.mxu1 %v4081_v28 }
  0x9f   : > { %3290 = vmatpush3.bf16.msra.mxu0 %v3422_v46  ;;  %v494_v46 = vadd.f32 %v3955_v52, %v433_v61 }
  0xa0   : > { %3291 = vmatprep.subr.bf16.mxu0 %v3425_v3 }
  0xa1   : > { %v548_v49 = vmax.f32 %v494_v46, 0.0 }
  0xa3   : > { %3292 = vmatpush3.bf16.msra.mxu0 %v3425_v3  ;;  %v4193_v3 = vsel %vm919_vm3, %v959_v12, %v960_v59  ;;  %v636_v23 = vmul.f32 %v3552_v34, %v548_v49 }
  0xa4   : > { %3293 = vmatprep.subr.bf16.mxu0 %v3427_v15 }
  0xa5   : > { %1969 = vmatmul.mubr.bf16.gmra.mrb[56].mxu0 %v3818_v58  ;;  %1872 = vmatmul.mubr.bf16.gmra.mrb[56].mxu1 %v4153_v19 }
  0xa6   : > { %1976 = vmatprep.mubr.bf16.mxu0 %v4057_v17  ;;  %1879 = vmatprep.mubr.bf16.mxu1 %v3585_v2 }
  0xa7   : > { %3294 = vmatpush3.bf16.msra.mxu0 %v3427_v15  ;;  %v963_v15 = vrot.slane %v3747_v37, 1  ;;  %v966_v37 = vrot.slane %v3803_v44, 1  ;;  %v320_v44 = vld [vmem:[%s3518_s20 + $0xc8] sm:$0x1] }
  0xa8   : > { %3295 = vmatprep.subr.bf16.mxu0 %v3428_v25 }
  0xa9   : > { %v4204_v31 = vsel %vm919_vm3, %v962_v26, %v963_v15  ;;  %v4215_v34 = vsel %vm919_vm3, %v965_v9, %v966_v37 }
  0xab   : > { %3296 = vmatpush3.bf16.msra.mxu0 %v3428_v25  ;;  %v549_v25 = vmax.f32 %v495_v0, 0.0 }
  0xac   : > { %3297 = vmatprep.subr.bf16.mxu0 %v3429_v24 }
  0xad   : > { %1977 = vmatmul.mubr.bf16.gmra.mrb[60].mxu0 %v3880_v18  ;;  %1880 = vmatmul.mubr.bf16.gmra.mrb[60].mxu1 %v4168_v54 }
  0xae   : > { %1984 = vmatprep.mubr.bf16.mxu0 %v4086_v60  ;;  %1887 = vmatprep.mubr.bf16.mxu1 %v3658_v13 }
  0xaf   : > { %3298 = vmatpush3.bf16.msra.mxu0 %v3429_v24  ;;  %v4206_v24 = vpack.c.bf16 %v549_v25, %v636_v23 }
  0xb0   : > { %3299 = vmatprep.subr.bf16.mxu0 %v3430_v32 }
  0xb1   : > { %v987_v62 = vshll.u32 %v4206_v24, 16  ;;  %v999_v50 = vrot.slane %v4206_v24, 1  ;;  %v985_v7 = vshrl.u32 %v4206_v24, 16 }
  0xb3   : > { %3300 = vmatpush3.bf16.msra.mxu0 %v3430_v32  ;;  %v989_v46 = vrot.slane %v987_v62, 1 }
  0xb5   : > { %1985 = vmatmul.mubr.bf16.gmra.mrb[64].mxu0 %v3920_v10  ;;  %1888 = vmatmul.mubr.bf16.gmra.mrb[64].mxu1 %v4181_v20  ;;  %v990_v26 = vor.u32 %v989_v46, %v985_v7 }
  0xb6   : > { %1992 = vmatprep.mubr.bf16.mxu0 %v4101_v35  ;;  %1895 = vmatprep.mubr.bf16.mxu1 %v3737_v30 }
  0xbd   : > { %1993 = vmatmul.mubr.bf16.gmra.mrb[68].mxu0 %v3949_v53  ;;  %1896 = vmatmul.mubr.bf16.gmra.mrb[68].mxu1 %v4193_v3 }
  0xbe   : > { %2000 = vmatprep.mubr.bf16.mxu0 %v4113_v38  ;;  %1903 = vmatprep.mubr.bf16.mxu1 %v3796_v36 }
  0xc5   : > { %2001 = vmatmul.mubr.bf16.gmra.mrb[72].mxu0 %v3996_v56  ;;  %1904 = vmatmul.mubr.bf16.gmra.mrb[72].mxu1 %v4204_v31 }
  0xc6   : > { %2008 = vmatprep.mubr.bf16.mxu0 %v4122_v43  ;;  %1911 = vmatprep.mubr.bf16.mxu1 %v4206_v24 }
  0xcd   : > { %2009 = vmatmul.mubr.bf16.gmra.mrb[76].mxu0 %v4035_v14  ;;  %1912 = vmatmul.mubr.bf16.gmra.mrb[76].mxu1 %v4215_v34 }
  0xce   : > { %2016 = vmatprep.mubr.bf16.mxu0 %v4138_v33  ;;  %2113 = vmatprep.mubr.bf16.mxu1 %v3735_v29 }
  0xd5   : > { %2017 = vmatmul.mubr.bf16.gmra.mrb[80].mxu0 %v4063_v5  ;;  %2114 = vmatmul.mubr.bf16.vlgmr.msra.gmra.mrb[80].mxu1 %v3686_v40  ;;  %v374_v40 = vunpack.c.l.bf16 %v320_v44 }
  0xd6   : > { %2024 = vmatprep.mubr.bf16.mxu0 %v4153_v19  ;;  %2121 = vmatprep.mubr.bf16.mxu1 %v3818_v58 }
  0xd7   : > { %v435_v29 = vmul.f32 %v3939_v41, %v374_v40 }
  0xdd   : > { %2025 = vmatmul.mubr.bf16.gmra.mrb[84].mxu0 %v4089_v63  ;;  %2122 = vmatmul.mubr.bf16.gmra.mrb[84].mxu1 %v3765_v1  ;;  %v496_v1 = vadd.f32 %v3955_v52, %v435_v29 }
  0xde   : > { %2032 = vmatprep.mubr.bf16.mxu0 %v4168_v54  ;;  %2129 = vmatprep.mubr.bf16.mxu1 %v3880_v18 }
  0xdf   : > { %v550_v58 = vmax.f32 %v496_v1, 0.0 }
  0xe5   : > { %2033 = vmatmul.mubr.bf16.gmra.mrb[88].mxu0 %v4104_v27  ;;  %2130 = vmatmul.mubr.bf16.gmra.mrb[88].mxu1 %v3832_v22  ;;  %v638_v22 = vmul.f32 %v3564_v42, %v550_v58 }
  0xe6   : > { %2040 = vmatprep.mubr.bf16.mxu0 %v4181_v20  ;;  %2137 = vmatprep.mubr.bf16.mxu1 %v3920_v10 }
  0xe7   : > { %v675_v18 = vpack.c.bf16 %v638_v22, %v638_v22 }
  0xe9   : > { %v1000_v61 = vrot.slane %v675_v18, 1  ;;  %v992_v0 = vshll.u32 %v675_v18, 16 }
  0xeb   : > { %v4261_v49 = vsel %vm919_vm3, %v999_v50, %v1000_v61  ;;  %v994_v15 = vrot.slane %v992_v0, 1 }
  0xed   : > { %2041 = vmatmul.mubr.bf16.gmra.mrb[92].mxu0 %v3623_v45  ;;  %2138 = vmatmul.mubr.bf16.gmra.mrb[92].mxu1 %v3874_v11  ;;  %v4270_v40 = vsel %vm678_vm2, %v990_v26, %v994_v15  ;;  %v323_v15 = vld [vmem:[%s3518_s20 + $0xd4] sm:$0x1] }
  0xee   : > { %2048 = vmatprep.mubr.bf16.mxu0 %v4193_v3  ;;  %2145 = vmatprep.mubr.bf16.mxu1 %v3949_v53 }
  0xf5   : > { %2049 = vmatmul.mubr.bf16.gmra.mrb[96].mxu0 %v3702_v57  ;;  %2146 = vmatmul.mubr.bf16.gmra.mrb[96].mxu1 %v3901_v51 }
  0xf6   : > { %2056 = vmatprep.mubr.bf16.mxu0 %v4204_v31  ;;  %2153 = vmatprep.mubr.bf16.mxu1 %v3996_v56 }
  0xfd   : > { %2057 = vmatmul.mubr.bf16.gmra.mrb[100].mxu0 %v3784_v21  ;;  %2154 = vmatmul.mubr.bf16.gmra.mrb[100].mxu1 %v3944_v55 }
  0xfe   : > { %2064 = vmatprep.mubr.bf16.mxu0 %v4215_v34  ;;  %2161 = vmatprep.mubr.bf16.mxu1 %v4035_v14  ;;  %v4884_v14 = vld [vmem:[#allocation2_spill] sm:$0xff] }
 0x101   : > { %v2829_v10 = vpop.f32.mrb[0].mxu0  ;;  %v2901_v11 = vpop.f32.mrb[0].mxu1 }
 0x102   : > { %v2830_v32 = vpop.f32.mrb[1].mxu0  ;;  %v2902_v39 = vpop.f32.mrb[1].mxu1 }
 0x103   : > { %v4248_v53 = vadd.f32 %v2830_v32, %v2829_v10  ;;  %v2832_v51 = vpop.f32.mrb[2].mxu0  ;;  %v4252_v56 = vadd.f32 %v2902_v39, %v2901_v11  ;;  %v2904_v42 = vpop.f32.mrb[2].mxu1 }
 0x104   : > { %v2833_v4 = vpop.f32.mrb[3].mxu0  ;;  %v2905_v55 = vpop.f32.mrb[3].mxu1 }
 0x105   : > { %v4255_v12 = vadd.f32 %v2833_v4, %v2832_v51  ;;  %v4257_v59 = vadd.f32 %v2905_v55, %v2904_v42  ;;  %2065 = vmatmul.mubr.bf16.gmra.mrb[104].mxu0 %v4884_v14  ;;  %2162 = vmatmul.mubr.bf16.gmra.mrb[104].mxu1 %v3987_v47 }
 0x106   : > { %2072 = vmatprep.mubr.bf16.mxu0 %v4261_v49  ;;  %2169 = vmatprep.mubr.bf16.mxu1 %v4063_v5 }
 0x109   : > { %v2835_v25 = vpop.f32.mrb[4].mxu0 }
 0x10a   : > { %v2836_v23 = vpop.f32.mrb[5].mxu0 }
 0x10b   : > { %v4267_v9 = vadd.f32 %v2836_v23, %v2835_v25  ;;  %v2838_v37 = vpop.f32.mrb[6].mxu0 }
 0x10c   : > { %v2839_v44 = vpop.f32.mrb[7].mxu0  ;;  %v2907_v29 = vpop.f32.mrb[4].mxu1 }
 0x10d   : > { %v4272_v1 = vadd.f32 %v2839_v44, %v2838_v37  ;;  %v2908_v58 = vpop.f32.mrb[5].mxu1  ;;  %2073 = vmatmul.mubr.bf16.gmra.mrb[108].mxu0 %v4270_v40  ;;  %2170 = vmatmul.mubr.bf16.gmra.mrb[108].mxu1 %v4021_v48 }
 0x10e   : > { %v4274_v47 = vadd.f32 %v2908_v58, %v2907_v29  ;;  %v2910_v22 = vpop.f32.mrb[6].mxu1  ;;  %3301 = vmatprep.mubr.bf16.mxu0 %v3972_v8  ;;  %2177 = vmatprep.mubr.bf16.mxu1 %v4089_v63 }
 0x10f   : > { %v2911_v18 = vpop.f32.mrb[7].mxu1 }
 0x110   : > { %v4278_v5 = vadd.f32 %v2911_v18, %v2910_v22 }
 0x111   : > { %v2841_v10 = vpop.f32.mrb[8].mxu0 }
 0x112   : > { %v2842_v11 = vpop.f32.mrb[9].mxu0 }
 0x113   : > { %v4282_v32 = vadd.f32 %v2842_v11, %v2841_v10  ;;  %v2844_v39 = vpop.f32.mrb[10].mxu0 }
 0x114   : > { %v2845_v51 = vpop.f32.mrb[11].mxu0 }
 0x115   : > { %v4284_v62 = vadd.f32 %v2845_v51, %v2844_v39  ;;  %3302 = vmatmul.mubr.bf16.vlgmr.msra.gmra.mrb[112].mxu0 %v4016_v16  ;;  %2178 = vmatmul.mubr.bf16.gmra.mrb[112].mxu1 %v4059_v6  ;;  %v321_v16 = vld [vmem:[%s3518_s20 + $0xcc] sm:$0xff]   ;;  %s2768_s20 = sshll.u32 %s4886_s22, 8 }
 0x116   : > { %3305 = vmatprep.mubr.bf16.mxu0 %v4057_v17  ;;  %2185 = vmatprep.mubr.bf16.mxu1 %v4104_v27  ;;  %v375_v46 = vunpack.c.l.bf16 %v321_v16  ;;  %v376_v0 = vunpack.c.h.bf16 %v321_v16  ;;  %s4617_s9 = scalar_lea.vmem %s4878_s4, %s2768_s20 }
 0x118   : > { %v2913_v48 = vpop.f32.mrb[8].mxu1  ;;  %v436_v44 = vmul.f32 %v3939_v41, %v375_v46  ;;  %v437_v29 = vmul.f32 %v3939_v41, %v376_v0 }
 0x119   : > { %v2914_v8 = vpop.f32.mrb[9].mxu1  ;;  %v2847_v61 = vpop.f32.mrb[12].mxu0 }
 0x11a   : > { %v4290_v63 = vadd.f32 %v2914_v8, %v2913_v48  ;;  %v2916_v42 = vpop.f32.mrb[10].mxu1  ;;  %v2848_v55 = vpop.f32.mrb[13].mxu0  ;;  %v497_v22 = vadd.f32 %v3955_v52, %v436_v44  ;;  %v498_v18 = vadd.f32 %v3955_v52, %v437_v29 }
 0x11b   : > { %v2917_v4 = vpop.f32.mrb[11].mxu1  ;;  %v4297_v6 = vadd.f32 %v2848_v55, %v2847_v61  ;;  %v2850_v17 = vpop.f32.mrb[14].mxu0 }
 0x11c   : > { %v4292_v50 = vadd.f32 %v2917_v4, %v2916_v42  ;;  %v2851_v27 = vpop.f32.mrb[15].mxu0  ;;  %v551_v4 = vmax.f32 %v497_v22, 0.0 }
 0x11d   : > { %3306 = vmatmul.mubr.bf16.gmra.mrb[116].mxu0 %v4086_v60  ;;  %2186 = vmatmul.mubr.bf16.gmra.mrb[116].mxu1 %v4081_v28  ;;  %v4301_v7 = vadd.f32 %v2851_v27, %v2850_v17  ;;  %v377_v28 = vunpack.c.l.bf16 %v323_v15 }
 0x11e   : > { %3309 = vmatprep.mubr.bf16.mxu0 %v4101_v35  ;;  %2193 = vmatprep.mubr.bf16.mxu1 %v3623_v45 }
 0x11f   : > { %v438_v58 = vmul.f32 %v3939_v41, %v377_v28  ;;  %v552_v41 = vmax.f32 %v498_v18, 0.0 }
 0x120   : > { %v2919_v26 = vpop.f32.mrb[12].mxu1 }
 0x121   : > { %v2920_v25 = vpop.f32.mrb[13].mxu1  ;;  %v640_v46 = vmul.f32 0.0, %v552_v41 }
 0x122   : > { %v4304_v60 = vadd.f32 %v2920_v25, %v2919_v26  ;;  %v2922_v23 = vpop.f32.mrb[14].mxu1 }
 0x123   : > { %v2923_v37 = vpop.f32.mrb[15].mxu1 }
 0x124   : > { %v4308_v35 = vadd.f32 %v2923_v37, %v2922_v23 }
 0x125   : > { %3310 = vmatmul.mubr.bf16.gmra.mrb[120].mxu0 %v4113_v38  ;;  %2194 = vmatmul.mubr.bf16.gmra.mrb[120].mxu1 %v3585_v2 }
 0x126   : > { %3313 = vmatprep.mubr.bf16.mxu0 %v4122_v43  ;;  %2201 = vmatprep.mubr.bf16.mxu1 %v3702_v57  ;;  %v499_v57 = vadd.f32 %v3955_v52, %v438_v58  ;;  %v639_v52 = vmul.f32 0.0, %v551_v4 }
 0x128   : > { %v2853_v45 = vpop.f32.mrb[16].mxu0  ;;  %v2941_v10 = vpop.f32.mrb[16].mxu1  ;;  %v553_v27 = vmax.f32 %v499_v57, 0.0  ;;  %v4336_v28 = vpack.c.bf16 %v640_v46, %v639_v52 }
 0x129   : > { %v2854_v11 = vpop.f32.mrb[17].mxu0  ;;  %v2942_v51 = vpop.f32.mrb[17].mxu1 }
 0x12a   : > { %v4317_v39 = vadd.f32 %v2854_v11, %v2853_v45  ;;  %v2856_v48 = vpop.f32.mrb[18].mxu0  ;;  %v2943_v38 = vadd.f32 %v2942_v51, %v2941_v10  ;;  %v2944_v8 = vpop.f32.mrb[18].mxu1  ;;  %v1006_v22 = vshll.u32 %v4336_v28, 16 }
 0x12b   : > { %v2857_v2 = vpop.f32.mrb[19].mxu0  ;;  %v2945_v43 = vpop.f32.mrb[19].mxu1 }
 0x12c   : > { %v4319_v42 = vadd.f32 %v2857_v2, %v2856_v48  ;;  %v4323_v61 = vadd.f32 %v2943_v38, %v4248_v53  ;;  %v2946_v55 = vadd.f32 %v2945_v43, %v2944_v8  ;;  %v1008_v8 = vrot.slane %v1006_v22, 1 }
 0x12d   : > { %3314 = vmatmul.mubr.bf16.gmra.mrb[124].mxu0 %v4138_v33  ;;  %2202 = vmatmul.mubr.bf16.gmra.mrb[124].mxu1 %v3658_v13 }
 0x12e   : > { %3317 = vmatprep.mubr.bf16.mxu0 %v4153_v19  ;;  %v4329_v16 = vadd.f32 %v2946_v55, %v4255_v12  ;;  %2209 = vmatprep.mubr.bf16.mxu1 %v3784_v21  ;;  %v641_v12 = vmul.f32 0.0, %v553_v27 }
 0x130   : > { %v2859_v17 = vpop.f32.mrb[20].mxu0  ;;  %v2947_v0 = vpop.f32.mrb[20].mxu1  ;;  %v677_v58 = vpack.c.bf16 %v641_v12, %v641_v12 }
 0x131   : > { %v2860_v26 = vpop.f32.mrb[21].mxu0  ;;  %v2948_v15 = vpop.f32.mrb[21].mxu1 }
 0x132   : > { %v4332_v53 = vadd.f32 %v2860_v26, %v2859_v17  ;;  %v2862_v25 = vpop.f32.mrb[22].mxu0  ;;  %v2949_v33 = vadd.f32 %v2948_v15, %v2947_v0  ;;  %v2950_v23 = vpop.f32.mrb[22].mxu1 }
 0x133   : > { %v2863_v13 = vpop.f32.mrb[23].mxu0  ;;  %v2951_v19 = vpop.f32.mrb[23].mxu1 }
 0x134   : > { %v4334_v37 = vadd.f32 %v2863_v13, %v2862_v25  ;;  %v4339_v21 = vadd.f32 %v2949_v33, %v4267_v9  ;;  %v2952_v44 = vadd.f32 %v2951_v19, %v2950_v23  ;;  %v1018_v25 = vrot.slane %v4336_v28, 1 }
 0x135   : > { %3318 = vmatmul.mubr.bf16.gmra.mrb[128].mxu0 %v4168_v54  ;;  %2210 = vmatmul.mubr.bf16.gmra.mrb[128].mxu1 %v3737_v30  ;;  %v1019_v33 = vrot.slane %v677_v58, 1 }
 0x136   : > { %3321 = vmatprep.mubr.bf16.mxu0 %v4181_v20  ;;  %v4345_v29 = vadd.f32 %v2952_v44, %v4272_v1  ;;  %2217 = vmatprep.mubr.bf16.mxu1 %v4884_v14  ;;  %v1004_v1 = vshrl.u32 %v4336_v28, 16  ;;  %v1011_v14 = vshll.u32 %v677_v58, 16 }
 0x138   : > { %v2865_v45 = vpop.f32.mrb[24].mxu0  ;;  %v2953_v18 = vpop.f32.mrb[24].mxu1  ;;  %v1009_v41 = vor.u32 %v1008_v8, %v1004_v1  ;;  %v1013_v55 = vrot.slane %v1011_v14, 1 }
 0x139   : > { %v2866_v10 = vpop.f32.mrb[25].mxu0  ;;  %v2954_v11 = vpop.f32.mrb[25].mxu1 }
 0x13a   : > { %v4349_v9 = vadd.f32 %v2866_v10, %v2865_v45  ;;  %v2868_v51 = vpop.f32.mrb[26].mxu0  ;;  %v2955_v54 = vadd.f32 %v2954_v11, %v2953_v18  ;;  %v2956_v48 = vpop.f32.mrb[26].mxu1 }
 0x13b   : > { %v2869_v30 = vpop.f32.mrb[27].mxu0  ;;  %v2957_v20 = vpop.f32.mrb[27].mxu1 }
 0x13c   : > { %v4351_v38 = vadd.f32 %v2869_v30, %v2868_v51  ;;  %v4355_v2 = vadd.f32 %v2955_v54, %v4282_v32  ;;  %v2958_v43 = vadd.f32 %v2957_v20, %v2956_v48 }
 0x13d   : > { %3322 = vmatmul.mubr.bf16.gmra.mrb[132].mxu0 %v4193_v3  ;;  %2218 = vmatmul.mubr.bf16.gmra.mrb[132].mxu1 %v3796_v36 }
 0x13e   : > { %3325 = vmatprep.mubr.bf16.mxu0 %v4204_v31  ;;  %v4361_v57 = vadd.f32 %v2958_v43, %v4284_v62  ;;  %2225 = vmatprep.mubr.bf16.mxu1 %v4270_v40  ;;  %v1014_v62 = vsel %vm678_vm2, %v1009_v41, %v1013_v55 }
 0x140   : > { %v2871_v4 = vpop.f32.mrb[28].mxu0  ;;  %v2959_v17 = vpop.f32.mrb[28].mxu1 }
 0x141   : > { %v2872_v27 = vpop.f32.mrb[29].mxu0  ;;  %v2960_v32 = vpop.f32.mrb[29].mxu1 }
 0x142   : > { %v4364_v52 = vadd.f32 %v2872_v27, %v2871_v4  ;;  %v2874_v46 = vpop.f32.mrb[30].mxu0  ;;  %v2961_v0 = vadd.f32 %v2960_v32, %v2959_v17  ;;  %v2962_v3 = vpop.f32.mrb[30].mxu1 }
 0x143   : > { %v2875_v26 = vpop.f32.mrb[31].mxu0  ;;  %v2963_v31 = vpop.f32.mrb[31].mxu1 }
 0x144   : > { %v4366_v36 = vadd.f32 %v2875_v26, %v2874_v46  ;;  %v4370_v15 = vadd.f32 %v2961_v0, %v4297_v6  ;;  %v2964_v40 = vadd.f32 %v2963_v31, %v2962_v3 }
 0x145   : > { %3326 = vmatmul.mubr.bf16.gmra.mrb[136].mxu0 %v4215_v34  ;;  %2226 = vmatmul.mubr.bf16.gmra.mrb[136].mxu1 %v4206_v24  ;;  %v1020_v34 = vsel %vm919_vm3, %v1018_v25, %v1019_v33 }
 0x146   : > { %3329 = vmatprep.mubr.bf16.mxu0 %v4261_v49  ;;  %v4377_v23 = vadd.f32 %v2964_v40, %v4301_v7  ;;  %2233 = vmatprep.mubr.bf16.mxu1 %v1014_v62 }
 0x148   : > { %v2877_v13 = vpop.f32.mrb[32].mxu0  ;;  %v2965_v19 = vpop.f32.mrb[32].mxu1 }
 0x149   : > { %v2878_v12 = vpop.f32.mrb[33].mxu0  ;;  %v2966_v6 = vpop.f32.mrb[33].mxu1 }
 0x14a   : > { %v4379_v44 = vadd.f32 %v2878_v12, %v2877_v13  ;;  %v2880_v45 = vpop.f32.mrb[34].mxu0  ;;  %v2967_v22 = vadd.f32 %v2966_v6, %v2965_v19  ;;  %v2968_v24 = vpop.f32.mrb[34].mxu1 }
 0x14b   : > { %v2881_v18 = vpop.f32.mrb[35].mxu0  ;;  %v2969_v10 = vpop.f32.mrb[35].mxu1 }
 0x14c   : > { %v4382_v49 = vadd.f32 %v2881_v18, %v2880_v45  ;;  %v4385_v58 = vadd.f32 %v2967_v22, %v4317_v39  ;;  %v2970_v7 = vadd.f32 %v2969_v10, %v2968_v24 }
 0x14d   : > { %3330 = vmatmul.mubr.bf16.gmra.mrb[140].mxu0 %v1020_v34  ;;  %2234 = vmatmul.mubr.bf16.gmra.mrb[140].mxu1 %v4336_v28 }
 0x14e   : > { %v4389_v11 = vadd.f32 %v2970_v7, %v4319_v42 }
 0x150   : > { %v2883_v51 = vpop.f32.mrb[36].mxu0  ;;  %v2971_v54 = vpop.f32.mrb[36].mxu1 }
 0x151   : > { %v2884_v48 = vpop.f32.mrb[37].mxu0  ;;  %v2972_v20 = vpop.f32.mrb[37].mxu1 }
 0x152   : > { %v4391_v30 = vadd.f32 %v2884_v48, %v2883_v51  ;;  %v2886_v1 = vpop.f32.mrb[38].mxu0  ;;  %v2973_v8 = vadd.f32 %v2972_v20, %v2971_v54  ;;  %v2974_v14 = vpop.f32.mrb[38].mxu1 }
 0x153   : > { %v2887_v43 = vpop.f32.mrb[39].mxu0  ;;  %v2975_v39 = vpop.f32.mrb[39].mxu1 }
 0x154   : > { %v4393_v4 = vadd.f32 %v2887_v43, %v2886_v1  ;;  %v4396_v41 = vadd.f32 %v2973_v8, %v4332_v53  ;;  %v2976_v28 = vadd.f32 %v2975_v39, %v2974_v14 }
 0x156   : > { %v4399_v42 = vadd.f32 %v2976_v28, %v4334_v37 }
 0x158   : > { %v2889_v55 = vpop.f32.mrb[40].mxu0  ;;  %v2977_v17 = vpop.f32.mrb[40].mxu1 }
 0x159   : > { %v2890_v27 = vpop.f32.mrb[41].mxu0  ;;  %v2978_v46 = vpop.f32.mrb[41].mxu1 }
 0x15a   : > { %v4401_v32 = vadd.f32 %v2890_v27, %v2889_v55  ;;  %v2892_v0 = vpop.f32.mrb[42].mxu0  ;;  %v2979_v3 = vadd.f32 %v2978_v46, %v2977_v17  ;;  %v2980_v26 = vpop.f32.mrb[42].mxu1 }
 0x15b   : > { %v2893_v31 = vpop.f32.mrb[43].mxu0  ;;  %v2981_v40 = vpop.f32.mrb[43].mxu1 }
 0x15c   : > { %v4403_v62 = vadd.f32 %v2893_v31, %v2892_v0  ;;  %v4406_v53 = vadd.f32 %v2979_v3, %v4349_v9  ;;  %v2982_v25 = vadd.f32 %v2981_v40, %v2980_v26 }
 0x15e   : > { %v4409_v37 = vadd.f32 %v2982_v25, %v4351_v38 }
 0x160   : > { %v2895_v33 = vpop.f32.mrb[44].mxu0  ;;  %v2983_v13 = vpop.f32.mrb[44].mxu1 }
 0x161   : > { %v2896_v19 = vpop.f32.mrb[45].mxu0  ;;  %v2984_v6 = vpop.f32.mrb[45].mxu1 }
 0x162   : > { %v4411_v12 = vadd.f32 %v2896_v19, %v2895_v33  ;;  %v2898_v45 = vpop.f32.mrb[46].mxu0  ;;  %v2985_v34 = vadd.f32 %v2984_v6, %v2983_v13  ;;  %v2986_v22 = vpop.f32.mrb[46].mxu1 }
 0x163   : > { %v2899_v24 = vpop.f32.mrb[47].mxu0  ;;  %v2987_v10 = vpop.f32.mrb[47].mxu1 }
 0x164   : > { %v4413_v18 = vadd.f32 %v2899_v24, %v2898_v45  ;;  %v4416_v9 = vadd.f32 %v2985_v34, %v4364_v52  ;;  %v2988_v7 = vadd.f32 %v2987_v10, %v2986_v22 }
 0x166   : > { %v4419_v38 = vadd.f32 %v2988_v7, %v4366_v36 }
 0x168   : > { %v3053_v51 = vpop.f32.mrb[48].mxu0  ;;  %v2989_v54 = vpop.f32.mrb[48].mxu1 }
 0x169   : > { %v3054_v48 = vpop.f32.mrb[49].mxu0  ;;  %v2990_v20 = vpop.f32.mrb[49].mxu1 }
 0x16a   : > { %v3055_v1 = vadd.f32 %v3054_v48, %v3053_v51  ;;  %v3056_v8 = vpop.f32.mrb[50].mxu0  ;;  %v2991_v14 = vadd.f32 %v2990_v20, %v2989_v54  ;;  %v2992_v43 = vpop.f32.mrb[50].mxu1 }
 0x16b   : > { %v3057_v39 = vpop.f32.mrb[51].mxu0  ;;  %v2993_v55 = vpop.f32.mrb[51].mxu1 }
 0x16c   : > { %v4422_v28 = vadd.f32 %v3055_v1, %v4323_v61  ;;  %v3058_v17 = vadd.f32 %v3057_v39, %v3056_v8  ;;  %v4425_v52 = vadd.f32 %v2991_v14, %v4379_v44  ;;  %v2994_v27 = vadd.f32 %v2993_v55, %v2992_v43 }
 0x16e   : > { %v4428_v36 = vadd.f32 %v3058_v17, %v4329_v16  ;;  %v4431_v46 = vadd.f32 %v2994_v27, %v4382_v49 }
 0x170   : > { %v3059_v0 = vpop.f32.mrb[52].mxu0  ;;  %v2995_v3 = vpop.f32.mrb[52].mxu1 }
 0x171   : > { %v3060_v26 = vpop.f32.mrb[53].mxu0  ;;  %v2996_v31 = vpop.f32.mrb[53].mxu1 }
 0x172   : > { %v3061_v40 = vadd.f32 %v3060_v26, %v3059_v0  ;;  %v3062_v25 = vpop.f32.mrb[54].mxu0  ;;  %v2997_v61 = vadd.f32 %v2996_v31, %v2995_v3  ;;  %v2998_v33 = vpop.f32.mrb[54].mxu1 }
 0x173   : > { %v3063_v13 = vpop.f32.mrb[55].mxu0  ;;  %v2999_v44 = vpop.f32.mrb[55].mxu1 }
 0x174   : > { %v4434_v19 = vadd.f32 %v3061_v40, %v4339_v21  ;;  %v3064_v6 = vadd.f32 %v3063_v13, %v3062_v25  ;;  %v4437_v16 = vadd.f32 %v2997_v61, %v4391_v30  ;;  %v3000_v45 = vadd.f32 %v2999_v44, %v2998_v33 }
 0x176   : > { %v4440_v49 = vadd.f32 %v3064_v6, %v4345_v29  ;;  %v4443_v34 = vadd.f32 %v3000_v45, %v4393_v4 }
 0x178   : > { %v3065_v22 = vpop.f32.mrb[56].mxu0  ;;  %v3001_v24 = vpop.f32.mrb[56].mxu1 }
 0x179   : > { %v3066_v10 = vpop.f32.mrb[57].mxu0  ;;  %v3002_v7 = vpop.f32.mrb[57].mxu1 }
 0x17a   : > { %v3067_v51 = vadd.f32 %v3066_v10, %v3065_v22  ;;  %v3068_v54 = vpop.f32.mrb[58].mxu0  ;;  %v3003_v21 = vadd.f32 %v3002_v7, %v3001_v24  ;;  %v3004_v48 = vpop.f32.mrb[58].mxu1 }
 0x17b   : > { %v3069_v20 = vpop.f32.mrb[59].mxu0  ;;  %v3005_v30 = vpop.f32.mrb[59].mxu1 }
 0x17c   : > { %v4446_v1 = vadd.f32 %v3067_v51, %v4355_v2  ;;  %v3070_v8 = vadd.f32 %v3069_v20, %v3068_v54  ;;  %v4449_v29 = vadd.f32 %v3003_v21, %v4401_v32  ;;  %v3006_v14 = vadd.f32 %v3005_v30, %v3004_v48 }
 0x17e   : > { %v4452_v4 = vadd.f32 %v3070_v8, %v4361_v57  ;;  %v4455_v43 = vadd.f32 %v3006_v14, %v4403_v62 }
 0x180   : > { %v3071_v39 = vpop.f32.mrb[60].mxu0  ;;  %v3007_v55 = vpop.f32.mrb[60].mxu1 }
 0x181   : > { %v3072_v17 = vpop.f32.mrb[61].mxu0  ;;  %v3008_v27 = vpop.f32.mrb[61].mxu1 }
 0x182   : > { %v3073_v0 = vadd.f32 %v3072_v17, %v3071_v39  ;;  %v3074_v3 = vpop.f32.mrb[62].mxu0  ;;  %v3009_v2 = vadd.f32 %v3008_v27, %v3007_v55  ;;  %v3010_v26 = vpop.f32.mrb[62].mxu1 }
 0x183   : > { %v3075_v31 = vpop.f32.mrb[63].mxu0  ;;  %v3011_v32 = vpop.f32.mrb[63].mxu1 }
 0x184   : > { %v4458_v40 = vadd.f32 %v3073_v0, %v4370_v15  ;;  %v3076_v25 = vadd.f32 %v3075_v31, %v3074_v3  ;;  %v4461_v57 = vadd.f32 %v3009_v2, %v4411_v12  ;;  %v3012_v61 = vadd.f32 %v3011_v32, %v3010_v26 }
 0x186   : > { %v4464_v62 = vadd.f32 %v3076_v25, %v4377_v23  ;;  %v4467_v33 = vadd.f32 %v3012_v61, %v4413_v18 }
 0x188   : > { %v3077_v13 = vpop.f32.mrb[64].mxu0  ;;  %v3013_v44 = vpop.f32.mrb[64].mxu1 }
 0x189   : > { %v3078_v6 = vpop.f32.mrb[65].mxu0  ;;  %v3014_v45 = vpop.f32.mrb[65].mxu1 }
 0x18a   : > { %v3079_v22 = vadd.f32 %v3078_v6, %v3077_v13  ;;  %v3080_v24 = vpop.f32.mrb[66].mxu0  ;;  %v3015_v15 = vadd.f32 %v3014_v45, %v3013_v44  ;;  %v3016_v10 = vpop.f32.mrb[66].mxu1 }
 0x18b   : > { %v3081_v7 = vpop.f32.mrb[67].mxu0  ;;  %v3017_v12 = vpop.f32.mrb[67].mxu1 }
 0x18c   : > { %v4470_v51 = vadd.f32 %v3079_v22, %v4385_v58  ;;  %v3082_v54 = vadd.f32 %v3081_v7, %v3080_v24  ;;  %v4473_v23 = vadd.f32 %v3015_v15, %v4252_v56  ;;  %v3018_v21 = vadd.f32 %v3017_v12, %v3016_v10 }
 0x18e   : > { %v4476_v18 = vadd.f32 %v3082_v54, %v4389_v11  ;;  %v4479_v48 = vadd.f32 %v3018_v21, %v4257_v59 }
 0x190   : > { %v3083_v20 = vpop.f32.mrb[68].mxu0  ;;  %v3019_v30 = vpop.f32.mrb[68].mxu1 }
 0x191   : > { %v3084_v8 = vpop.f32.mrb[69].mxu0  ;;  %v3020_v14 = vpop.f32.mrb[69].mxu1 }
 0x192   : > { %v3085_v39 = vadd.f32 %v3084_v8, %v3083_v20  ;;  %v3086_v55 = vpop.f32.mrb[70].mxu0  ;;  %v3021_v58 = vadd.f32 %v3020_v14, %v3019_v30  ;;  %v3022_v17 = vpop.f32.mrb[70].mxu1 }
 0x193   : > { %v3087_v27 = vpop.f32.mrb[71].mxu0  ;;  %v3023_v56 = vpop.f32.mrb[71].mxu1 }
 0x194   : > { %v4482_v0 = vadd.f32 %v3085_v39, %v4396_v41  ;;  %v3088_v3 = vadd.f32 %v3087_v27, %v3086_v55  ;;  %v4485_v11 = vadd.f32 %v3021_v58, %v4274_v47  ;;  %v3024_v2 = vadd.f32 %v3023_v56, %v3022_v17 }
 0x196   : > { %v4488_v59 = vadd.f32 %v3088_v3, %v4399_v42  ;;  %v4491_v26 = vadd.f32 %v3024_v2, %v4278_v5 }
 0x198   : > { %v3089_v31 = vpop.f32.mrb[72].mxu0  ;;  %v3025_v32 = vpop.f32.mrb[72].mxu1 }
 0x199   : > { %v3090_v25 = vpop.f32.mrb[73].mxu0  ;;  %v3026_v61 = vpop.f32.mrb[73].mxu1 }
 0x19a   : > { %v3091_v13 = vadd.f32 %v3090_v25, %v3089_v31  ;;  %v3092_v44 = vpop.f32.mrb[74].mxu0  ;;  %v3027_v41 = vadd.f32 %v3026_v61, %v3025_v32  ;;  %v3028_v6 = vpop.f32.mrb[74].mxu1 }
 0x19b   : > { %v3093_v45 = vpop.f32.mrb[75].mxu0  ;;  %v3029_v47 = vpop.f32.mrb[75].mxu1 }
 0x19c   : > { %v4494_v22 = vadd.f32 %v3091_v13, %v4406_v53  ;;  %v3094_v24 = vadd.f32 %v3093_v45, %v3092_v44  ;;  %v4497_v42 = vadd.f32 %v3027_v41, %v4290_v63  ;;  %v3030_v15 = vadd.f32 %v3029_v47, %v3028_v6 }
 0x19e   : > { %v4500_v5 = vadd.f32 %v3094_v24, %v4409_v37  ;;  %v4503_v10 = vadd.f32 %v3030_v15, %v4292_v50 }
 0x1a0   : > { %v3095_v7 = vpop.f32.mrb[76].mxu0  ;;  %v3031_v12 = vpop.f32.mrb[76].mxu1 }
 0x1a1   : > { %v3096_v54 = vpop.f32.mrb[77].mxu0  ;;  %v3032_v21 = vpop.f32.mrb[77].mxu1 }
 0x1a2   : > { %v3097_v20 = vadd.f32 %v3096_v54, %v3095_v7  ;;  %v3098_v30 = vpop.f32.mrb[78].mxu0  ;;  %v3033_v53 = vadd.f32 %v3032_v21, %v3031_v12  ;;  %v3034_v8 = vpop.f32.mrb[78].mxu1 }
 0x1a3   : > { %v3099_v14 = vpop.f32.mrb[79].mxu0  ;;  %v3035_v63 = vpop.f32.mrb[79].mxu1 }
 0x1a4   : > { %v4506_v39 = vadd.f32 %v3097_v20, %v4416_v9  ;;  %v3100_v55 = vadd.f32 %v3099_v14, %v3098_v30  ;;  %v4509_v37 = vadd.f32 %v3033_v53, %v4304_v60  ;;  %v3036_v58 = vadd.f32 %v3035_v63, %v3034_v8 }
 0x1a6   : > { %v4512_v50 = vadd.f32 %v3100_v55, %v4419_v38  ;;  %v4515_v17 = vadd.f32 %v3036_v58, %v4308_v35 }
 0x1a8   : > { %v3101_v27 = vpop.f32.mrb[80].mxu0  ;;  %v3165_v56 = vpop.f32.mrb[80].mxu1 }
 0x1a9   : > { %v3102_v3 = vpop.f32.mrb[81].mxu0  ;;  %v3166_v31 = vpop.f32.mrb[81].mxu1 }
 0x1aa   : > { %v3103_v2 = vadd.f32 %v3102_v3, %v3101_v27  ;;  %v3104_v32 = vpop.f32.mrb[82].mxu0  ;;  %v3167_v9 = vadd.f32 %v3166_v31, %v3165_v56  ;;  %v3168_v25 = vpop.f32.mrb[82].mxu1 }
 0x1ab   : > { %v3105_v61 = vpop.f32.mrb[83].mxu0  ;;  %v3169_v44 = vpop.f32.mrb[83].mxu1 }
 0x1ac   : > { %v4518_v13 = vadd.f32 %v3103_v2, %v4425_v52  ;;  %v3106_v60 = vadd.f32 %v3105_v61, %v3104_v32  ;;  %v3170_v41 = vadd.f32 %v3169_v44, %v3168_v25  ;;  %v4521_v38 = vadd.f32 %v3167_v9, %v4422_v28 }
 0x1ae   : > { %v4524_v35 = vadd.f32 %v3106_v60, %v4431_v46  ;;  %v4527_v6 = vadd.f32 %v3170_v41, %v4428_v36 }
 0x1b0   : > { %v3107_v45 = vpop.f32.mrb[84].mxu0  ;;  %v3171_v47 = vpop.f32.mrb[84].mxu1 }
 0x1b1   : > { %v3108_v24 = vpop.f32.mrb[85].mxu0  ;;  %v3172_v7 = vpop.f32.mrb[85].mxu1 }
 0x1b2   : > { %v3109_v15 = vadd.f32 %v3108_v24, %v3107_v45  ;;  %v3110_v12 = vpop.f32.mrb[86].mxu0  ;;  %v3173_v52 = vadd.f32 %v3172_v7, %v3171_v47  ;;  %v3174_v54 = vpop.f32.mrb[86].mxu1 }
 0x1b3   : > { %v3111_v21 = vpop.f32.mrb[87].mxu0  ;;  %v3175_v30 = vpop.f32.mrb[87].mxu1 }
 0x1b4   : > { %v4530_v20 = vadd.f32 %v3109_v15, %v4437_v16  ;;  %v3112_v28 = vadd.f32 %v3111_v21, %v3110_v12  ;;  %v3176_v53 = vadd.f32 %v3175_v30, %v3174_v54  ;;  %v4533_v46 = vadd.f32 %v3173_v52, %v4434_v19 }
 0x1b6   : > { %v4536_v36 = vadd.f32 %v3112_v28, %v4443_v34  ;;  %v4539_v8 = vadd.f32 %v3176_v53, %v4440_v49 }
 0x1b8   : > { %v3113_v14 = vpop.f32.mrb[88].mxu0  ;;  %v3177_v63 = vpop.f32.mrb[88].mxu1 }
 0x1b9   : > { %v3114_v55 = vpop.f32.mrb[89].mxu0  ;;  %v3178_v27 = vpop.f32.mrb[89].mxu1 }
 0x1ba   : > { %v3115_v58 = vadd.f32 %v3114_v55, %v3113_v14  ;;  %v3116_v56 = vpop.f32.mrb[90].mxu0  ;;  %v3179_v16 = vadd.f32 %v3178_v27, %v3177_v63  ;;  %v3180_v3 = vpop.f32.mrb[90].mxu1 }
 0x1bb   : > { %v3117_v2 = vpop.f32.mrb[91].mxu0  ;;  %v3181_v32 = vpop.f32.mrb[91].mxu1 }
 0x1bc   : > { %v4542_v31 = vadd.f32 %v3115_v58, %v4449_v29  ;;  %v3118_v19 = vadd.f32 %v3117_v2, %v3116_v56  ;;  %v3182_v9 = vadd.f32 %v3181_v32, %v3180_v3  ;;  %v4545_v34 = vadd.f32 %v3179_v16, %v4446_v1 }
 0x1be   : > { %v4548_v49 = vadd.f32 %v3118_v19, %v4455_v43  ;;  %v4551_v25 = vadd.f32 %v3182_v9, %v4452_v4 }
 0x1c0   : > { %v3119_v61 = vpop.f32.mrb[92].mxu0  ;;  %v3183_v60 = vpop.f32.mrb[92].mxu1 }
 0x1c1   : > { %v3120_v44 = vpop.f32.mrb[93].mxu0  ;;  %v3184_v45 = vpop.f32.mrb[93].mxu1 }
 0x1c2   : > { %v3121_v41 = vadd.f32 %v3120_v44, %v3119_v61  ;;  %v3122_v47 = vpop.f32.mrb[94].mxu0  ;;  %v3185_v29 = vadd.f32 %v3184_v45, %v3183_v60  ;;  %v3186_v24 = vpop.f32.mrb[94].mxu1 }
 0x1c3   : > { %v3123_v15 = vpop.f32.mrb[95].mxu0  ;;  %v3187_v12 = vpop.f32.mrb[95].mxu1 }
 0x1c4   : > { %v4554_v7 = vadd.f32 %v3121_v41, %v4461_v57  ;;  %v3124_v1 = vadd.f32 %v3123_v15, %v3122_v47  ;;  %v3188_v52 = vadd.f32 %v3187_v12, %v3186_v24  ;;  %v4557_v43 = vadd.f32 %v3185_v29, %v4458_v40 }
 0x1c6   : > { %v4560_v4 = vadd.f32 %v3124_v1, %v4467_v33  ;;  %v4563_v54 = vadd.f32 %v3188_v52, %v4464_v62 }
 0x1c8   : > { %v3125_v21 = vpop.f32.mrb[96].mxu0  ;;  %v3189_v28 = vpop.f32.mrb[96].mxu1 }
 0x1c9   : > { %v3126_v30 = vpop.f32.mrb[97].mxu0  ;;  %v3190_v14 = vpop.f32.mrb[97].mxu1 }
 0x1ca   : > { %v3127_v53 = vadd.f32 %v3126_v30, %v3125_v21  ;;  %v3128_v63 = vpop.f32.mrb[98].mxu0  ;;  %v3191_v57 = vadd.f32 %v3190_v14, %v3189_v28  ;;  %v3192_v55 = vpop.f32.mrb[98].mxu1 }
 0x1cb   : > { %v3129_v58 = vpop.f32.mrb[99].mxu0  ;;  %v3193_v56 = vpop.f32.mrb[99].mxu1 }
 0x1cc   : > { %v4566_v27 = vadd.f32 %v3127_v53, %v4473_v23  ;;  %v3130_v40 = vadd.f32 %v3129_v58, %v3128_v63  ;;  %v3194_v16 = vadd.f32 %v3193_v56, %v3192_v55  ;;  %v4569_v33 = vadd.f32 %v3191_v57, %v4470_v51 }
 0x1ce   : > { %v4572_v62 = vadd.f32 %v3130_v40, %v4479_v48  ;;  %v4575_v3 = vadd.f32 %v3194_v16, %v4476_v18 }
 0x1d0   : > { %v3131_v2 = vpop.f32.mrb[100].mxu0  ;;  %v3195_v19 = vpop.f32.mrb[100].mxu1 }
 0x1d1   : > { %v3132_v32 = vpop.f32.mrb[101].mxu0  ;;  %v3196_v61 = vpop.f32.mrb[101].mxu1 }
 0x1d2   : > { %v3133_v9 = vadd.f32 %v3132_v32, %v3131_v2  ;;  %v3134_v60 = vpop.f32.mrb[102].mxu0  ;;  %v3197_v23 = vadd.f32 %v3196_v61, %v3195_v19  ;;  %v3198_v44 = vpop.f32.mrb[102].mxu1 }
 0x1d3   : > { %v3135_v41 = vpop.f32.mrb[103].mxu0  ;;  %v3199_v47 = vpop.f32.mrb[103].mxu1 }
 0x1d4   : > { %v4578_v45 = vadd.f32 %v3133_v9, %v4485_v11  ;;  %v3136_v51 = vadd.f32 %v3135_v41, %v3134_v60  ;;  %v3200_v29 = vadd.f32 %v3199_v47, %v3198_v44  ;;  %v4581_v48 = vadd.f32 %v3197_v23, %v4482_v0 }
 0x1d6   : > { %v4584_v18 = vadd.f32 %v3136_v51, %v4491_v26  ;;  %v4587_v24 = vadd.f32 %v3200_v29, %v4488_v59 }
 0x1d8   : > { %v3137_v15 = vpop.f32.mrb[104].mxu0  ;;  %v3201_v1 = vpop.f32.mrb[104].mxu1 }
 0x1d9   : > { %v3138_v12 = vpop.f32.mrb[105].mxu0  ;;  %v3202_v21 = vpop.f32.mrb[105].mxu1 }
 0x1da   : > { %v3139_v52 = vadd.f32 %v3138_v12, %v3137_v15  ;;  %v3140_v28 = vpop.f32.mrb[106].mxu0  ;;  %v3203_v11 = vadd.f32 %v3202_v21, %v3201_v1  ;;  %v3204_v30 = vpop.f32.mrb[106].mxu1 }
 0x1db   : > { %v3141_v53 = vpop.f32.mrb[107].mxu0  ;;  %v3205_v63 = vpop.f32.mrb[107].mxu1 }
 0x1dc   : > { %v4590_v14 = vadd.f32 %v3139_v52, %v4497_v42  ;;  %v3142_v0 = vadd.f32 %v3141_v53, %v3140_v28  ;;  %v3206_v57 = vadd.f32 %v3205_v63, %v3204_v30  ;;  %v4593_v26 = vadd.f32 %v3203_v11, %v4494_v22 }
 0x1de   : > { %v4596_v59 = vadd.f32 %v3142_v0, %v4503_v10  ;;  %v4599_v55 = vadd.f32 %v3206_v57, %v4500_v5 }
 0x1e0   : > { %v3143_v58 = vpop.f32.mrb[108].mxu0  ;;  %v3207_v40 = vpop.f32.mrb[108].mxu1 }
 0x1e1   : > { %v3144_v56 = vpop.f32.mrb[109].mxu0  ;;  %v3208_v2 = vpop.f32.mrb[109].mxu1 }
 0x1e2   : > { %v3145_v16 = vadd.f32 %v3144_v56, %v3143_v58  ;;  %v3146_v42 = vpop.f32.mrb[110].mxu0  ;;  %v3209_v19 = vadd.f32 %v3208_v2, %v3207_v40  ;;  %v3210_v32 = vpop.f32.mrb[110].mxu1 }
 0x1e3   : > { %v3147_v9 = vpop.f32.mrb[111].mxu0  ;;  %v3211_v60 = vpop.f32.mrb[111].mxu1 }
 0x1e4   : > { %v4602_v61 = vadd.f32 %v3145_v16, %v4509_v37  ;;  %v3148_v22 = vadd.f32 %v3147_v9, %v3146_v42  ;;  %v3212_v23 = vadd.f32 %v3211_v60, %v3210_v32  ;;  %v4606_v10 = vadd.f32 %v3209_v19, %v4506_v39 }
 0x1e6   : > { %v4609_v5 = vadd.f32 %v3148_v22, %v4515_v17  ;;  %v4612_v44 = vadd.f32 %v3212_v23, %v4512_v50 }
 0x1e8   : > { %v3303_v37 = vpop.f32.mrb[112].mxu0  ;;  %v3213_v41 = vpop.f32.mrb[112].mxu1 }
 0x1e9   : > { %v4620_v51 = vadd.f32 %v3303_v37, %v4533_v46  ;;  %v2276_v39 = vpop.f32.mrb[113].mxu0  ;;  %v3214_v17 = vpop.f32.mrb[113].mxu1 }
 0x1ea   : > { %v4623_v47 = vadd.f32 %v2276_v39, %v4521_v38  ;;  %v3304_v50 = vpop.f32.mrb[114].mxu0  ;;  %v3215_v29 = vadd.f32 %v3214_v17, %v3213_v41  ;;  %v3216_v15 = vpop.f32.mrb[114].mxu1 }
 0x1eb   : > { %2547 = vst [vmem:[%s4617_s9 + $0x10] sm:$0xff] %v4620_v51  ;;  %v4628_v1 = vadd.f32 %v3304_v50, %v4539_v8  ;;  %v2279_v12 = vpop.f32.mrb[115].mxu0  ;;  %v3217_v52 = vpop.f32.mrb[115].mxu1 }
 0x1ec   : > { %2545 = vst [vmem:[%s4617_s9] sm:$0xff] %v4623_v47  ;;  %v4633_v46 = vadd.f32 %v2279_v12, %v4527_v6  ;;  %v3218_v38 = vadd.f32 %v3217_v52, %v3216_v15  ;;  %v4638_v21 = vadd.f32 %v3215_v29, %v4518_v13 }
 0x1ed   : > { %2548 = vst [vmem:[%s4617_s9 + $0x18] sm:$0xff] %v4628_v1 }
 0x1ee   : > { %v2403_v28 = vadd.f32 %v4633_v46, %v4623_v47  ;;  %2546 = vst [vmem:[%s4617_s9 + $0x8] sm:$0xff] %v4633_v46  ;;  %v4645_v8 = vadd.f32 %v3218_v38, %v4524_v35 }
 0x1f0   : > { %v2404_v11 = vadd.f32 %v2403_v28, %v4620_v51  ;;  %v3307_v6 = vpop.f32.mrb[116].mxu0  ;;  %v3219_v30 = vpop.f32.mrb[116].mxu1 }
 0x1f1   : > { %v4649_v53 = vadd.f32 %v3307_v6, %v4557_v43  ;;  %v2292_v0 = vpop.f32.mrb[117].mxu0  ;;  %v3220_v13 = vpop.f32.mrb[117].mxu1 }
 0x1f2   : > { %v4652_v63 = vadd.f32 %v2292_v0, %v4545_v34  ;;  %v2405_v57 = vadd.f32 %v2404_v11, %v4628_v1  ;;  %v3308_v58 = vpop.f32.mrb[118].mxu0  ;;  %v3221_v35 = vadd.f32 %v3220_v13, %v3219_v30  ;;  %v3222_v40 = vpop.f32.mrb[118].mxu1 }
 0x1f3   : > { %2551 = vst [vmem:[%s4617_s9 + $0x30] sm:$0xff] %v4649_v53  ;;  %v4658_v56 = vadd.f32 %v3308_v58, %v4563_v54  ;;  %v2295_v16 = vpop.f32.mrb[119].mxu0  ;;  %v3223_v2 = vpop.f32.mrb[119].mxu1 }
 0x1f4   : > { %v2406_v43 = vadd.f32 %v2405_v57, %v4652_v63  ;;  %2549 = vst [vmem:[%s4617_s9 + $0x20] sm:$0xff] %v4652_v63  ;;  %v4664_v34 = vadd.f32 %v2295_v16, %v4551_v25  ;;  %v3224_v42 = vadd.f32 %v3223_v2, %v3222_v40  ;;  %v2188_v19 = vadd.f32 %v3221_v35, %v4530_v20 }
 0x1f5   : > { %2552 = vst [vmem:[%s4617_s9 + $0x38] sm:$0xff] %v4658_v56 }
 0x1f6   : > { %v2407_v32 = vadd.f32 %v2406_v43, %v4664_v34  ;;  %2550 = vst [vmem:[%s4617_s9 + $0x28] sm:$0xff] %v4664_v34  ;;  %v2191_v54 = vadd.f32 %v3224_v42, %v4536_v36 }
 0x1f8   : > { %v2408_v9 = vadd.f32 %v2407_v32, %v4649_v53  ;;  %v3311_v22 = vpop.f32.mrb[120].mxu0  ;;  %v3225_v60 = vpop.f32.mrb[120].mxu1 }
 0x1f9   : > { %v4675_v25 = vadd.f32 %v3311_v22, %v4581_v48  ;;  %v2308_v23 = vpop.f32.mrb[121].mxu0  ;;  %v3226_v37 = vpop.f32.mrb[121].mxu1 }
 0x1fa   : > { %v4678_v41 = vadd.f32 %v2308_v23, %v4569_v33  ;;  %v2409_v20 = vadd.f32 %v2408_v9, %v4658_v56  ;;  %v3312_v39 = vpop.f32.mrb[122].mxu0  ;;  %v3227_v36 = vadd.f32 %v3226_v37, %v3225_v60  ;;  %v3228_v17 = vpop.f32.mrb[122].mxu1 }
 0x1fb   : > { %2555 = vst [vmem:[%s4617_s9 + $0x50] sm:$0xff] %v4675_v25  ;;  %v4684_v50 = vadd.f32 %v3312_v39, %v4587_v24  ;;  %v2311_v29 = vpop.f32.mrb[123].mxu0  ;;  %v3229_v15 = vpop.f32.mrb[123].mxu1 }
 0x1fc   : > { %v2410_v48 = vadd.f32 %v2409_v20, %v4678_v41  ;;  %2553 = vst [vmem:[%s4617_s9 + $0x40] sm:$0xff] %v4678_v41  ;;  %v4690_v33 = vadd.f32 %v2311_v29, %v4575_v3  ;;  %v3230_v12 = vadd.f32 %v3229_v15, %v3228_v17  ;;  %v2196_v52 = vadd.f32 %v3227_v36, %v4542_v31 }
 0x1fd   : > { %2556 = vst [vmem:[%s4617_s9 + $0x58] sm:$0xff] %v4684_v50 }
 0x1fe   : > { %v2411_v38 = vadd.f32 %v2410_v48, %v4690_v33  ;;  %2554 = vst [vmem:[%s4617_s9 + $0x48] sm:$0xff] %v4690_v33  ;;  %v4699_v24 = vadd.f32 %v3230_v12, %v4548_v49 }
 0x200   : > { %v2412_v28 = vadd.f32 %v2411_v38, %v4675_v25  ;;  %v3315_v11 = vpop.f32.mrb[124].mxu0  ;;  %v3231_v6 = vpop.f32.mrb[124].mxu1 }
 0x201   : > { %v4703_v3 = vadd.f32 %v3315_v11, %v4606_v10  ;;  %v2324_v30 = vpop.f32.mrb[125].mxu0  ;;  %v3232_v0 = vpop.f32.mrb[125].mxu1 }
 0x202   : > { %v4706_v31 = vadd.f32 %v2324_v30, %v4593_v26  ;;  %v2413_v13 = vadd.f32 %v2412_v28, %v4684_v50  ;;  %v3316_v57 = vpop.f32.mrb[126].mxu0  ;;  %v3233_v49 = vadd.f32 %v3232_v0, %v3231_v6  ;;  %v3234_v58 = vpop.f32.mrb[126].mxu1 }
 0x203   : > { %2559 = vst [vmem:[%s4617_s9 + $0x70] sm:$0xff] %v4703_v3  ;;  %v4712_v35 = vadd.f32 %v3316_v57, %v4612_v44  ;;  %v2327_v40 = vpop.f32.mrb[127].mxu0  ;;  %v3235_v16 = vpop.f32.mrb[127].mxu1 }
 0x204   : > { %v2414_v10 = vadd.f32 %v2413_v13, %v4706_v31  ;;  %2557 = vst [vmem:[%s4617_s9 + $0x60] sm:$0xff] %v4706_v31  ;;  %v4718_v26 = vadd.f32 %v2327_v40, %v4599_v55  ;;  %v3236_v43 = vadd.f32 %v3235_v16, %v3234_v58  ;;  %v2204_v2 = vadd.f32 %v3233_v49, %v4554_v7 }
 0x205   : > { %2560 = vst [vmem:[%s4617_s9 + $0x78] sm:$0xff] %v4712_v35 }
 0x206   : > { %v2415_v42 = vadd.f32 %v2414_v10, %v4718_v26  ;;  %2558 = vst [vmem:[%s4617_s9 + $0x68] sm:$0xff] %v4718_v26  ;;  %v2207_v44 = vadd.f32 %v3236_v43, %v4560_v4 }
 0x208   : > { %v2416_v32 = vadd.f32 %v2415_v42, %v4703_v3  ;;  %v3319_v9 = vpop.f32.mrb[128].mxu0  ;;  %v3237_v22 = vpop.f32.mrb[128].mxu1 }
 0x209   : > { %v4728_v55 = vadd.f32 %v3319_v9, %v2188_v19  ;;  %v2340_v60 = vpop.f32.mrb[129].mxu0  ;;  %v3238_v23 = vpop.f32.mrb[129].mxu1 }
 0x20a   : > { %v4731_v37 = vadd.f32 %v2340_v60, %v4638_v21  ;;  %v2417_v7 = vadd.f32 %v2416_v32, %v4712_v35  ;;  %v3320_v20 = vpop.f32.mrb[130].mxu0  ;;  %v3239_v4 = vadd.f32 %v3238_v23, %v3237_v22  ;;  %v3240_v39 = vpop.f32.mrb[130].mxu1 }
 0x20b   : > { %2563 = vst [vmem:[%s4617_s9 + $0x90] sm:$0xff] %v4728_v55  ;;  %v4736_v36 = vadd.f32 %v3320_v20, %v2191_v54  ;;  %v2343_v17 = vpop.f32.mrb[131].mxu0  ;;  %v3241_v19 = vpop.f32.mrb[131].mxu1 }
 0x20c   : > { %v2418_v29 = vadd.f32 %v2417_v7, %v4731_v37  ;;  %2561 = vst [vmem:[%s4617_s9 + $0x80] sm:$0xff] %v4731_v37  ;;  %v4742_v48 = vadd.f32 %v2343_v17, %v4645_v8  ;;  %v3242_v21 = vadd.f32 %v3241_v19, %v3240_v39  ;;  %v2212_v15 = vadd.f32 %v3239_v4, %v4566_v27 }
 0x20d   : > { %2564 = vst [vmem:[%s4617_s9 + $0x98] sm:$0xff] %v4736_v36 }
 0x20e   : > { %v2419_v12 = vadd.f32 %v2418_v29, %v4742_v48  ;;  %2562 = vst [vmem:[%s4617_s9 + $0x88] sm:$0xff] %v4742_v48  ;;  %v2215_v54 = vadd.f32 %v3242_v21, %v4572_v62 }
 0x210   : > { %v2420_v38 = vadd.f32 %v2419_v12, %v4728_v55  ;;  %v3323_v28 = vpop.f32.mrb[132].mxu0  ;;  %v3243_v11 = vpop.f32.mrb[132].mxu1 }
 0x211   : > { %v4752_v8 = vadd.f32 %v3323_v28, %v2204_v2  ;;  %v2356_v6 = vpop.f32.mrb[133].mxu0  ;;  %v3244_v30 = vpop.f32.mrb[133].mxu1 }
 0x212   : > { %v4754_v0 = vadd.f32 %v2356_v6, %v2196_v52  ;;  %v2421_v27 = vadd.f32 %v2420_v38, %v4736_v36  ;;  %v3324_v13 = vpop.f32.mrb[134].mxu0  ;;  %v3245_v57 = vadd.f32 %v3244_v30, %v3243_v11  ;;  %v3246_v62 = vpop.f32.mrb[134].mxu1 }
 0x213   : > { %2567 = vst [vmem:[%s4617_s9 + $0xb0] sm:$0xff] %v4752_v8  ;;  %v4759_v49 = vadd.f32 %v3324_v13, %v2207_v44  ;;  %v2359_v58 = vpop.f32.mrb[135].mxu0  ;;  %v3247_v10 = vpop.f32.mrb[135].mxu1 }
 0x214   : > { %v2422_v40 = vadd.f32 %v2421_v27, %v4754_v0  ;;  %2565 = vst [vmem:[%s4617_s9 + $0xa0] sm:$0xff] %v4754_v0  ;;  %v4765_v16 = vadd.f32 %v2359_v58, %v4699_v24  ;;  %v3248_v52 = vadd.f32 %v3247_v10, %v3246_v62  ;;  %v2220_v43 = vadd.f32 %v3245_v57, %v4578_v45 }
 0x215   : > { %2568 = vst [vmem:[%s4617_s9 + $0xb8] sm:$0xff] %v4759_v49 }
 0x216   : > { %v2423_v2 = vadd.f32 %v2422_v40, %v4765_v16  ;;  %2566 = vst [vmem:[%s4617_s9 + $0xa8] sm:$0xff] %v4765_v16  ;;  %v2223_v42 = vadd.f32 %v3248_v52, %v4584_v18 }
 0x218   : > { %v2424_v44 = vadd.f32 %v2423_v2, %v4752_v8  ;;  %v3327_v32 = vpop.f32.mrb[136].mxu0  ;;  %v3249_v9 = vpop.f32.mrb[136].mxu1 }
 0x219   : > { %v4775_v24 = vadd.f32 %v3327_v32, %v2220_v43  ;;  %v2372_v22 = vpop.f32.mrb[137].mxu0  ;;  %v3250_v60 = vpop.f32.mrb[137].mxu1 }
 0x21a   : > { %v4777_v23 = vadd.f32 %v2372_v22, %v2212_v15  ;;  %v2425_v45 = vadd.f32 %v2424_v44, %v4759_v49  ;;  %v3328_v7 = vpop.f32.mrb[138].mxu0  ;;  %v3251_v20 = vadd.f32 %v3250_v60, %v3249_v9  ;;  %v3252_v18 = vpop.f32.mrb[138].mxu1 }
 0x21b   : > { %2571 = vst [vmem:[%s4617_s9 + $0xd0] sm:$0xff] %v4775_v24  ;;  %v4782_v4 = vadd.f32 %v3328_v7, %v2223_v42  ;;  %v2375_v39 = vpop.f32.mrb[139].mxu0  ;;  %v3253_v29 = vpop.f32.mrb[139].mxu1 }
 0x21c   : > { %v2426_v17 = vadd.f32 %v2425_v45, %v4777_v23  ;;  %2569 = vst [vmem:[%s4617_s9 + $0xc0] sm:$0xff] %v4777_v23  ;;  %v2376_v19 = vadd.f32 %v2375_v39, %v2215_v54  ;;  %v3254_v21 = vadd.f32 %v3253_v29, %v3252_v18  ;;  %v2228_v15 = vadd.f32 %v3251_v20, %v4590_v14 }
 0x21d   : > { %2572 = vst [vmem:[%s4617_s9 + $0xd8] sm:$0xff] %v4782_v4 }
 0x21e   : > { %v2427_v12 = vadd.f32 %v2426_v17, %v2376_v19  ;;  %2570 = vst [vmem:[%s4617_s9 + $0xc8] sm:$0xff] %v2376_v19  ;;  %v2231_v38 = vadd.f32 %v3254_v21, %v4596_v59 }
 0x220   : > { %v2428_v28 = vadd.f32 %v2427_v12, %v4775_v24  ;;  %v3331_v11 = vpop.f32.mrb[140].mxu0  ;;  %v3255_v6 = vpop.f32.mrb[140].mxu1 }
 0x221   : > { %v2388_v30 = vpop.f32.mrb[141].mxu0  ;;  %v3256_v27 = vpop.f32.mrb[141].mxu1 }
 0x222   : > { %v2389_v13 = vadd.f32 %v2388_v30, %v2228_v15  ;;  %v2429_v54 = vadd.f32 %v2428_v28, %v4782_v4  ;;  %v3332_v57 = vpop.f32.mrb[142].mxu0  ;;  %v3257_v62 = vadd.f32 %v3256_v27, %v3255_v6  ;;  %v3258_v14 = vpop.f32.mrb[142].mxu1 }
 0x223   : > { %v2391_v58 = vpop.f32.mrb[143].mxu0  ;;  %v3259_v10 = vpop.f32.mrb[143].mxu1 }
 0x224   : > { %v2430_v40 = vadd.f32 %v2429_v54, %v2389_v13  ;;  %2573 = vst [vmem:[%s4617_s9 + $0xe0] sm:$0xff] %v2389_v13  ;;  %v2392_v59 = vadd.f32 %v2391_v58, %v2231_v38  ;;  %v2236_v52 = vadd.f32 %v3257_v62, %v4602_v61  ;;  %v3260_v43 = vadd.f32 %v3259_v10, %v3258_v14 }
 0x226   : > { %v2431_v2 = vadd.f32 %v2430_v40, %v2392_v59  ;;  %2574 = vst [vmem:[%s4617_s9 + $0xe8] sm:$0xff] %v2392_v59  ;;  %v2397_v42 = vadd.f32 %v3331_v11, %v2236_v52  ;;  %v2239_v44 = vadd.f32 %v3260_v43, %v4609_v5 }
 0x228   : > { %2575 = vst [vmem:[%s4617_s9 + $0xf0] sm:$0xff] %v2397_v42  ;;  %v2400_v32 = vadd.f32 %v3332_v57, %v2239_v44  ;;  %v2432_v9 = vadd.f32 %v2431_v2, %v2397_v42 }
 0x22a   : > { %2576 = vst [vmem:[%s4617_s9 + $0xf8] sm:$0xff] %v2400_v32  ;;  %v2433_v22 = vadd.f32 %v2432_v9, %v2400_v32 }
 0x22c   : > { %v2434_v60 = vrot.slane %v2433_v22, 4 }
 0x22e   : > { %v2435_v45 = vadd.f32 %v2434_v60, %v2433_v22 }
 0x230   : > { %v2436_v7 = vrot.slane %v2435_v45, 2 }
 0x232   : > { %v2437_v20 = vadd.f32 %v2436_v7, %v2435_v45 }
 0x234   : > { %v2438_v18 = vrot.slane %v2437_v20, 1 }
 0x236   : > { %v2439_v39 = vadd.f32 %v2438_v18, %v2437_v20 }
 0x238   : > { %v2441_v61 = vmul.f32 0.00390625, %v2439_v39 }
 0x23a   : > { %2543 = vst [vmem:[%s265_s12] sm:$0x1] %v2441_v61  ;;  %v2451_v17 = vsub.f32 %v4690_v33, %v2441_v61  ;;  %v2453_v5 = vsub.f32 %v4684_v50, %v2441_v61  ;;  %v2454_v29 = vsub.f32 %v4706_v31, %v2441_v61  ;;  %v2455_v21 = vsub.f32 %v4718_v26, %v2441_v61 }
 0x23b   : > { %v2456_v15 = vsub.f32 %v4703_v3, %v2441_v61  ;;  %v2457_v12 = vsub.f32 %v4712_v35, %v2441_v61  ;;  %v2458_v38 = vsub.f32 %v4731_v37, %v2441_v61  ;;  %v2459_v28 = vsub.f32 %v4742_v48, %v2441_v61 }
 0x23c   : > { %v2460_v11 = vsub.f32 %v4728_v55, %v2441_v61  ;;  %v2461_v6 = vsub.f32 %v4736_v36, %v2441_v61  ;;  %v2462_v33 = vsub.f32 %v4754_v0, %v2441_v61  ;;  %v2463_v50 = vsub.f32 %v4765_v16, %v2441_v61 }
 0x23d   : > { %v2464_v31 = vsub.f32 %v4752_v8, %v2441_v61  ;;  %v4818_v26 = vsub.f32 %v4759_v49, %v2441_v61  ;;  %v4821_v3 = vsub.f32 %v4777_v23, %v2441_v61  ;;  %v4823_v35 = vsub.f32 %v2376_v19, %v2441_v61 }
 0x23e   : > { %v4826_v37 = vsub.f32 %v4775_v24, %v2441_v61  ;;  %v4829_v55 = vsub.f32 %v4782_v4, %v2441_v61  ;;  %v4831_v36 = vsub.f32 %v2389_v13, %v2441_v61  ;;  %v4833_v48 = vsub.f32 %v2392_v59, %v2441_v61 }
 0x23f   : > { %v4835_v0 = vsub.f32 %v2397_v42, %v2441_v61  ;;  %v4837_v8 = vsub.f32 %v2400_v32, %v2441_v61  ;;  %v2442_v49 = vsub.f32 %v4623_v47, %v2441_v61  ;;  %v2443_v16 = vsub.f32 %v4633_v46, %v2441_v61 }
 0x240   : > { %v2444_v23 = vsub.f32 %v4620_v51, %v2441_v61  ;;  %v2445_v30 = vsub.f32 %v4628_v1, %v2441_v61  ;;  %v2446_v4 = vsub.f32 %v4652_v63, %v2441_v61  ;;  %v2447_v54 = vsub.f32 %v4664_v34, %v2441_v61 }
 0x241   : > { %v2474_v19 = vmul.f32 %v2442_v49, %v2442_v49  ;;  %v2475_v24 = vmul.f32 %v2443_v16, %v2443_v16  ;;  %v2448_v14 = vsub.f32 %v4649_v53, %v2441_v61  ;;  %v2449_v46 = vsub.f32 %v4658_v56, %v2441_v61 }
 0x242   : > { %v2476_v27 = vmul.f32 %v2444_v23, %v2444_v23  ;;  %v2477_v57 = vmul.f32 %v2445_v30, %v2445_v30  ;;  %v2478_v58 = vmul.f32 %v2446_v4, %v2446_v4  ;;  %v2479_v40 = vmul.f32 %v2447_v54, %v2447_v54 }
 0x243   : > { %v2506_v13 = vadd.f32 %v2475_v24, %v2474_v19  ;;  %v2450_v10 = vsub.f32 %v4678_v41, %v2441_v61  ;;  %v2480_v59 = vmul.f32 %v2448_v14, %v2448_v14  ;;  %v2481_v52 = vmul.f32 %v2449_v46, %v2449_v46 }
 0x244   : > { %v2452_v43 = vsub.f32 %v4675_v25, %v2441_v61  ;;  %v2483_v42 = vmul.f32 %v2451_v17, %v2451_v17  ;;  %v2485_v9 = vmul.f32 %v2453_v5, %v2453_v5  ;;  %v2486_v60 = vmul.f32 %v2454_v29, %v2454_v29 }
 0x245   : > { %v2507_v62 = vadd.f32 %v2506_v13, %v2476_v27  ;;  %v2482_v2 = vmul.f32 %v2450_v10, %v2450_v10  ;;  %v2487_v45 = vmul.f32 %v2455_v21, %v2455_v21  ;;  %v2488_v20 = vmul.f32 %v2456_v15, %v2456_v15 }
 0x246   : > { %v2484_v32 = vmul.f32 %v2452_v43, %v2452_v43  ;;  %v2489_v18 = vmul.f32 %v2457_v12, %v2457_v12  ;;  %v2490_v49 = vmul.f32 %v2458_v38, %v2458_v38  ;;  %v2491_v23 = vmul.f32 %v2459_v28, %v2459_v28 }
 0x247   : > { %v2508_v47 = vadd.f32 %v2507_v62, %v2477_v57  ;;  %v2492_v61 = vmul.f32 %v2460_v11, %v2460_v11  ;;  %v2493_v17 = vmul.f32 %v2461_v6, %v2461_v6  ;;  %v2494_v30 = vmul.f32 %v2462_v33, %v2462_v33 }
 0x248   : > { %v2495_v5 = vmul.f32 %v2463_v50, %v2463_v50  ;;  %v2496_v29 = vmul.f32 %v2464_v31, %v2464_v31  ;;  %v2497_v21 = vmul.f32 %v4818_v26, %v4818_v26  ;;  %v2498_v12 = vmul.f32 %v4821_v3, %v4821_v3 }
 0x249   : > { %v2509_v51 = vadd.f32 %v2508_v47, %v2478_v58  ;;  %v2499_v28 = vmul.f32 %v4823_v35, %v4823_v35  ;;  %v2500_v6 = vmul.f32 %v4826_v37, %v4826_v37  ;;  %v2501_v50 = vmul.f32 %v4829_v55, %v4829_v55 }
 0x24a   : > { %v2502_v26 = vmul.f32 %v4831_v36, %v4831_v36  ;;  %v2503_v3 = vmul.f32 %v4833_v48, %v4833_v48  ;;  %v2504_v35 = vmul.f32 %v4835_v0, %v4835_v0  ;;  %v2505_v37 = vmul.f32 %v4837_v8, %v4837_v8 }
 0x24b   : > { %v2510_v1 = vadd.f32 %v2509_v51, %v2479_v40 }
 0x24d   : > { %v2511_v63 = vadd.f32 %v2510_v1, %v2480_v59 }
 0x24f   : > { %v2512_v34 = vadd.f32 %v2511_v63, %v2481_v52 }
 0x251   : > { %v2513_v44 = vadd.f32 %v2512_v34, %v2482_v2 }
 0x253   : > { %v2514_v53 = vadd.f32 %v2513_v44, %v2483_v42 }
 0x255   : > { %v2515_v22 = vadd.f32 %v2514_v53, %v2484_v32 }
 0x257   : > { %v2516_v56 = vadd.f32 %v2515_v22, %v2485_v9 }
 0x259   : > { %v2517_v7 = vadd.f32 %v2516_v56, %v2486_v60 }
 0x25b   : > { %v2518_v41 = vadd.f32 %v2517_v7, %v2487_v45 }
 0x25d   : > { %v2519_v39 = vadd.f32 %v2518_v41, %v2488_v20 }
 0x25f   : > { %v2520_v16 = vadd.f32 %v2519_v39, %v2489_v18 }
 0x261   : > { %v2521_v25 = vadd.f32 %v2520_v16, %v2490_v49 }
 0x263   : > { %v2522_v19 = vadd.f32 %v2521_v25, %v2491_v23 }
 0x265   : > { %v2523_v24 = vadd.f32 %v2522_v19, %v2492_v61 }
 0x267   : > { %v2524_v4 = vadd.f32 %v2523_v24, %v2493_v17 }
 0x269   : > { %v2525_v27 = vadd.f32 %v2524_v4, %v2494_v30 }
 0x26b   : > { %v2526_v13 = vadd.f32 %v2525_v27, %v2495_v5 }
 0x26d   : > { %v2527_v15 = vadd.f32 %v2526_v13, %v2496_v29 }
 0x26f   : > { %v2528_v38 = vadd.f32 %v2527_v15, %v2497_v21 }
 0x271   : > { %v2529_v11 = vadd.f32 %v2528_v38, %v2498_v12 }
 0x273   : > { %v2530_v33 = vadd.f32 %v2529_v11, %v2499_v28 }
 0x275   : > { %v2531_v31 = vadd.f32 %v2530_v33, %v2500_v6 }
 0x277   : > { %v2532_v54 = vadd.f32 %v2531_v31, %v2501_v50 }
 0x279   : > { %v2533_v57 = vadd.f32 %v2532_v54, %v2502_v26 }
 0x27b   : > { %v2534_v62 = vadd.f32 %v2533_v57, %v2503_v3 }
 0x27d   : > { %v2535_v14 = vadd.f32 %v2534_v62, %v2504_v35 }
 0x27f   : > { %v2536_v58 = vadd.f32 %v2535_v14, %v2505_v37 }
 0x281   : > { %v2537_v55 = vrot.slane %v2536_v58, 4 }
 0x283   : > { %v2538_v47 = vadd.f32 %v2537_v55, %v2536_v58 }
 0x285   : > { %v2539_v46 = vrot.slane %v2538_v47, 2 }
 0x287   : > { %v2540_v40 = vadd.f32 %v2539_v46, %v2538_v47 }
 0x289   : > { %v2541_v51 = vrot.slane %v2540_v40, 1 }
 0x28b   : > { %v2542_v36 = vadd.f32 %v2541_v51, %v2540_v40 }
 0x28d   : > { %2544 = vst [vmem:[%s268_s15] sm:$0x1] %v2542_v36 }
 0x28e PF: > { %s17_s21 = sadd.s32 1, %s3439_s21  }
 0x28f   : > { %p14_p4 = scmp.ge.s32.totalorder %s17_s21, 4  }
 0x291   :  { %16 = sbr.rel (!%p14_p4) target bundleno = 1 (0x1), region = 90 }

// kernel: residual_block_forward.3
= control target key start
LH: loop header
LB: loop body
LE: loop exit
PB: predicated region body
PF: predicated region fallthrough
CT: control target
= control target key end

     0   :  { %s4062_s15 = smov 0   ;;  %s5816_s0 = inlined_call_operand.vmem [shape: bf16[2,18,18,128], index: 0, kind: input, shape index: {}]   ;;  %s5817_s1 = inlined_call_operand.vmem [shape: bf16[1152,128], index: 1, kind: input, shape index: {}]   ;;  %s5818_s2 = inlined_call_operand.vmem [shape: bf16[2,18,18,128], index: 2, kind: output, shape index: {0}]   ;;  %s5819_s3 = inlined_call_operand.vmem [shape: f32[2,1,128], index: 3, kind: output, shape index: {1}]   ;;  %s5820_s4 = inlined_call_operand.vmem [shape: f32[2,1,128], index: 4, kind: output, shape index: {2}]  }
   0x1 LB: > { %s3041_s16 = sadd.s32 4294967295, %s4034_s15   ;;  %p3045_p0 = scmp.ge.s32.totalorder %s4034_s15, 1  ;;  %s4034_s15 = sphi %s4062_s15, %s15_s15  }
   0x2   : > { %p167_p1 = scmp.lt.s32.totalorder %s4034_s15, 3 }
   0x4   : > { %p168_p2 = pnand %p3045_p0, %p167_p1 }
   0x6   : > { %171 = sbr.rel (%p168_p2) target bundleno = 682 (0x2aa), region = 28 }
   0xd   : > { %v3915_v0 = vld [vmem:[%s5817_s1 + $0x40] sm:$0xff]   ;;  %v3917_v2 = vld [vmem:[%s5817_s1 + $0x48] sm:$0xff]   ;;  %p199_p3 = scmp.lt.s32.totalorder %s3041_s16, 1  ;;  %v3919_v4 = vld [vmem:[%s5817_s1 + $0x50] sm:$0xff]   ;;  %vm414_vm0 = vsmask.f32 7424 }
   0xe   : > { %v3916_v1 = vld [vmem:[%s5817_s1] sm:$0xff]   ;;  %3369 = vmatprep.subr.bf16.mxu0 %v3915_v0  ;;  %3889 = vmatprep.subr.bf16.mxu1 %v3915_v0  ;;  %v3918_v3 = vld [vmem:[%s5817_s1 + $0x8] sm:$0xff]   ;;  %v3920_v5 = vld [vmem:[%s5817_s1 + $0x10] sm:$0xff]   ;;  %vm623_vm1 = vcmask 1046528   ;;  %vm2319_vm2 = vcmask 1040384   ;;  %vm2822_vm7 = vcmask 1043456  }
   0xf   : > { %3370 = vmatpush3.bf16.msra.mxu0 %v3916_v1  ;;  %3897 = vmatpush3.bf16.msra.mxu1 %v3916_v1  ;;  %s5890_s16 = smov (!%p199_p3, %s3041_s16), 1  ;;  %v3921_v6 = vld [vmem:[%s5817_s1 + $0x58] sm:$0xff]   ;;  %v3923_v8 = vld [vmem:[%s5817_s1 + $0x60] sm:$0xff]   ;;  %v3925_v10 = vld [vmem:[%s5817_s1 + $0x68] sm:$0xff]   ;;  %vm2320_vm3 = vsmask.f32 256 }
  0x10   : > { %3371 = vmatprep.subr.bf16.mxu0 %v3917_v2  ;;  %3890 = vmatprep.subr.bf16.mxu1 %v3917_v2  ;;  %s3905_s5 = smul.u32 216, %s5890_s16  ;;  %v3922_v7 = vld [vmem:[%s5817_s1 + $0x18] sm:$0xff]   ;;  %v3924_v9 = vld [vmem:[%s5817_s1 + $0x20] sm:$0xff]   ;;  %v3926_v11 = vld [vmem:[%s5817_s1 + $0x28] sm:$0xff]   ;;  %vm2370_vm5 = vsmask.f32 7938  ;;  %s211_s9 = scalar_lea.vmem %s5819_s3, %s5890_s16 }
  0x11   : > { %v3927_v18 = vld [vmem:[%s5817_s1 + $0x70] sm:$0xff]   ;;  %v3929_v28 = vld [vmem:[%s5817_s1 + $0x78] sm:$0xff]   ;;  %v3935_v33 = vld [vmem:[%s5817_s1 + $0xc0] sm:$0xff]   ;;  %vm2500_vm8 = vsmask.f32 4368  ;;  %s214_s12 = scalar_lea.vmem %s5820_s4, %s5890_s16 }
  0x12   : > { %s4108_s14 = scalar_lea.vmem %s5816_s0, %s3905_s5  ;;  %v3928_v25 = vld [vmem:[%s5817_s1 + $0x30] sm:$0xff]   ;;  %v3930_v30 = vld [vmem:[%s5817_s1 + $0x38] sm:$0xff]   ;;  %v3936_v34 = vld [vmem:[%s5817_s1 + $0x140] sm:$0xff]   ;;  %s4844_s7 = scalar_lea.vmem %s5818_s2, %s3905_s5 }
  0x13   : > { %3372 = vmatpush3.bf16.msra.mxu0 %v3918_v3  ;;  %3898 = vmatpush3.bf16.msra.mxu1 %v3918_v3  ;;  %v4117_v12 = vld [vmem:[%s4108_s14] sm:$0xff]   ;;  %v4120_v13 = vld [vmem:[%s4108_s14 + $0x8] ss:$0 sps:$4 sm:$0x11]   ;;  %v3933_v17 = vld [vmem:[%s4108_s14 + $0x90] sm:$0xff]  }
  0x14   : > { %3373 = vmatprep.subr.bf16.mxu0 %v3919_v4  ;;  %3891 = vmatprep.subr.bf16.mxu1 %v3919_v4  ;;  %v416_v14 = vshrl.u32 %v4117_v12, 16  ;;  %v418_v15 = vshll.u32 %v4117_v12, 16  ;;  %v423_v16 = vshll.u32 %v4120_v13, 16  ;;  %v3934_v19 = vld [vmem:[%s4108_s14 + $0x98] ss:$0 sps:$4 sm:$0x11]   ;;  %vm4847_vm4 = vmand %vm2319_vm2, %vm2320_vm3 }
  0x15   : > { %v560_v22 = vshrl.u32 %v3933_v17, 16  ;;  %v562_v23 = vshll.u32 %v3933_v17, 16  ;;  %v567_v24 = vshll.u32 %v3934_v19, 16  ;;  %v4150_v36 = vld [vmem:[%s4108_s14 + $0xc] sm:$0xff]   ;;  %v4156_v38 = vld [vmem:[%s4108_s14 + $0x9c] sm:$0xff]   ;;  %vm4855_vm6 = vmand %vm2319_vm2, %vm2370_vm5 }
  0x16   : > { %v420_v20 = vrot.slane %v418_v15, 1  ;;  %v425_v21 = vrot.slane %v423_v16, 1  ;;  %v4153_v37 = vld [vmem:[%s4108_s14 + $0x14] ss:$0 sps:$4 sm:$0x11]   ;;  %v3937_v39 = vld [vmem:[%s5817_s1 + $0x80] sm:$0xff]   ;;  %vm5194_vm9 = vmand %vm2822_vm7, %vm2370_vm5 }
  0x17   : > { %3374 = vmatpush3.bf16.msra.mxu0 %v3920_v5  ;;  %3899 = vmatpush3.bf16.msra.mxu1 %v3920_v5  ;;  %v564_v27 = vrot.slane %v562_v23, 1  ;;  %v569_v29 = vrot.slane %v567_v24, 1  ;;  %v428_v40 = vshrl.u32 %v4150_v36, 16  ;;  %v430_v41 = vshll.u32 %v4150_v36, 16  ;;  %v3938_v46 = vld [vmem:[%s5817_s1 + $0x100] sm:$0xff]   ;;  %v3939_v48 = vld [vmem:[%s5817_s1 + $0xc8] sm:$0xff]   ;;  %vm5203_vm10 = vmor %vm2320_vm3, %vm2500_vm8 }
  0x18   : > { %3375 = vmatprep.subr.bf16.mxu0 %v3921_v6  ;;  %3892 = vmatprep.subr.bf16.mxu1 %v3921_v6  ;;  %v421_v26 = vor.u32 %v420_v20, %v416_v14  ;;  %v435_v42 = vshll.u32 %v4153_v37, 16  ;;  %v4166_v43 = vld [vmem:[%s4108_s14 + $0xa4] ss:$0 sps:$4 sm:$0x11]   ;;  %v572_v44 = vshrl.u32 %v4156_v38, 16  ;;  %v574_v45 = vshll.u32 %v4156_v38, 16 }
  0x19   : > { %v565_v32 = vor.u32 %v564_v27, %v560_v22  ;;  %v432_v47 = vrot.slane %v430_v41, 1  ;;  %v579_v51 = vshll.u32 %v4166_v43, 16  ;;  %v3940_v53 = vld [vmem:[%s5817_s1 + $0x88] sm:$0xff]   ;;  %v3945_v59 = vld [vmem:[%s5817_s1 + $0xd0] sm:$0xff]   ;;  %v3947_v62 = vld [vmem:[%s5817_s1 + $0xd8] sm:$0xff]  }
  0x1a   : > { %v426_v31 = vsel %vm414_vm0, %v421_v26, %v425_v21  ;;  %v437_v49 = vrot.slane %v435_v42, 1  ;;  %v576_v50 = vrot.slane %v574_v45, 1  ;;  %v3948_v57 = vld [vmem:[%s5817_s1 + $0x148] sm:$0xff]   ;;  %v3946_v60 = vld [vmem:[%s5817_s1 + $0x90] sm:$0xff]   ;;  %v4205_v63 = vld [vmem:[%s4108_s14 + $0x18] sm:$0xff]   ;;  %v625_v45 = vrot.slane %v4120_v13, 1 }
  0x1b   : > { %3376 = vmatpush3.bf16.msra.mxu0 %v3922_v7  ;;  %3900 = vmatpush3.bf16.msra.mxu1 %v3922_v7  ;;  %v4147_v35 = vsel %vm414_vm0, %v565_v32, %v569_v29  ;;  %v433_v52 = vor.u32 %v432_v47, %v428_v40  ;;  %v581_v55 = vrot.slane %v579_v51, 1  ;;  %v3950_v61 = vld [vmem:[%s5817_s1 + $0x108] sm:$0xff]   ;;  %v4208_v0 = vld [vmem:[%s4108_s14 + $0x20] ss:$0 sps:$4 sm:$0x11]   ;;  %v440_v1 = vshrl.u32 %v4205_v63, 16 }
  0x1c   : > { %3377 = vmatprep.subr.bf16.mxu0 %v3923_v8  ;;  %3893 = vmatprep.subr.bf16.mxu1 %v3923_v8  ;;  %v577_v54 = vor.u32 %v576_v50, %v572_v44  ;;  %v442_v2 = vshll.u32 %v4205_v63, 16  ;;  %v447_v3 = vshll.u32 %v4208_v0, 16  ;;  %v4214_v4 = vld [vmem:[%s4108_s14 + $0xa8] sm:$0xff]   ;;  %v4217_v5 = vld [vmem:[%s4108_s14 + $0xb0] ss:$0 sps:$4 sm:$0x11]  }
  0x1d   : > { %1348 = vmatprep.mubr.bf16.mxu0 %v426_v31  ;;  %1444 = vmatprep.mubr.bf16.mxu1 %v4147_v35  ;;  %v4182_v56 = vsel %vm414_vm0, %v433_v52, %v437_v49  ;;  %v584_v8 = vshrl.u32 %v4214_v4, 16  ;;  %v3955_v16 = vld [vmem:[%s5817_s1 + $0xe0] sm:$0xff]   ;;  %v3957_v21 = vld [vmem:[%s5817_s1 + $0xe8] sm:$0xff]   ;;  %v4247_v24 = vld [vmem:[%s4108_s14 + $0xb4] sm:$0xff]   ;;  %v624_v50 = vrot.slane %v4117_v12, 1  ;;  %v627_v52 = vrot.slane %v4150_v36, 1 }
  0x1e   : > { %v4189_v58 = vsel %vm414_vm0, %v577_v54, %v581_v55  ;;  %v444_v6 = vrot.slane %v442_v2, 1  ;;  %v449_v7 = vrot.slane %v447_v3, 1  ;;  %v4240_v22 = vld [vmem:[%s4108_s14 + $0x24] sm:$0xff]   ;;  %v4244_v23 = vld [vmem:[%s4108_s14 + $0x2c] ss:$0 sps:$4 sm:$0x11]  }
  0x1f   : > { %3378 = vmatpush3.bf16.msra.mxu0 %v3924_v9  ;;  %3901 = vmatpush3.bf16.msra.mxu1 %v3924_v9  ;;  %v586_v9 = vshll.u32 %v4214_v4, 16  ;;  %v452_v26 = vshrl.u32 %v4240_v22, 16  ;;  %v454_v27 = vshll.u32 %v4240_v22, 16  ;;  %v459_v29 = vshll.u32 %v4244_v23, 16  ;;  %v3964_v42 = vld [vmem:[%s5817_s1 + $0x150] sm:$0xff]   ;;  %v3972_v3 = vld [vmem:[%s5817_s1 + $0x180] sm:$0xff]  }
  0x20   : > { %3379 = vmatprep.subr.bf16.mxu0 %v3925_v10  ;;  %3894 = vmatprep.subr.bf16.mxu1 %v3925_v10  ;;  %v3949_v10 = vld [vmem:[%s5817_s1 + $0x98] sm:$0xff]   ;;  %v445_v14 = vor.u32 %v444_v6, %v440_v1  ;;  %v596_v31 = vshrl.u32 %v4247_v24, 16  ;;  %v598_v32 = vshll.u32 %v4247_v24, 16  ;;  %v3966_v49 = vld [vmem:[%s5817_s1 + $0x110] sm:$0xff]  }
  0x21   : > { %v588_v15 = vrot.slane %v586_v9, 1  ;;  %v3965_v13 = vld [vmem:[%s5817_s1 + $0xb0] sm:$0xff]   ;;  %v4298_v55 = vld [vmem:[%s4108_s14 + $0x38] ss:$0 sps:$4 sm:$0x11]   ;;  %v4324_v9 = vld [vmem:[%s4108_s14 + $0x3c] sm:$0xff]  }
  0x22   : > { %v4234_v19 = vsel %vm414_vm0, %v445_v14, %v449_v7  ;;  %v600_v40 = vrot.slane %v598_v32, 1  ;;  %v4295_v54 = vld [vmem:[%s4108_s14 + $0x30] sm:$0xff]   ;;  %v3973_v6 = vld [vmem:[%s5817_s1 + $0x158] sm:$0xff]   ;;  %v476_v14 = vshrl.u32 %v4324_v9, 16 }
  0x23   : > { %3380 = vmatpush3.bf16.msra.mxu0 %v3926_v11  ;;  %3902 = vmatpush3.bf16.msra.mxu1 %v3926_v11  ;;  %v591_v11 = vshll.u32 %v4217_v5, 16  ;;  %v589_v20 = vor.u32 %v588_v15, %v584_v8  ;;  %v626_v8 = vsel %vm623_vm1, %v624_v50, %v625_v45  ;;  %v478_v15 = vshll.u32 %v4324_v9, 16 }
  0x24   : > { %3381 = vmatprep.subr.bf16.mxu0 %v3927_v18  ;;  %3895 = vmatprep.subr.bf16.mxu1 %v3927_v18  ;;  %v3956_v18 = vld [vmem:[%s5817_s1 + $0xa0] sm:$0xff]   ;;  %v631_v45 = vrot.slane %v4208_v0, 1 }
  0x27   : > { %3382 = vmatpush3.bf16.msra.mxu0 %v3928_v25  ;;  %3903 = vmatpush3.bf16.msra.mxu1 %v3928_v25 }
  0x28   : > { %3383 = vmatprep.subr.bf16.mxu0 %v3929_v28  ;;  %3896 = vmatprep.subr.bf16.mxu1 %v3929_v28  ;;  %v3958_v28 = vld [vmem:[%s5817_s1 + $0xa8] sm:$0xff]  }
  0x2b   : > { %3384 = vmatpush3.bf16.msra.mxu0 %v3930_v30  ;;  %3904 = vmatpush3.bf16.msra.mxu1 %v3930_v30  ;;  %v4260_v30 = vld [vmem:[%s4108_s14 + $0xbc] ss:$0 sps:$4 sm:$0x11]  }
  0x2c   : > { %3481 = vmatprep.subr.bf16.mxu1 %v3935_v33  ;;  %3593 = vmatprep.subr.bf16.mxu0 %v3936_v34  ;;  %v456_v33 = vrot.slane %v454_v27, 1  ;;  %v3963_v34 = vld [vmem:[%s5817_s1 + $0xf0] sm:$0xff]   ;;  %v603_v41 = vshll.u32 %v4260_v30, 16 }
  0x2e   : > { %1349 = vmatmul.mubr.bf16.vlgmr.msra.gmra.mrb[0].mxu0 %v4117_v12  ;;  %1445 = vmatmul.mubr.bf16.vlgmr.msra.gmra.mrb[0].mxu1 %v3933_v17  ;;  %v593_v17 = vrot.slane %v591_v11, 1  ;;  %v457_v44 = vor.u32 %v456_v33, %v452_v26  ;;  %v605_v47 = vrot.slane %v603_v41, 1  ;;  %v628_v12 = vrot.slane %v4153_v37, 1 }
  0x2f   : > { %3482 = vmatpush3.bf16.msra.mxu1 %v3937_v39  ;;  %3594 = vmatpush3.bf16.msra.mxu0 %v3938_v46  ;;  %v461_v39 = vrot.slane %v459_v29, 1  ;;  %v601_v46 = vor.u32 %v600_v40, %v596_v31  ;;  %v466_v37 = vshll.u32 %v4295_v54, 16  ;;  %v3980_v31 = vld [vmem:[%s5817_s1 + $0x1c8] sm:$0xff]  }
  0x30   : > { %3483 = vmatprep.subr.bf16.mxu1 %v3939_v48  ;;  %1356 = vmatprep.mubr.bf16.mxu0 %v4182_v56  ;;  %v4250_v25 = vsel %vm414_vm0, %v589_v20, %v593_v17  ;;  %v4336_v17 = vld [vmem:[%s4108_s14 + $0x48] sm:$0xff]   ;;  %v3979_v20 = vld [vmem:[%s5817_s1 + $0x160] sm:$0xff]  }
  0x31   : > { %1452 = vmatprep.mubr.bf16.mxu1 %v4189_v58  ;;  %3595 = vmatprep.subr.bf16.mxu0 %v3948_v57  ;;  %v4275_v48 = vsel %vm414_vm0, %v457_v44, %v461_v39  ;;  %v4283_v51 = vsel %vm414_vm0, %v601_v46, %v605_v47  ;;  %v3968_v57 = vld [vmem:[%s5817_s1 + $0xb8] sm:$0xff]   ;;  %v468_v1 = vrot.slane %v466_v37, 1  ;;  %v488_v27 = vshrl.u32 %v4336_v17, 16  ;;  %v3982_v40 = vld [vmem:[%s5817_s1 + $0x188] sm:$0xff]   ;;  %v3989_v37 = vld [vmem:[%s5817_s1 + $0x1d0] sm:$0xff]  }
  0x32   : > { %v4367_v46 = vld [vmem:[%s4108_s14 + $0x54] sm:$0xff]   ;;  %v4371_v47 = vld [vmem:[%s4108_s14 + $0x5c] ss:$0 sps:$4 sm:$0x11]  }
  0x33   : > { %3484 = vmatpush3.bf16.msra.mxu1 %v3940_v53  ;;  %3596 = vmatpush3.bf16.msra.mxu0 %v3950_v61  ;;  %v3967_v53 = vld [vmem:[%s5817_s1 + $0xf8] sm:$0xff]   ;;  %v471_v61 = vshll.u32 %v4298_v55, 16  ;;  %v502_v0 = vshll.u32 %v4367_v46, 16 }
  0x34   : > { %3485 = vmatprep.subr.bf16.mxu1 %v3945_v59  ;;  %3597 = vmatprep.subr.bf16.mxu0 %v3964_v42  ;;  %v630_v59 = vrot.slane %v4205_v63, 1  ;;  %v4363_v42 = vsel %vm623_vm1, %v627_v52, %v628_v12  ;;  %v507_v52 = vshll.u32 %v4371_v47, 16 }
  0x35   : > { %v473_v2 = vrot.slane %v471_v61, 1  ;;  %v504_v12 = vrot.slane %v502_v0, 1  ;;  %v4460_v0 = vld [vmem:[%s4108_s14 + $0x80] ss:$0 sps:$4 sm:$0x11]  }
  0x36   : > { %1357 = vmatmul.mubr.bf16.gmra.mrb[4].mxu0 %v4150_v36  ;;  %1453 = vmatmul.mubr.bf16.gmra.mrb[4].mxu1 %v4156_v38 }
  0x37   : > { %3486 = vmatpush3.bf16.msra.mxu1 %v3946_v60  ;;  %1364 = vmatprep.mubr.bf16.mxu0 %v4234_v19  ;;  %v464_v60 = vshrl.u32 %v4295_v54, 16 }
  0x38   : > { %3487 = vmatprep.subr.bf16.mxu1 %v3947_v62  ;;  %1460 = vmatprep.mubr.bf16.mxu1 %v4250_v25  ;;  %v3971_v62 = vld [vmem:[%s5817_s1 + $0x1c0] sm:$0xff]  }
  0x39   : > { %3598 = vmatpush3.bf16.msra.mxu0 %v3966_v49  ;;  %v469_v7 = vor.u32 %v468_v1, %v464_v60  ;;  %v3985_v49 = vld [vmem:[%s5817_s1 + $0x168] sm:$0xff]  }
  0x3a   : > { %3599 = vmatprep.subr.bf16.mxu0 %v3973_v6  ;;  %v4393_v60 = vld [vmem:[%s4108_s14 + $0x68] ss:$0 sps:$4 sm:$0x11]  }
  0x3b   : > { %3488 = vmatpush3.bf16.msra.mxu1 %v3949_v10  ;;  %v4327_v10 = vld [vmem:[%s4108_s14 + $0x44] ss:$0 sps:$4 sm:$0x11]   ;;  %v4330_v11 = vsel %vm414_vm0, %v469_v7, %v473_v2  ;;  %v3990_v2 = vld [vmem:[%s5817_s1 + $0x190] sm:$0xff]  }
  0x3c   : > { %3489 = vmatprep.subr.bf16.mxu1 %v3955_v16  ;;  %v483_v16 = vshll.u32 %v4327_v10, 16 }
  0x3e   : > { %1365 = vmatmul.mubr.bf16.gmra.mrb[8].mxu0 %v4205_v63  ;;  %1461 = vmatmul.mubr.bf16.gmra.mrb[8].mxu1 %v4214_v4  ;;  %v485_v26 = vrot.slane %v483_v16, 1  ;;  %v4421_v16 = vld [vmem:[%s4108_s14 + $0x74] ss:$0 sps:$4 sm:$0x11]  }
  0x3f   : > { %3490 = vmatpush3.bf16.msra.mxu1 %v3956_v18  ;;  %1372 = vmatprep.mubr.bf16.mxu0 %v4275_v48  ;;  %v4340_v18 = vld [vmem:[%s4108_s14 + $0x50] ss:$0 sps:$4 sm:$0x11]  }
  0x40   : > { %3491 = vmatprep.subr.bf16.mxu1 %v3957_v21  ;;  %1468 = vmatprep.mubr.bf16.mxu1 %v4283_v51  ;;  %v480_v21 = vrot.slane %v478_v15, 1  ;;  %v495_v29 = vshll.u32 %v4340_v18, 16  ;;  %v3993_v15 = vld [vmem:[%s5817_s1 + $0x170] sm:$0xff]  }
  0x42   : > { %v481_v32 = vor.u32 %v480_v21, %v476_v14  ;;  %v497_v39 = vrot.slane %v495_v29, 1  ;;  %v4413_v14 = vld [vmem:[%s4108_s14 + $0x6c] sm:$0xff]   ;;  %v3997_v29 = vld [vmem:[%s5817_s1 + $0x1d8] sm:$0xff]  }
  0x43   : > { %3492 = vmatpush3.bf16.msra.mxu1 %v3958_v28  ;;  %v490_v28 = vshll.u32 %v4336_v17, 16  ;;  %v3994_v21 = vld [vmem:[%s5817_s1 + $0x130] sm:$0xff]  }
  0x44   : > { %3493 = vmatprep.subr.bf16.mxu1 %v3963_v34  ;;  %v3981_v34 = vld [vmem:[%s5817_s1 + $0x120] sm:$0xff]   ;;  %v4360_v41 = vsel %vm414_vm0, %v481_v32, %v485_v26  ;;  %v4439_v32 = vld [vmem:[%s4108_s14 + $0x78] sm:$0xff]  }
  0x45   : > { %v492_v33 = vrot.slane %v490_v28, 1  ;;  %v526_v28 = vshll.u32 %v4413_v14, 16 }
  0x46   : > { %1373 = vmatmul.mubr.bf16.gmra.mrb[12].mxu0 %v4240_v22  ;;  %1469 = vmatmul.mubr.bf16.gmra.mrb[12].mxu1 %v4247_v24 }
  0x47   : > { %3494 = vmatpush3.bf16.msra.mxu1 %v3965_v13  ;;  %1509 = vmatprep.mubr.bf16.mxu1 %v4150_v36  ;;  %v3974_v36 = vld [vmem:[%s5817_s1 + $0x118] sm:$0xff]   ;;  %v493_v44 = vor.u32 %v492_v33, %v488_v27  ;;  %v500_v13 = vshrl.u32 %v4367_v46, 16 }
  0x48   : > { %3495 = vmatprep.subr.bf16.mxu1 %v3967_v53  ;;  %3600 = vmatpush3.bf16.msra.mxu0 %v3974_v36  ;;  %v3986_v53 = vld [vmem:[%s5817_s1 + $0x128] sm:$0xff]   ;;  %v3998_v33 = vld [vmem:[%s5817_s1 + $0x198] sm:$0xff]  }
  0x49   : > { %1380 = vmatprep.mubr.bf16.mxu0 %v4330_v11  ;;  %3601 = vmatprep.subr.bf16.mxu0 %v3979_v20  ;;  %v4377_v50 = vsel %vm414_vm0, %v493_v44, %v497_v39  ;;  %v505_v61 = vor.u32 %v504_v12, %v500_v13  ;;  %v634_v20 = vrot.slane %v4244_v23, 1  ;;  %v524_v23 = vshrl.u32 %v4413_v14, 16  ;;  %v3999_v39 = vld [vmem:[%s5817_s1 + $0x178] sm:$0xff]  }
  0x4a   : > { %v528_v44 = vrot.slane %v526_v28, 1  ;;  %v637_v13 = vrot.slane %v4298_v55, 1  ;;  %v538_v12 = vshll.u32 %v4439_v32, 16 }
  0x4b   : > { %3496 = vmatpush3.bf16.msra.mxu1 %v3968_v57  ;;  %v4389_v57 = vld [vmem:[%s4108_s14 + $0x60] sm:$0xff]  }
  0x4c   : > { %3705 = vmatprep.subr.bf16.mxu1 %v3971_v62  ;;  %3602 = vmatpush3.bf16.msra.mxu0 %v3981_v34  ;;  %v509_v62 = vrot.slane %v507_v52, 1  ;;  %v514_v1 = vshll.u32 %v4389_v57, 16  ;;  %v512_v6 = vshrl.u32 %v4389_v57, 16  ;;  %v531_v34 = vshll.u32 %v4421_v16, 16 }
  0x4d   : > { %3603 = vmatprep.subr.bf16.mxu0 %v3985_v49  ;;  %v636_v49 = vrot.slane %v4295_v54, 1  ;;  %v529_v52 = vor.u32 %v528_v44, %v524_v23 }
  0x4e   : > { %1510 = vmatmul.mubr.bf16.vlgmr.msra.gmra.mrb[16].mxu1 %v626_v8  ;;  %1381 = vmatmul.mubr.bf16.gmra.mrb[16].mxu0 %v4295_v54  ;;  %v4409_v36 = vsel %vm414_vm0, %v505_v61, %v509_v62  ;;  %v516_v7 = vrot.slane %v514_v1, 1  ;;  %v519_v8 = vshll.u32 %v4393_v60, 16  ;;  %v4470_v61 = vld [vmem:[%s5817_s1 + $0x200] sm:$0xff]   ;;  %v536_v62 = vshrl.u32 %v4439_v32, 16 }
  0x4f   : > { %3706 = vmatpush3.bf16.msra.mxu1 %v3972_v3  ;;  %1517 = vmatprep.mubr.bf16.mxu1 %v4205_v63  ;;  %v4405_v3 = vsel %vm623_vm1, %v630_v59, %v631_v45  ;;  %v633_v59 = vrot.slane %v4240_v22, 1  ;;  %v4000_v45 = vld [vmem:[%s5817_s1 + $0x138] sm:$0xff]   ;;  %v4473_v55 = vsel %vm623_vm1, %v636_v49, %v637_v13  ;;  %v4005_v1 = vld [vmem:[%s5817_s1 + $0x1a0] sm:$0xff]  }
  0x50   : > { %3707 = vmatprep.subr.bf16.mxu1 %v3980_v31  ;;  %1388 = vmatprep.mubr.bf16.mxu0 %v4360_v41  ;;  %v517_v26 = vor.u32 %v516_v7, %v512_v6  ;;  %v521_v27 = vrot.slane %v519_v8, 1  ;;  %v4481_v6 = vld [vmem:[%s4108_s14 + $0x84] sm:$0xff]   ;;  %v540_v8 = vrot.slane %v538_v12, 1  ;;  %v4014_v13 = vld [vmem:[%s5817_s1 + $0x1b8] sm:$0xff]  }
  0x51   : > { %3604 = vmatpush3.bf16.msra.mxu0 %v3986_v53  ;;  %v4435_v31 = vsel %vm623_vm1, %v633_v59, %v634_v20  ;;  %v533_v53 = vrot.slane %v531_v34, 1  ;;  %v639_v59 = vrot.slane %v4324_v9, 1  ;;  %v4493_v20 = vld [vmem:[%s4108_s14 + $0x8c] ss:$0 sps:$4 sm:$0x11]   ;;  %v550_v23 = vshll.u32 %v4481_v6, 16 }
  0x52   : > { %3605 = vmatprep.subr.bf16.mxu0 %v3993_v15  ;;  %v4006_v15 = vld [vmem:[%s5817_s1 + $0x1e8] sm:$0xff]   ;;  %v541_v28 = vor.u32 %v540_v8, %v536_v62  ;;  %v4012_v34 = vld [vmem:[%s5817_s1 + $0x1f8] sm:$0xff]   ;;  %v555_v44 = vshll.u32 %v4493_v20, 16 }
  0x53   : > { %3708 = vmatpush3.bf16.msra.mxu1 %v3982_v40  ;;  %v4449_v40 = vsel %vm414_vm0, %v517_v26, %v521_v27  ;;  %v4485_v7 = vsel %vm414_vm0, %v529_v52, %v533_v53  ;;  %v4008_v26 = vld [vmem:[%s5817_s1 + $0x1a8] sm:$0xff]   ;;  %v4009_v27 = vld [vmem:[%s5817_s1 + $0x1f0] sm:$0xff]   ;;  %v552_v49 = vrot.slane %v550_v23, 1  ;;  %v642_v52 = vrot.slane %v4336_v17, 1 }
  0x54   : > { %3709 = vmatprep.subr.bf16.mxu1 %v3989_v37  ;;  %v4003_v37 = vld [vmem:[%s5817_s1 + $0x1e0] sm:$0xff]   ;;  %v643_v53 = vrot.slane %v4340_v18, 1  ;;  %v646_v18 = vrot.slane %v4371_v47, 1  ;;  %v4007_v47 = vld [vmem:[%s5817_s1 + $0x208] sm:$0xff]  }
  0x55   : > { %3606 = vmatpush3.bf16.msra.mxu0 %v3994_v21  ;;  %v640_v21 = vrot.slane %v4327_v10, 1  ;;  %v4011_v10 = vld [vmem:[%s5817_s1 + $0x1b0] sm:$0xff]   ;;  %v4017_v23 = vld [vmem:[%s5817_s1 + $0x228] sm:$0xff]  }
  0x56   : > { %1518 = vmatmul.mubr.bf16.gmra.mrb[20].mxu1 %v4363_v42  ;;  %1389 = vmatmul.mubr.bf16.gmra.mrb[20].mxu0 %v4324_v9  ;;  %v4530_v62 = vsel %vm623_vm1, %v642_v52, %v643_v53 }
  0x57   : > { %1525 = vmatprep.mubr.bf16.mxu1 %v4240_v22  ;;  %1396 = vmatprep.mubr.bf16.mxu0 %v4377_v50 }
  0x58   : > { %3710 = vmatpush3.bf16.msra.mxu1 %v3990_v2  ;;  %3607 = vmatprep.subr.bf16.mxu0 %v3999_v39  ;;  %v543_v2 = vshll.u32 %v4460_v0, 16  ;;  %v548_v39 = vshrl.u32 %v4481_v6, 16 }
  0x59   : > { %3711 = vmatprep.subr.bf16.mxu1 %v3997_v29  ;;  %3608 = vmatpush3.bf16.msra.mxu0 %v4000_v45 }
  0x5a   : > { %3841 = vmatprep.subr.bf16.mxu0 %v4470_v61  ;;  %v545_v29 = vrot.slane %v543_v2, 1  ;;  %v553_v12 = vor.u32 %v552_v49, %v548_v39  ;;  %v645_v2 = vrot.slane %v4367_v46, 1  ;;  %v4018_v39 = vld [vmem:[%s5817_s1 + $0x230] sm:$0xff]   ;;  %v4019_v49 = vld [vmem:[%s5817_s1 + $0x238] sm:$0xff]  }
  0x5c   : > { %3712 = vmatpush3.bf16.msra.mxu1 %v3998_v33  ;;  %v4510_v33 = vsel %vm623_vm1, %v639_v59, %v640_v21  ;;  %v4518_v45 = vsel %vm414_vm0, %v541_v28, %v545_v29  ;;  %v4542_v8 = vsel %vm623_vm1, %v645_v2, %v646_v18  ;;  %v649_v59 = vrot.slane %v4393_v60, 1  ;;  %v4016_v28 = vld [vmem:[%s5817_s1 + $0x220] sm:$0xff]  }
  0x5d   : > { %3713 = vmatprep.subr.bf16.mxu1 %v4003_v37  ;;  %v557_v37 = vrot.slane %v555_v44, 1  ;;  %v666_v18 = vrot.slane %v4214_v4, 1 }
  0x5e   : > { %1526 = vmatmul.mubr.bf16.gmra.mrb[24].mxu1 %v4405_v3  ;;  %1397 = vmatmul.mubr.bf16.gmra.mrb[24].mxu0 %v4336_v17 }
  0x5f   : > { %1533 = vmatprep.mubr.bf16.mxu1 %v4295_v54  ;;  %1404 = vmatprep.mubr.bf16.mxu0 %v4409_v36 }
  0x60   : > { %3714 = vmatpush3.bf16.msra.mxu1 %v4005_v1  ;;  %v4533_v1 = vsel %vm414_vm0, %v553_v12, %v557_v37  ;;  %v663_v12 = vrot.slane %v4156_v38, 1  ;;  %v664_v37 = vrot.slane %v4166_v43, 1  ;;  %v4633_v43 = vld [vmem:[%s4108_s14 + $0xc0] sm:$0xff]  }
  0x61   : > { %3715 = vmatprep.subr.bf16.mxu1 %v4006_v15  ;;  %v648_v15 = vrot.slane %v4389_v57, 1 }
  0x62   : > { %v4621_v2 = vsel %vm623_vm1, %v663_v12, %v664_v37 }
  0x63   : > { %v4551_v21 = vsel %vm623_vm1, %v648_v15, %v649_v59  ;;  %v667_v15 = vrot.slane %v4217_v5, 1  ;;  %v669_v59 = vrot.slane %v4247_v24, 1  ;;  %v700_v5 = vshll.u32 %v4633_v43, 16 }
  0x64   : > { %3716 = vmatpush3.bf16.msra.mxu1 %v4008_v26  ;;  %v651_v26 = vrot.slane %v4413_v14, 1 }
  0x65   : > { %3717 = vmatprep.subr.bf16.mxu1 %v4009_v27  ;;  %v652_v27 = vrot.slane %v4421_v16, 1  ;;  %v654_v16 = vrot.slane %v4439_v32, 1 }
  0x66   : > { %1534 = vmatmul.mubr.bf16.gmra.mrb[28].mxu1 %v4435_v31  ;;  %1405 = vmatmul.mubr.bf16.gmra.mrb[28].mxu0 %v4367_v46 }
  0x67   : > { %1541 = vmatprep.mubr.bf16.mxu1 %v4324_v9  ;;  %1412 = vmatprep.mubr.bf16.mxu0 %v4449_v40  ;;  %v4567_v60 = vsel %vm623_vm1, %v651_v26, %v652_v27 }
  0x68   : > { %3718 = vmatpush3.bf16.msra.mxu1 %v4011_v10  ;;  %v657_v10 = vrot.slane %v4481_v6, 1 }
  0x69   : > { %3719 = vmatprep.subr.bf16.mxu1 %v4012_v34  ;;  %v658_v34 = vrot.slane %v4493_v20, 1 }
  0x6b   : > { %v4600_v44 = vsel %vm623_vm1, %v657_v10, %v658_v34 }
  0x6c   : > { %3720 = vmatpush3.bf16.msra.mxu1 %v4014_v13  ;;  %v4024_v13 = vld [vmem:[%s4108_s14 + $0x98] ss:$0 sps:$4 sm:$0x11]  }
  0x6d   : > { %v661_v52 = vrot.slane %v4024_v13, 1 }
  0x6e   : > { %1542 = vmatmul.mubr.bf16.gmra.mrb[32].mxu1 %v4473_v55  ;;  %1413 = vmatmul.mubr.bf16.gmra.mrb[32].mxu0 %v4389_v57 }
  0x6f   : > { %1549 = vmatprep.mubr.bf16.mxu1 %v4336_v17  ;;  %1420 = vmatprep.mubr.bf16.mxu0 %v4485_v7 }
  0x76   : > { %1550 = vmatmul.mubr.bf16.gmra.mrb[36].mxu1 %v4510_v33  ;;  %1421 = vmatmul.mubr.bf16.gmra.mrb[36].mxu0 %v4413_v14 }
  0x77   : > { %1557 = vmatprep.mubr.bf16.mxu1 %v4367_v46  ;;  %1428 = vmatprep.mubr.bf16.mxu0 %v4518_v45 }
  0x7e   : > { %1558 = vmatmul.mubr.bf16.gmra.mrb[40].mxu1 %v4530_v62  ;;  %1429 = vmatmul.mubr.bf16.gmra.mrb[40].mxu0 %v4439_v32 }
  0x7f   : > { %1565 = vmatprep.mubr.bf16.mxu1 %v4389_v57  ;;  %1436 = vmatprep.mubr.bf16.mxu0 %v4533_v1 }
  0x86   : > { %1566 = vmatmul.mubr.bf16.gmra.mrb[44].mxu1 %v4542_v8  ;;  %1437 = vmatmul.mubr.bf16.gmra.mrb[44].mxu0 %v4481_v6 }
  0x87   : > { %1573 = vmatprep.mubr.bf16.mxu1 %v4413_v14  ;;  %1670 = vmatprep.mubr.bf16.mxu0 %v4363_v42  ;;  %v4010_v42 = vld [vmem:[%s5817_s1 + $0x210] sm:$0xff]  }
  0x8e   : > { %1574 = vmatmul.mubr.bf16.gmra.mrb[48].mxu1 %v4551_v21  ;;  %1671 = vmatmul.mubr.bf16.vlgmr.msra.gmra.mrb[48].mxu0 %v4182_v56  ;;  %v4013_v56 = vld [vmem:[%s5817_s1 + $0x218] sm:$0xff]  }
  0x8f   : > { %1581 = vmatprep.mubr.bf16.mxu1 %v4439_v32  ;;  %3842 = vmatpush3.bf16.msra.mxu0 %v4470_v61  ;;  %v655_v61 = vrot.slane %v4460_v0, 1  ;;  %v4590_v0 = vld [vmem:[%s4108_s14 + $0x90] sm:$0xff]  }
  0x90   : > { %1678 = vmatprep.mubr.bf16.mxu0 %v4405_v3  ;;  %3843 = vmatprep.subr.bf16.mxu0 %v4007_v47  ;;  %v660_v20 = vrot.slane %v4590_v0, 1 }
  0x91   : > { %v4582_v29 = vsel %vm623_vm1, %v654_v16, %v655_v61 }
  0x92   : > { %v4612_v53 = vsel %vm623_vm1, %v660_v20, %v661_v52 }
  0x93   : > { %3844 = vmatpush3.bf16.msra.mxu0 %v4007_v47  ;;  %v670_v47 = vrot.slane %v4260_v30, 1  ;;  %v702_v30 = vrot.slane %v700_v5, 1 }
  0x94   : > { %3845 = vmatprep.subr.bf16.mxu0 %v4010_v42 }
  0x96   : > { %1582 = vmatmul.mubr.bf16.gmra.mrb[52].mxu1 %v4567_v60  ;;  %1679 = vmatmul.mubr.bf16.gmra.mrb[52].mxu0 %v4234_v19 }
  0x97   : > { %1589 = vmatprep.mubr.bf16.mxu1 %v4481_v6  ;;  %1686 = vmatprep.mubr.bf16.mxu0 %v4435_v31 }
  0x98   : > { %3846 = vmatpush3.bf16.msra.mxu0 %v4010_v42 }
  0x99   : > { %3847 = vmatprep.subr.bf16.mxu0 %v4013_v56 }
  0x9c   : > { %3848 = vmatpush3.bf16.msra.mxu0 %v4013_v56 }
  0x9d   : > { %3849 = vmatprep.subr.bf16.mxu0 %v4016_v28 }
  0x9e   : > { %1590 = vmatmul.mubr.bf16.gmra.mrb[56].mxu1 %v4582_v29  ;;  %1687 = vmatmul.mubr.bf16.gmra.mrb[56].mxu0 %v4275_v48 }
  0x9f   : > { %1597 = vmatprep.mubr.bf16.mxu1 %v4590_v0  ;;  %1694 = vmatprep.mubr.bf16.mxu0 %v4473_v55 }
  0xa0   : > { %3850 = vmatpush3.bf16.msra.mxu0 %v4016_v28 }
  0xa1   : > { %3851 = vmatprep.subr.bf16.mxu0 %v4017_v23 }
  0xa4   : > { %3852 = vmatpush3.bf16.msra.mxu0 %v4017_v23 }
  0xa5   : > { %3853 = vmatprep.subr.bf16.mxu0 %v4018_v39 }
  0xa6   : > { %1598 = vmatmul.mubr.bf16.gmra.mrb[60].mxu1 %v4600_v44  ;;  %1695 = vmatmul.mubr.bf16.gmra.mrb[60].mxu0 %v4330_v11 }
  0xa7   : > { %1605 = vmatprep.mubr.bf16.mxu1 %v4156_v38  ;;  %1702 = vmatprep.mubr.bf16.mxu0 %v4510_v33  ;;  %v4630_v38 = vsel %vm623_vm1, %v666_v18, %v667_v15 }
  0xa8   : > { %3854 = vmatpush3.bf16.msra.mxu0 %v4018_v39 }
  0xa9   : > { %3855 = vmatprep.subr.bf16.mxu0 %v4019_v49 }
  0xac   : > { %3856 = vmatpush3.bf16.msra.mxu0 %v4019_v49 }
  0xae   : > { %1606 = vmatmul.mubr.bf16.gmra.mrb[64].mxu1 %v4612_v53  ;;  %1703 = vmatmul.mubr.bf16.gmra.mrb[64].mxu0 %v4360_v41 }
  0xaf   : > { %1613 = vmatprep.mubr.bf16.mxu1 %v4214_v4  ;;  %1710 = vmatprep.mubr.bf16.mxu0 %v4530_v62  ;;  %v4642_v4 = vsel %vm623_vm1, %v669_v59, %v670_v47 }
  0xb6   : > { %1614 = vmatmul.mubr.bf16.gmra.mrb[68].mxu1 %v4621_v2  ;;  %1711 = vmatmul.mubr.bf16.gmra.mrb[68].mxu0 %v4377_v50 }
  0xb7   : > { %1621 = vmatprep.mubr.bf16.mxu1 %v4247_v24  ;;  %1718 = vmatprep.mubr.bf16.mxu0 %v4542_v8  ;;  %v698_v24 = vshrl.u32 %v4633_v43, 16 }
  0xbe   : > { %1622 = vmatmul.mubr.bf16.gmra.mrb[72].mxu1 %v4630_v38  ;;  %1719 = vmatmul.mubr.bf16.gmra.mrb[72].mxu0 %v4409_v36 }
  0xbf   : > { %1629 = vmatprep.mubr.bf16.mxu1 %v4633_v43  ;;  %1726 = vmatprep.mubr.bf16.mxu0 %v4551_v21 }
  0xc6   : > { %1630 = vmatmul.mubr.bf16.gmra.mrb[76].mxu1 %v4642_v4  ;;  %1727 = vmatmul.mubr.bf16.gmra.mrb[76].mxu0 %v4449_v40 }
  0xc7   : > { %1831 = vmatprep.mubr.bf16.mxu1 %v4234_v19  ;;  %1734 = vmatprep.mubr.bf16.mxu0 %v4567_v60  ;;  %v710_v19 = vrot.slane %v4633_v43, 1 }
  0xce   : > { %1832 = vmatmul.mubr.bf16.vlgmr.msra.gmra.mrb[80].mxu1 %v4205_v63  ;;  %1735 = vmatmul.mubr.bf16.gmra.mrb[80].mxu0 %v4485_v7  ;;  %v4020_v63 = vld [vmem:[%s4108_s14 + $0xc8] ss:$0 sps:$4 sm:$0x11]  }
  0xcf   : > { %1839 = vmatprep.mubr.bf16.mxu1 %v4275_v48  ;;  %1742 = vmatprep.mubr.bf16.mxu0 %v4582_v29  ;;  %v705_v48 = vshll.u32 %v4020_v63, 16 }
  0xd6   : > { %1840 = vmatmul.mubr.bf16.gmra.mrb[84].mxu1 %v4240_v22  ;;  %1743 = vmatmul.mubr.bf16.gmra.mrb[84].mxu0 %v4518_v45  ;;  %v711_v22 = vrot.slane %v4020_v63, 1 }
  0xd7   : > { %1847 = vmatprep.mubr.bf16.mxu1 %v4330_v11  ;;  %1750 = vmatprep.mubr.bf16.mxu0 %v4600_v44  ;;  %v707_v11 = vrot.slane %v705_v48, 1 }
  0xde   : > { %1848 = vmatmul.mubr.bf16.gmra.mrb[88].mxu1 %v4295_v54  ;;  %1751 = vmatmul.mubr.bf16.gmra.mrb[88].mxu0 %v4533_v1  ;;  %v4677_v54 = vsel %vm623_vm1, %v710_v19, %v711_v22 }
  0xdf   : > { %1855 = vmatprep.mubr.bf16.mxu1 %v4360_v41  ;;  %1758 = vmatprep.mubr.bf16.mxu0 %v4612_v53 }
  0xe6   : > { %1856 = vmatmul.mubr.bf16.gmra.mrb[92].mxu1 %v4324_v9  ;;  %1759 = vmatmul.mubr.bf16.gmra.mrb[92].mxu0 %v4147_v35  ;;  %v703_v9 = vor.u32 %v702_v30, %v698_v24 }
  0xe7   : > { %1863 = vmatprep.mubr.bf16.mxu1 %v4377_v50  ;;  %1766 = vmatprep.mubr.bf16.mxu0 %v4621_v2 }
  0xe8   : > { %v4688_v56 = vsel %vm414_vm0, %v703_v9, %v707_v11 }
  0xee   : > { %1864 = vmatmul.mubr.bf16.gmra.mrb[96].mxu1 %v4336_v17  ;;  %1767 = vmatmul.mubr.bf16.gmra.mrb[96].mxu0 %v4189_v58 }
  0xef   : > { %1871 = vmatprep.mubr.bf16.mxu1 %v4409_v36  ;;  %1774 = vmatprep.mubr.bf16.mxu0 %v4630_v38 }
  0xf6   : > { %1872 = vmatmul.mubr.bf16.gmra.mrb[100].mxu1 %v4367_v46  ;;  %1775 = vmatmul.mubr.bf16.gmra.mrb[100].mxu0 %v4250_v25 }
  0xf7   : > { %1879 = vmatprep.mubr.bf16.mxu1 %v4449_v40  ;;  %1782 = vmatprep.mubr.bf16.mxu0 %v4642_v4 }
  0xfe   : > { %1880 = vmatmul.mubr.bf16.gmra.mrb[104].mxu1 %v4389_v57  ;;  %1783 = vmatmul.mubr.bf16.gmra.mrb[104].mxu0 %v4283_v51 }
  0xff   : > { %1887 = vmatprep.mubr.bf16.mxu1 %v4485_v7  ;;  %1790 = vmatprep.mubr.bf16.mxu0 %v4677_v54 }
 0x101   : > { %v3385_v17 = vpop.f32.mrb[0].mxu0  ;;  %v3457_v41 = vpop.f32.mrb[0].mxu1 }
 0x102   : > { %v3386_v46 = vpop.f32.mrb[1].mxu0  ;;  %v3458_v50 = vpop.f32.mrb[1].mxu1 }
 0x103   : > { %v4683_v36 = vadd.f32 %v3386_v46, %v3385_v17  ;;  %v4685_v40 = vadd.f32 %v3458_v50, %v3457_v41  ;;  %v3388_v26 = vpop.f32.mrb[2].mxu0  ;;  %v3460_v27 = vpop.f32.mrb[2].mxu1 }
 0x104   : > { %v3389_v42 = vpop.f32.mrb[3].mxu0  ;;  %v3461_v57 = vpop.f32.mrb[3].mxu1 }
 0x105   : > { %v4690_v7 = vadd.f32 %v3389_v42, %v3388_v26  ;;  %v4692_v16 = vadd.f32 %v3461_v57, %v3460_v27 }
 0x106   : > { %1888 = vmatmul.mubr.bf16.gmra.mrb[108].mxu1 %v4413_v14  ;;  %1791 = vmatmul.mubr.bf16.gmra.mrb[108].mxu0 %v4688_v56 }
 0x107   : > { %1895 = vmatprep.mubr.bf16.mxu1 %v4518_v45  ;;  %3857 = vmatprep.mubr.bf16.mxu0 %v4405_v3 }
 0x109   : > { %v3391_v61 = vpop.f32.mrb[4].mxu0  ;;  %v3463_v28 = vpop.f32.mrb[4].mxu1 }
 0x10a   : > { %v3392_v23 = vpop.f32.mrb[5].mxu0  ;;  %v3464_v10 = vpop.f32.mrb[5].mxu1 }
 0x10b   : > { %v4698_v34 = vadd.f32 %v3392_v23, %v3391_v61  ;;  %v4700_v39 = vadd.f32 %v3464_v10, %v3463_v28  ;;  %v3394_v49 = vpop.f32.mrb[6].mxu0  ;;  %v3466_v20 = vpop.f32.mrb[6].mxu1 }
 0x10c   : > { %v3395_v13 = vpop.f32.mrb[7].mxu0  ;;  %v3467_v52 = vpop.f32.mrb[7].mxu1 }
 0x10d   : > { %v4702_v12 = vadd.f32 %v3395_v13, %v3394_v49  ;;  %v4704_v14 = vadd.f32 %v3467_v52, %v3466_v20 }
 0x10e   : > { %1896 = vmatmul.mubr.bf16.gmra.mrb[112].mxu1 %v4439_v32  ;;  %3858 = vmatmul.mubr.bf16.vlgmr.msra.gmra.mrb[112].mxu0 %v4435_v31 }
 0x10f   : > { %1903 = vmatprep.mubr.bf16.mxu1 %v4533_v1  ;;  %3861 = vmatprep.mubr.bf16.mxu0 %v4473_v55 }
 0x111   : > { %v3397_v3 = vpop.f32.mrb[8].mxu0  ;;  %v3469_v45 = vpop.f32.mrb[8].mxu1 }
 0x112   : > { %v3398_v37 = vpop.f32.mrb[9].mxu0  ;;  %v3470_v18 = vpop.f32.mrb[9].mxu1 }
 0x113   : > { %v4710_v15 = vadd.f32 %v3398_v37, %v3397_v3  ;;  %v4712_v59 = vadd.f32 %v3470_v18, %v3469_v45  ;;  %v3400_v47 = vpop.f32.mrb[10].mxu0  ;;  %v3472_v63 = vpop.f32.mrb[10].mxu1 }
 0x114   : > { %v3401_v5 = vpop.f32.mrb[11].mxu0  ;;  %v3473_v19 = vpop.f32.mrb[11].mxu1 }
 0x115   : > { %v4714_v22 = vadd.f32 %v3401_v5, %v3400_v47  ;;  %v4716_v32 = vadd.f32 %v3473_v19, %v3472_v63  ;;  %v4022_v5 = vld [vmem:[%s4108_s14 + $0xd4] ss:$0 sps:$4 sm:$0x11]  }
 0x116   : > { %1904 = vmatmul.mubr.bf16.gmra.mrb[116].mxu1 %v4481_v6  ;;  %3862 = vmatmul.mubr.bf16.gmra.mrb[116].mxu0 %v4510_v33 }
 0x117   : > { %1911 = vmatprep.mubr.bf16.mxu1 %v4147_v35  ;;  %3865 = vmatprep.mubr.bf16.mxu0 %v4530_v62 }
 0x119   : > { %v3403_v31 = vpop.f32.mrb[12].mxu0  ;;  %v3475_v55 = vpop.f32.mrb[12].mxu1 }
 0x11a   : > { %v3404_v1 = vpop.f32.mrb[13].mxu0  ;;  %v3476_v24 = vpop.f32.mrb[13].mxu1 }
 0x11b   : > { %v4722_v30 = vadd.f32 %v3404_v1, %v3403_v31  ;;  %v4724_v48 = vadd.f32 %v3476_v24, %v3475_v55  ;;  %v3406_v9 = vpop.f32.mrb[14].mxu0  ;;  %v3478_v11 = vpop.f32.mrb[14].mxu1 }
 0x11c   : > { %v3407_v17 = vpop.f32.mrb[15].mxu0  ;;  %v3479_v41 = vpop.f32.mrb[15].mxu1 }
 0x11d   : > { %v4726_v46 = vadd.f32 %v3407_v17, %v3406_v9  ;;  %v4728_v6 = vadd.f32 %v3479_v41, %v3478_v11 }
 0x11e   : > { %1912 = vmatmul.mubr.bf16.gmra.mrb[120].mxu1 %v4590_v0  ;;  %3866 = vmatmul.mubr.bf16.gmra.mrb[120].mxu0 %v4542_v8 }
 0x11f   : > { %1919 = vmatprep.mubr.bf16.mxu1 %v4189_v58  ;;  %3869 = vmatprep.mubr.bf16.mxu0 %v4551_v21  ;;  %v4025_v58 = vld [vmem:[%s4108_s14 + $0x9c] sm:$0xff]  }
 0x121   : > { %v3497_v35 = vpop.f32.mrb[16].mxu1  ;;  %v3409_v33 = vpop.f32.mrb[16].mxu0 }
 0x122   : > { %v3498_v62 = vpop.f32.mrb[17].mxu1  ;;  %v3410_v50 = vpop.f32.mrb[17].mxu0 }
 0x123   : > { %v3499_v26 = vadd.f32 %v3498_v62, %v3497_v35  ;;  %v3500_v27 = vpop.f32.mrb[18].mxu1  ;;  %v4734_v42 = vadd.f32 %v3410_v50, %v3409_v33  ;;  %v3412_v57 = vpop.f32.mrb[18].mxu0  ;;  %v4027_v50 = vld [vmem:[%s4108_s14 + $0xb4] sm:$0xff]  }
 0x124   : > { %v3501_v61 = vpop.f32.mrb[19].mxu1  ;;  %v3413_v0 = vpop.f32.mrb[19].mxu0 }
 0x125   : > { %v4737_v28 = vadd.f32 %v3499_v26, %v4683_v36  ;;  %v3502_v8 = vadd.f32 %v3501_v61, %v3500_v27  ;;  %v4739_v23 = vadd.f32 %v3413_v0, %v3412_v57 }
 0x126   : > { %1920 = vmatmul.mubr.bf16.gmra.mrb[124].mxu1 %v4025_v58  ;;  %3870 = vmatmul.mubr.bf16.gmra.mrb[124].mxu0 %v4567_v60 }
 0x127   : > { %v4743_v21 = vadd.f32 %v3502_v8, %v4690_v7  ;;  %1927 = vmatprep.mubr.bf16.mxu1 %v4250_v25  ;;  %3873 = vmatprep.mubr.bf16.mxu0 %v4582_v29  ;;  %v4751_v7 = vld [vmem:[%s4108_s14 + $0xcc] sm:$0xff]  }
 0x128   : > { %v4026_v29 = vld [vmem:[%s4108_s14 + $0xa8] sm:$0xff]   ;;  %v726_v19 = vshll.u32 %v4751_v7, 16 }
 0x129   : > { %v3503_v10 = vpop.f32.mrb[20].mxu1  ;;  %v3415_v36 = vpop.f32.mrb[20].mxu0 }
 0x12a   : > { %v3504_v49 = vpop.f32.mrb[21].mxu1  ;;  %v3416_v20 = vpop.f32.mrb[21].mxu0  ;;  %v728_v41 = vrot.slane %v726_v19, 1 }
 0x12b   : > { %v3505_v13 = vadd.f32 %v3504_v49, %v3503_v10  ;;  %v3506_v52 = vpop.f32.mrb[22].mxu1  ;;  %v4748_v3 = vadd.f32 %v3416_v20, %v3415_v36  ;;  %v3418_v45 = vpop.f32.mrb[22].mxu0 }
 0x12c   : > { %v3507_v37 = vpop.f32.mrb[23].mxu1  ;;  %v3419_v25 = vpop.f32.mrb[23].mxu0 }
 0x12d   : > { %v4754_v60 = vadd.f32 %v3505_v13, %v4698_v34  ;;  %v3508_v18 = vadd.f32 %v3507_v37, %v3506_v52  ;;  %v4756_v47 = vadd.f32 %v3419_v25, %v3418_v45  ;;  %v736_v45 = vrot.slane %v4751_v7, 1 }
 0x12e   : > { %1928 = vmatmul.mubr.bf16.gmra.mrb[128].mxu1 %v4026_v29  ;;  %3874 = vmatmul.mubr.bf16.gmra.mrb[128].mxu0 %v4600_v44  ;;  %v724_v44 = vshrl.u32 %v4751_v7, 16  ;;  %v737_v37 = vrot.slane %v4022_v5, 1 }
 0x12f   : > { %v4760_v63 = vadd.f32 %v3508_v18, %v4702_v12  ;;  %1935 = vmatprep.mubr.bf16.mxu1 %v4283_v51  ;;  %3877 = vmatprep.mubr.bf16.mxu0 %v4612_v53  ;;  %v731_v51 = vshll.u32 %v4022_v5, 16 }
 0x130   : > { %v729_v27 = vor.u32 %v728_v41, %v724_v44 }
 0x131   : > { %v3509_v34 = vpop.f32.mrb[24].mxu1  ;;  %v3421_v31 = vpop.f32.mrb[24].mxu0  ;;  %v733_v57 = vrot.slane %v731_v51, 1 }
 0x132   : > { %v3510_v55 = vpop.f32.mrb[25].mxu1  ;;  %v3422_v1 = vpop.f32.mrb[25].mxu0 }
 0x133   : > { %v3511_v24 = vadd.f32 %v3510_v55, %v3509_v34  ;;  %v3512_v9 = vpop.f32.mrb[26].mxu1  ;;  %v4767_v11 = vadd.f32 %v3422_v1, %v3421_v31  ;;  %v3424_v12 = vpop.f32.mrb[26].mxu0 }
 0x134   : > { %v3513_v17 = vpop.f32.mrb[27].mxu1  ;;  %v3425_v35 = vpop.f32.mrb[27].mxu0 }
 0x135   : > { %v4771_v53 = vadd.f32 %v3511_v24, %v4710_v15  ;;  %v3514_v33 = vadd.f32 %v3513_v17, %v3512_v9  ;;  %v4773_v62 = vadd.f32 %v3425_v35, %v3424_v12 }
 0x136   : > { %1936 = vmatmul.mubr.bf16.gmra.mrb[132].mxu1 %v4027_v50  ;;  %3878 = vmatmul.mubr.bf16.gmra.mrb[132].mxu0 %v4621_v2 }
 0x137   : > { %v4777_v26 = vadd.f32 %v3514_v33, %v4714_v22  ;;  %1943 = vmatprep.mubr.bf16.mxu1 %v4688_v56  ;;  %3881 = vmatprep.mubr.bf16.mxu0 %v4630_v38  ;;  %v734_v22 = vsel %vm414_vm0, %v729_v27, %v733_v57 }
 0x139   : > { %v3515_v61 = vpop.f32.mrb[28].mxu1  ;;  %v3427_v15 = vpop.f32.mrb[28].mxu0 }
 0x13a   : > { %v3516_v0 = vpop.f32.mrb[29].mxu1  ;;  %v3428_v8 = vpop.f32.mrb[29].mxu0 }
 0x13b   : > { %v3517_v58 = vadd.f32 %v3516_v0, %v3515_v61  ;;  %v3518_v10 = vpop.f32.mrb[30].mxu1  ;;  %v4782_v36 = vadd.f32 %v3428_v8, %v3427_v15  ;;  %v3430_v49 = vpop.f32.mrb[30].mxu0 }
 0x13c   : > { %v3519_v20 = vpop.f32.mrb[31].mxu1  ;;  %v3431_v56 = vpop.f32.mrb[31].mxu0 }
 0x13d   : > { %v4786_v2 = vadd.f32 %v3517_v58, %v4722_v30  ;;  %v3520_v13 = vadd.f32 %v3519_v20, %v3518_v10  ;;  %v4788_v38 = vadd.f32 %v3431_v56, %v3430_v49 }
 0x13e   : > { %1944 = vmatmul.mubr.bf16.gmra.mrb[136].mxu1 %v4633_v43  ;;  %3882 = vmatmul.mubr.bf16.gmra.mrb[136].mxu0 %v4642_v4 }
 0x13f   : > { %v4792_v52 = vadd.f32 %v3520_v13, %v4726_v46  ;;  %1951 = vmatprep.mubr.bf16.mxu1 %v734_v22  ;;  %3885 = vmatprep.mubr.bf16.mxu0 %v4677_v54  ;;  %v738_v46 = vsel %vm623_vm1, %v736_v45, %v737_v37 }
 0x141   : > { %v3521_v25 = vpop.f32.mrb[32].mxu1  ;;  %v3433_v30 = vpop.f32.mrb[32].mxu0 }
 0x142   : > { %v3522_v18 = vpop.f32.mrb[33].mxu1  ;;  %v3434_v29 = vpop.f32.mrb[33].mxu0 }
 0x143   : > { %v3523_v19 = vadd.f32 %v3522_v18, %v3521_v25  ;;  %v3524_v34 = vpop.f32.mrb[34].mxu1  ;;  %v4797_v31 = vadd.f32 %v3434_v29, %v3433_v30  ;;  %v3436_v43 = vpop.f32.mrb[34].mxu0 }
 0x144   : > { %v3525_v55 = vpop.f32.mrb[35].mxu1  ;;  %v3437_v1 = vpop.f32.mrb[35].mxu0 }
 0x145   : > { %v4801_v4 = vadd.f32 %v3523_v19, %v4734_v42  ;;  %v3526_v54 = vadd.f32 %v3525_v55, %v3524_v34  ;;  %v4803_v24 = vadd.f32 %v3437_v1, %v3436_v43 }
 0x146   : > { %1952 = vmatmul.mubr.bf16.gmra.mrb[140].mxu1 %v4751_v7  ;;  %3886 = vmatmul.mubr.bf16.gmra.mrb[140].mxu0 %v738_v46 }
 0x147   : > { %v4807_v5 = vadd.f32 %v3526_v54, %v4739_v23 }
 0x149   : > { %v3527_v9 = vpop.f32.mrb[36].mxu1  ;;  %v3439_v12 = vpop.f32.mrb[36].mxu0 }
 0x14a   : > { %v3528_v17 = vpop.f32.mrb[37].mxu1  ;;  %v3440_v44 = vpop.f32.mrb[37].mxu0 }
 0x14b   : > { %v3529_v41 = vadd.f32 %v3528_v17, %v3527_v9  ;;  %v3530_v51 = vpop.f32.mrb[38].mxu1  ;;  %v4809_v35 = vadd.f32 %v3440_v44, %v3439_v12  ;;  %v3442_v42 = vpop.f32.mrb[38].mxu0 }
 0x14c   : > { %v3531_v33 = vpop.f32.mrb[39].mxu1  ;;  %v3443_v27 = vpop.f32.mrb[39].mxu0 }
 0x14d   : > { %v4812_v50 = vadd.f32 %v3529_v41, %v4748_v3  ;;  %v3532_v57 = vadd.f32 %v3531_v33, %v3530_v51  ;;  %v4814_v7 = vadd.f32 %v3443_v27, %v3442_v42  ;;  %v3161_v51 = vld [vmem:[%s4844_s7 + $0x18] sm:$0x1] }
 0x14f   : > { %v4817_v23 = vadd.f32 %v3532_v57, %v4756_v47  ;;  %v2326_v57 = vsel %vm4847_vm4, 0, %v3161_v51 }
 0x150   : > { %3162 = vst [vmem:[%s4844_s7 + $0x18] sm:$0x1] %v2326_v57 }
 0x151   : > { %v3533_v61 = vpop.f32.mrb[40].mxu1  ;;  %v3445_v15 = vpop.f32.mrb[40].mxu0 }
 0x152   : > { %v3534_v0 = vpop.f32.mrb[41].mxu1  ;;  %v3446_v8 = vpop.f32.mrb[41].mxu0 }
 0x153   : > { %v3535_v58 = vadd.f32 %v3534_v0, %v3533_v61  ;;  %v3536_v10 = vpop.f32.mrb[42].mxu1  ;;  %v4819_v49 = vadd.f32 %v3446_v8, %v3445_v15  ;;  %v3448_v20 = vpop.f32.mrb[42].mxu0  ;;  %v3159_v15 = vld [vmem:[%s4844_s7 + $0xc] sm:$0x1] }
 0x154   : > { %v3537_v22 = vpop.f32.mrb[43].mxu1  ;;  %v3449_v56 = vpop.f32.mrb[43].mxu0 }
 0x155   : > { %v4822_v3 = vadd.f32 %v3535_v58, %v4767_v11  ;;  %v3538_v13 = vadd.f32 %v3537_v22, %v3536_v10  ;;  %v4824_v45 = vadd.f32 %v3449_v56, %v3448_v20  ;;  %v2323_v10 = vsel %vm4847_vm4, 0, %v3159_v15  ;;  %v3193_v20 = vld [vmem:[%s4844_s7 + $0x20] sm:$0x1] }
 0x156   : > { %3160 = vst [vmem:[%s4844_s7 + $0xc] sm:$0x1] %v2323_v10 }
 0x157   : > { %v4827_v47 = vadd.f32 %v3538_v13, %v4773_v62  ;;  %v2376_v13 = vsel %vm4855_vm6, 0, %v3193_v20 }
 0x158   : > { %3194 = vst [vmem:[%s4844_s7 + $0x20] sm:$0x1] %v2376_v13 }
 0x159   : > { %v3539_v37 = vpop.f32.mrb[44].mxu1  ;;  %v3451_v25 = vpop.f32.mrb[44].mxu0 }
 0x15a   : > { %v3540_v30 = vpop.f32.mrb[45].mxu1  ;;  %v3452_v18 = vpop.f32.mrb[45].mxu0 }
 0x15b   : > { %v3541_v29 = vadd.f32 %v3540_v30, %v3539_v37  ;;  %v3542_v19 = vpop.f32.mrb[46].mxu1  ;;  %v4829_v34 = vadd.f32 %v3452_v18, %v3451_v25  ;;  %v3454_v43 = vpop.f32.mrb[46].mxu0 }
 0x15c   : > { %v3543_v55 = vpop.f32.mrb[47].mxu1  ;;  %v3455_v46 = vpop.f32.mrb[47].mxu0 }
 0x15d   : > { %v4832_v11 = vadd.f32 %v3541_v29, %v4782_v36  ;;  %v3544_v1 = vadd.f32 %v3543_v55, %v3542_v19  ;;  %v4834_v54 = vadd.f32 %v3455_v46, %v3454_v43 }
 0x15f   : > { %v4837_v62 = vadd.f32 %v3544_v1, %v4788_v38 }
 0x161   : > { %v3545_v9 = vpop.f32.mrb[48].mxu1  ;;  %v3609_v12 = vpop.f32.mrb[48].mxu0 }
 0x162   : > { %v3546_v17 = vpop.f32.mrb[49].mxu1  ;;  %v3610_v44 = vpop.f32.mrb[49].mxu0 }
 0x163   : > { %v3547_v36 = vadd.f32 %v3546_v17, %v3545_v9  ;;  %v3548_v41 = vpop.f32.mrb[50].mxu1  ;;  %v3611_v42 = vadd.f32 %v3610_v44, %v3609_v12  ;;  %v3612_v33 = vpop.f32.mrb[50].mxu0  ;;  %v3165_v44 = vld [vmem:[%s4844_s7 + $0x30] sm:$0x1] }
 0x164   : > { %v3549_v27 = vpop.f32.mrb[51].mxu1  ;;  %v3613_v58 = vpop.f32.mrb[51].mxu0  ;;  %v2332_v51 = vsel %vm4847_vm4, 0, %v3165_v44 }
 0x165   : > { %v4861_v0 = vadd.f32 %v3547_v36, %v4797_v31  ;;  %v3550_v8 = vadd.f32 %v3549_v27, %v3548_v41  ;;  %v4868_v22 = vadd.f32 %v3611_v42, %v4737_v28  ;;  %v3614_v56 = vadd.f32 %v3613_v58, %v3612_v33  ;;  %v3191_v31 = vld [vmem:[%s4844_s7 + $0x14] sm:$0x1]  ;;  %3166 = vst [vmem:[%s4844_s7 + $0x30] sm:$0x1] %v2332_v51  ;;  %v3197_v27 = vld [vmem:[%s4844_s7 + $0x38] sm:$0x1] }
 0x166   : > { %v2373_v30 = vsel %vm4855_vm6, 0, %v3191_v31 }
 0x167   : > { %v4874_v37 = vadd.f32 %v3550_v8, %v4803_v24  ;;  %v4879_v25 = vadd.f32 %v3614_v56, %v4743_v21  ;;  %3192 = vst [vmem:[%s4844_s7 + $0x14] sm:$0x1] %v2373_v30  ;;  %v3195_v8 = vld [vmem:[%s4844_s7 + $0x2c] sm:$0x1] }
 0x168   : > { %v2379_v20 = vsel %vm4855_vm6, 0, %v3195_v8 }
 0x169   : > { %v3551_v18 = vpop.f32.mrb[52].mxu1  ;;  %v3615_v28 = vpop.f32.mrb[52].mxu0  ;;  %3196 = vst [vmem:[%s4844_s7 + $0x2c] sm:$0x1] %v2379_v20 }
 0x16a   : > { %v3552_v29 = vpop.f32.mrb[53].mxu1  ;;  %v3616_v43 = vpop.f32.mrb[53].mxu0 }
 0x16b   : > { %v3553_v19 = vadd.f32 %v3552_v29, %v3551_v18  ;;  %v3554_v55 = vpop.f32.mrb[54].mxu1  ;;  %v3617_v24 = vadd.f32 %v3616_v43, %v3615_v28  ;;  %v3618_v46 = vpop.f32.mrb[54].mxu0 }
 0x16c   : > { %v3555_v1 = vpop.f32.mrb[55].mxu1  ;;  %v3619_v12 = vpop.f32.mrb[55].mxu0 }
 0x16d   : > { %v4885_v21 = vadd.f32 %v3553_v19, %v4809_v35  ;;  %v3556_v9 = vadd.f32 %v3555_v1, %v3554_v55  ;;  %v4888_v17 = vadd.f32 %v3617_v24, %v4754_v60  ;;  %v3620_v36 = vadd.f32 %v3619_v12, %v3618_v46  ;;  %v3163_v35 = vld [vmem:[%s4844_s7 + $0x24] sm:$0x1]  ;;  %v3169_v46 = vld [vmem:[%s4844_s7 + $0x48] sm:$0x1] }
 0x16e   : > { %v2329_v60 = vsel %vm4847_vm4, 0, %v3163_v35 }
 0x16f   : > { %v4892_v41 = vadd.f32 %v3556_v9, %v4814_v7  ;;  %v4897_v42 = vadd.f32 %v3620_v36, %v4760_v63  ;;  %3164 = vst [vmem:[%s4844_s7 + $0x24] sm:$0x1] %v2329_v60  ;;  %v2382_v7 = vsel %vm4855_vm6, 0, %v3197_v27 }
 0x170   : > { %3198 = vst [vmem:[%s4844_s7 + $0x38] sm:$0x1] %v2382_v7 }
 0x171   : > { %v3557_v33 = vpop.f32.mrb[56].mxu1  ;;  %v3621_v57 = vpop.f32.mrb[56].mxu0 }
 0x172   : > { %v3558_v15 = vpop.f32.mrb[57].mxu1  ;;  %v3622_v10 = vpop.f32.mrb[57].mxu0 }
 0x173   : > { %v3559_v58 = vadd.f32 %v3558_v15, %v3557_v33  ;;  %v3560_v63 = vpop.f32.mrb[58].mxu1  ;;  %v3623_v56 = vadd.f32 %v3622_v10, %v3621_v57  ;;  %v3624_v13 = vpop.f32.mrb[58].mxu0  ;;  %v3201_v57 = vld [vmem:[%s4844_s7 + $0x50] sm:$0x1] }
 0x174   : > { %v3561_v31 = vpop.f32.mrb[59].mxu1  ;;  %v3625_v28 = vpop.f32.mrb[59].mxu0  ;;  %v2388_v8 = vsel %vm4855_vm6, 0, %v3201_v57  ;;  %v3203_v57 = vld [vmem:[%s4844_s7 + $0x5c] sm:$0x1] }
 0x175   : > { %v4913_v30 = vadd.f32 %v3559_v58, %v4819_v49  ;;  %v3562_v18 = vadd.f32 %v3561_v31, %v3560_v63  ;;  %v4916_v29 = vadd.f32 %v3623_v56, %v4771_v53  ;;  %v3626_v19 = vadd.f32 %v3625_v28, %v3624_v13  ;;  %v3199_v58 = vld [vmem:[%s4844_s7 + $0x44] sm:$0x1]  ;;  %3202 = vst [vmem:[%s4844_s7 + $0x50] sm:$0x1] %v2388_v8 }
 0x176   : > { %v2338_v49 = vsel %vm4847_vm4, 0, %v3169_v46 }
 0x177   : > { %v4919_v43 = vadd.f32 %v3562_v18, %v4824_v45  ;;  %v4922_v55 = vadd.f32 %v3626_v19, %v4777_v26  ;;  %3170 = vst [vmem:[%s4844_s7 + $0x48] sm:$0x1] %v2338_v49  ;;  %v3167_v26 = vld [vmem:[%s4844_s7 + $0x3c] sm:$0x1] }
 0x178   : > { %v2335_v27 = vsel %vm4847_vm4, 0, %v3167_v26 }
 0x179   : > { %v3563_v24 = vpop.f32.mrb[60].mxu1  ;;  %v3627_v1 = vpop.f32.mrb[60].mxu0  ;;  %3168 = vst [vmem:[%s4844_s7 + $0x3c] sm:$0x1] %v2335_v27 }
 0x17a   : > { %v3564_v9 = vpop.f32.mrb[61].mxu1  ;;  %v3628_v53 = vpop.f32.mrb[61].mxu0 }
 0x17b   : > { %v3565_v12 = vadd.f32 %v3564_v9, %v3563_v24  ;;  %v3566_v36 = vpop.f32.mrb[62].mxu1  ;;  %v3629_v45 = vadd.f32 %v3628_v53, %v3627_v1  ;;  %v3630_v44 = vpop.f32.mrb[62].mxu0  ;;  %v3173_v24 = vld [vmem:[%s4844_s7 + $0x60] sm:$0x1] }
 0x17c   : > { %v3567_v51 = vpop.f32.mrb[63].mxu1  ;;  %v3631_v60 = vpop.f32.mrb[63].mxu0  ;;  %v2344_v9 = vsel %vm4847_vm4, 0, %v3173_v24 }
 0x17d   : > { %v4930_v35 = vadd.f32 %v3565_v12, %v4829_v34  ;;  %v3568_v33 = vadd.f32 %v3567_v51, %v3566_v36  ;;  %v4936_v15 = vadd.f32 %v3629_v45, %v4786_v2  ;;  %v3632_v7 = vadd.f32 %v3631_v60, %v3630_v44  ;;  %3174 = vst [vmem:[%s4844_s7 + $0x60] sm:$0x1] %v2344_v9  ;;  %v3171_v36 = vld [vmem:[%s4844_s7 + $0x54] sm:$0x1]  ;;  %v3205_v44 = vld [vmem:[%s4844_s7 + $0x68] sm:$0x1] }
 0x17e   : > { %v2385_v34 = vsel %vm4855_vm6, 0, %v3199_v58  ;;  %v2391_v58 = vsel %vm4855_vm6, 0, %v3203_v57 }
 0x17f   : > { %v4943_v10 = vadd.f32 %v3568_v33, %v4834_v54  ;;  %v4949_v63 = vadd.f32 %v3632_v7, %v4792_v52  ;;  %3200 = vst [vmem:[%s4844_s7 + $0x44] sm:$0x1] %v2385_v34  ;;  %3204 = vst [vmem:[%s4844_s7 + $0x5c] sm:$0x1] %v2391_v58 }
 0x181   : > { %v3569_v2 = vpop.f32.mrb[64].mxu1  ;;  %v3633_v20 = vpop.f32.mrb[64].mxu0 }
 0x182   : > { %v3570_v56 = vpop.f32.mrb[65].mxu1  ;;  %v3634_v31 = vpop.f32.mrb[65].mxu0 }
 0x183   : > { %v3571_v13 = vadd.f32 %v3570_v56, %v3569_v2  ;;  %v3572_v18 = vpop.f32.mrb[66].mxu1  ;;  %v3635_v28 = vadd.f32 %v3634_v31, %v3633_v20  ;;  %v3636_v54 = vpop.f32.mrb[66].mxu0 }
 0x184   : > { %v3573_v19 = vpop.f32.mrb[67].mxu1  ;;  %v3637_v1 = vpop.f32.mrb[67].mxu0 }
 0x185   : > { %v4954_v46 = vadd.f32 %v3571_v13, %v4685_v40  ;;  %v3574_v52 = vadd.f32 %v3573_v19, %v3572_v18  ;;  %v4959_v49 = vadd.f32 %v3635_v28, %v4801_v4  ;;  %v3638_v12 = vadd.f32 %v3637_v1, %v3636_v54 }
 0x186   : > { %v2341_v40 = vsel %vm4847_vm4, 0, %v3171_v36  ;;  %v2394_v4 = vsel %vm4855_vm6, 0, %v3205_v44 }
 0x187   : > { %v4963_v53 = vadd.f32 %v3574_v52, %v4692_v16  ;;  %v4967_v45 = vadd.f32 %v3638_v12, %v4807_v5  ;;  %3172 = vst [vmem:[%s4844_s7 + $0x54] sm:$0x1] %v2341_v40  ;;  %3206 = vst [vmem:[%s4844_s7 + $0x68] sm:$0x1] %v2394_v4 }
 0x189   : > { %v3575_v51 = vpop.f32.mrb[68].mxu1  ;;  %v3639_v26 = vpop.f32.mrb[68].mxu0 }
 0x18a   : > { %v3576_v33 = vpop.f32.mrb[69].mxu1  ;;  %v3640_v16 = vpop.f32.mrb[69].mxu0 }
 0x18b   : > { %v3577_v60 = vadd.f32 %v3576_v33, %v3575_v51  ;;  %v3578_v27 = vpop.f32.mrb[70].mxu1  ;;  %v3641_v7 = vadd.f32 %v3640_v16, %v3639_v26  ;;  %v3642_v5 = vpop.f32.mrb[70].mxu0  ;;  %v3177_v51 = vld [vmem:[%s4844_s7 + $0x78] sm:$0x1]  ;;  %v3175_v16 = vld [vmem:[%s4844_s7 + $0x6c] sm:$0x1] }
 0x18c   : > { %v3579_v8 = vpop.f32.mrb[71].mxu1  ;;  %v3643_v20 = vpop.f32.mrb[71].mxu0  ;;  %v2350_v26 = vsel %vm4847_vm4, 0, %v3177_v51 }
 0x18d   : > { %v4980_v34 = vadd.f32 %v3577_v60, %v4700_v39  ;;  %v3580_v2 = vadd.f32 %v3579_v8, %v3578_v27  ;;  %v4984_v56 = vadd.f32 %v3641_v7, %v4812_v50  ;;  %v3644_v13 = vadd.f32 %v3643_v20, %v3642_v5  ;;  %3178 = vst [vmem:[%s4844_s7 + $0x78] sm:$0x1] %v2350_v26 }
 0x18f   : > { %v4987_v31 = vadd.f32 %v3580_v2, %v4704_v14  ;;  %v4990_v18 = vadd.f32 %v3644_v13, %v4817_v23 }
 0x191   : > { %v3581_v28 = vpop.f32.mrb[72].mxu1  ;;  %v3645_v54 = vpop.f32.mrb[72].mxu0 }
 0x192   : > { %v3582_v19 = vpop.f32.mrb[73].mxu1  ;;  %v3646_v39 = vpop.f32.mrb[73].mxu0 }
 0x193   : > { %v3583_v24 = vadd.f32 %v3582_v19, %v3581_v28  ;;  %v3584_v52 = vpop.f32.mrb[74].mxu1  ;;  %v3647_v1 = vadd.f32 %v3646_v39, %v3645_v54  ;;  %v3648_v9 = vpop.f32.mrb[74].mxu0 }
 0x194   : > { %v3585_v50 = vpop.f32.mrb[75].mxu1  ;;  %v3649_v36 = vpop.f32.mrb[75].mxu0 }
 0x195   : > { %v4993_v12 = vadd.f32 %v3583_v24, %v4712_v59  ;;  %v3586_v14 = vadd.f32 %v3585_v50, %v3584_v52  ;;  %v4996_v23 = vadd.f32 %v3647_v1, %v4822_v3  ;;  %v3650_v40 = vadd.f32 %v3649_v36, %v3648_v9  ;;  %v3209_v3 = vld [vmem:[%s4844_s7 + $0x80] sm:$0x1] }
 0x197   : > { %v4999_v44 = vadd.f32 %v3586_v14, %v4716_v32  ;;  %v5003_v4 = vadd.f32 %v3650_v40, %v4827_v47  ;;  %v2347_v32 = vsel %vm4847_vm4, 0, %v3175_v16  ;;  %v2400_v47 = vsel %vm4855_vm6, 0, %v3209_v3  ;;  %v3207_v40 = vld [vmem:[%s4844_s7 + $0x74] sm:$0x1]  ;;  %v3179_v16 = vld [vmem:[%s4844_s7 + $0x84] sm:$0x1] }
 0x198   : > { %3176 = vst [vmem:[%s4844_s7 + $0x6c] sm:$0x1] %v2347_v32  ;;  %3210 = vst [vmem:[%s4844_s7 + $0x80] sm:$0x1] %v2400_v47  ;;  %v2397_v26 = vsel %vm4855_vm6, 0, %v3207_v40 }
 0x199   : > { %v3587_v59 = vpop.f32.mrb[76].mxu1  ;;  %v3651_v33 = vpop.f32.mrb[76].mxu0  ;;  %3208 = vst [vmem:[%s4844_s7 + $0x74] sm:$0x1] %v2397_v26 }
 0x19a   : > { %v3588_v60 = vpop.f32.mrb[77].mxu1  ;;  %v3652_v57 = vpop.f32.mrb[77].mxu0 }
 0x19b   : > { %v3589_v27 = vadd.f32 %v3588_v60, %v3587_v59  ;;  %v3590_v7 = vpop.f32.mrb[78].mxu1  ;;  %v3653_v5 = vadd.f32 %v3652_v57, %v3651_v33  ;;  %v3654_v8 = vpop.f32.mrb[78].mxu0  ;;  %v3181_v60 = vld [vmem:[%s4844_s7 + $0x90] sm:$0x1] }
 0x19c   : > { %v3591_v58 = vpop.f32.mrb[79].mxu1  ;;  %v3655_v13 = vpop.f32.mrb[79].mxu0 }
 0x19d   : > { %v5017_v2 = vadd.f32 %v3589_v27, %v4724_v48  ;;  %v3592_v20 = vadd.f32 %v3591_v58, %v3590_v7  ;;  %v5020_v28 = vadd.f32 %v3653_v5, %v4832_v11  ;;  %v3656_v54 = vadd.f32 %v3655_v13, %v3654_v8  ;;  %v3213_v7 = vld [vmem:[%s4844_s7 + $0x98] sm:$0x1] }
 0x19e   : > { %v2356_v27 = vsel %vm4847_vm4, 0, %v3181_v60 }
 0x19f   : > { %v5023_v19 = vadd.f32 %v3592_v20, %v4728_v6  ;;  %v5026_v24 = vadd.f32 %v3656_v54, %v4837_v62  ;;  %3182 = vst [vmem:[%s4844_s7 + $0x90] sm:$0x1] %v2356_v27 }
 0x1a1   : > { %v3721_v39 = vpop.f32.mrb[80].mxu1  ;;  %v3657_v52 = vpop.f32.mrb[80].mxu0 }
 0x1a2   : > { %v3722_v1 = vpop.f32.mrb[81].mxu1  ;;  %v3658_v48 = vpop.f32.mrb[81].mxu0 }
 0x1a3   : > { %v3723_v9 = vadd.f32 %v3722_v1, %v3721_v39  ;;  %v3724_v50 = vpop.f32.mrb[82].mxu1  ;;  %v3659_v14 = vadd.f32 %v3658_v48, %v3657_v52  ;;  %v3660_v36 = vpop.f32.mrb[82].mxu0  ;;  %v3211_v1 = vld [vmem:[%s4844_s7 + $0x8c] sm:$0x1] }
 0x1a4   : > { %v3725_v11 = vpop.f32.mrb[83].mxu1  ;;  %v3661_v6 = vpop.f32.mrb[83].mxu0 }
 0x1a5   : > { %v3726_v51 = vadd.f32 %v3725_v11, %v3724_v50  ;;  %v5030_v62 = vadd.f32 %v3723_v9, %v4868_v22  ;;  %v5035_v59 = vadd.f32 %v3659_v14, %v4861_v0  ;;  %v3662_v33 = vadd.f32 %v3661_v6, %v3660_v36  ;;  %v3185_v14 = vld [vmem:[%s4844_s7 + $0xa8] sm:$0x1] }
 0x1a6   : > { %v2353_v22 = vsel %vm4847_vm4, 0, %v3179_v16  ;;  %v2403_v50 = vsel %vm4855_vm6, 0, %v3211_v1  ;;  %v2362_v11 = vsel %vm4847_vm4, 0, %v3185_v14  ;;  %v3189_v1 = vld [vmem:[%s4844_s7 + $0xc0] sm:$0x1] }
 0x1a7   : > { %v5041_v3 = vadd.f32 %v3726_v51, %v4879_v25  ;;  %v5048_v57 = vadd.f32 %v3662_v33, %v4874_v37  ;;  %3180 = vst [vmem:[%s4844_s7 + $0x84] sm:$0x1] %v2353_v22  ;;  %v2406_v25 = vsel %vm4855_vm6, 0, %v3213_v7  ;;  %3212 = vst [vmem:[%s4844_s7 + $0x8c] sm:$0x1] %v2403_v50 }
 0x1a8   : > { %3214 = vst [vmem:[%s4844_s7 + $0x98] sm:$0x1] %v2406_v25  ;;  %3186 = vst [vmem:[%s4844_s7 + $0xa8] sm:$0x1] %v2362_v11  ;;  %v3217_v25 = vld [vmem:[%s4844_s7 + $0xb0] sm:$0x1] }
 0x1a9   : > { %v3727_v0 = vpop.f32.mrb[84].mxu1  ;;  %v3663_v32 = vpop.f32.mrb[84].mxu0 }
 0x1aa   : > { %v3728_v47 = vpop.f32.mrb[85].mxu1  ;;  %v3664_v5 = vpop.f32.mrb[85].mxu0 }
 0x1ab   : > { %v3729_v8 = vadd.f32 %v3728_v47, %v3727_v0  ;;  %v3730_v58 = vpop.f32.mrb[86].mxu1  ;;  %v3665_v20 = vadd.f32 %v3664_v5, %v3663_v32  ;;  %v3666_v37 = vpop.f32.mrb[86].mxu0 }
 0x1ac   : > { %v3731_v13 = vpop.f32.mrb[87].mxu1  ;;  %v3667_v54 = vpop.f32.mrb[87].mxu0 }
 0x1ad   : > { %v3732_v39 = vadd.f32 %v3731_v13, %v3730_v58  ;;  %v5057_v52 = vadd.f32 %v3729_v8, %v4888_v17  ;;  %v5061_v48 = vadd.f32 %v3665_v20, %v4885_v21  ;;  %v3668_v9 = vadd.f32 %v3667_v54, %v3666_v37  ;;  %v3215_v58 = vld [vmem:[%s4844_s7 + $0xa4] sm:$0x1] }
 0x1ae   : > { %v2412_v8 = vsel %vm4855_vm6, 0, %v3217_v25  ;;  %v2409_v13 = vsel %vm4855_vm6, 0, %v3215_v58 }
 0x1af   : > { %v5067_v36 = vadd.f32 %v3732_v39, %v4897_v42  ;;  %v5073_v17 = vadd.f32 %v3668_v9, %v4892_v41  ;;  %v3183_v41 = vld [vmem:[%s4844_s7 + $0x9c] sm:$0x1]  ;;  %3218 = vst [vmem:[%s4844_s7 + $0xb0] sm:$0x1] %v2412_v8  ;;  %3216 = vst [vmem:[%s4844_s7 + $0xa4] sm:$0x1] %v2409_v13 }
 0x1b0   : > { %v2359_v47 = vsel %vm4847_vm4, 0, %v3183_v41 }
 0x1b1   : > { %v3733_v40 = vpop.f32.mrb[88].mxu1  ;;  %v3669_v21 = vpop.f32.mrb[88].mxu0  ;;  %3184 = vst [vmem:[%s4844_s7 + $0x9c] sm:$0x1] %v2359_v47 }
 0x1b2   : > { %v3734_v6 = vpop.f32.mrb[89].mxu1  ;;  %v3670_v51 = vpop.f32.mrb[89].mxu0 }
 0x1b3   : > { %v3735_v26 = vadd.f32 %v3734_v6, %v3733_v40  ;;  %v3736_v33 = vpop.f32.mrb[90].mxu1  ;;  %v3671_v42 = vadd.f32 %v3670_v51, %v3669_v21  ;;  %v3672_v60 = vpop.f32.mrb[90].mxu0 }
 0x1b4   : > { %v3737_v16 = vpop.f32.mrb[91].mxu1  ;;  %v3673_v27 = vpop.f32.mrb[91].mxu0 }
 0x1b5   : > { %v3738_v22 = vadd.f32 %v3737_v16, %v3736_v33  ;;  %v5077_v0 = vadd.f32 %v3735_v26, %v4916_v29  ;;  %v5081_v7 = vadd.f32 %v3671_v42, %v4913_v30  ;;  %v3674_v32 = vadd.f32 %v3673_v27, %v3672_v60  ;;  %v3187_v27 = vld [vmem:[%s4844_s7 + $0xb4] sm:$0x1] }
 0x1b7   : > { %v5087_v5 = vadd.f32 %v3738_v22, %v4922_v55  ;;  %v5093_v29 = vadd.f32 %v3674_v32, %v4919_v43  ;;  %v2368_v43 = vsel %vm4847_vm4, 0, %v3189_v1  ;;  %v3221_v32 = vld [vmem:[%s4844_s7 + $0xc8] sm:$0x1] }
 0x1b8   : > { %3190 = vst [vmem:[%s4844_s7 + $0xc0] sm:$0x1] %v2368_v43 }
 0x1b9   : > { %v3739_v30 = vpop.f32.mrb[92].mxu1  ;;  %v3675_v20 = vpop.f32.mrb[92].mxu0 }
 0x1ba   : > { %v3740_v37 = vpop.f32.mrb[93].mxu1  ;;  %v3676_v54 = vpop.f32.mrb[93].mxu0 }
 0x1bb   : > { %v3741_v39 = vadd.f32 %v3740_v37, %v3739_v30  ;;  %v3742_v55 = vpop.f32.mrb[94].mxu1  ;;  %v3677_v9 = vadd.f32 %v3676_v54, %v3675_v20  ;;  %v3678_v50 = vpop.f32.mrb[94].mxu0 }
 0x1bc   : > { %v3743_v14 = vpop.f32.mrb[95].mxu1  ;;  %v3679_v11 = vpop.f32.mrb[95].mxu0 }
 0x1bd   : > { %v3744_v40 = vadd.f32 %v3743_v14, %v3742_v55  ;;  %v5104_v21 = vadd.f32 %v3741_v39, %v4936_v15  ;;  %v5108_v6 = vadd.f32 %v3677_v9, %v4930_v35  ;;  %v3680_v51 = vadd.f32 %v3679_v11, %v3678_v50 }
 0x1be   : > { %v2365_v35 = vsel %vm4847_vm4, 0, %v3187_v27 }
 0x1bf   : > { %v5111_v26 = vadd.f32 %v3744_v40, %v4949_v63  ;;  %v5114_v33 = vadd.f32 %v3680_v51, %v4943_v10  ;;  %3188 = vst [vmem:[%s4844_s7 + $0xb4] sm:$0x1] %v2365_v35  ;;  %v2418_v10 = vsel %vm4855_vm6, 0, %v3221_v32 }
 0x1c0   : > { %3222 = vst [vmem:[%s4844_s7 + $0xc8] sm:$0x1] %v2418_v10 }
 0x1c1   : > { %v3745_v42 = vpop.f32.mrb[96].mxu1  ;;  %v3681_v60 = vpop.f32.mrb[96].mxu0 }
 0x1c2   : > { %v3746_v16 = vpop.f32.mrb[97].mxu1  ;;  %v3682_v22 = vpop.f32.mrb[97].mxu0 }
 0x1c3   : > { %v3747_v15 = vadd.f32 %v3746_v16, %v3745_v42  ;;  %v3748_v41 = vpop.f32.mrb[98].mxu1  ;;  %v3683_v47 = vadd.f32 %v3682_v22, %v3681_v60  ;;  %v3684_v25 = vpop.f32.mrb[98].mxu0  ;;  %v3219_v42 = vld [vmem:[%s4844_s7 + $0xbc] sm:$0x1] }
 0x1c4   : > { %v3749_v8 = vpop.f32.mrb[99].mxu1  ;;  %v3685_v63 = vpop.f32.mrb[99].mxu0  ;;  %v2415_v16 = vsel %vm4855_vm6, 0, %v3219_v42 }
 0x1c5   : > { %v3750_v30 = vadd.f32 %v3749_v8, %v3748_v41  ;;  %v5124_v58 = vadd.f32 %v3747_v15, %v4959_v49  ;;  %v5128_v20 = vadd.f32 %v3683_v47, %v4954_v46  ;;  %v3686_v37 = vadd.f32 %v3685_v63, %v3684_v25  ;;  %3220 = vst [vmem:[%s4844_s7 + $0xbc] sm:$0x1] %v2415_v16 }
 0x1c7   : > { %v5131_v13 = vadd.f32 %v3750_v30, %v4967_v45  ;;  %v5134_v54 = vadd.f32 %v3686_v37, %v4963_v53 }
 0x1c9   : > { %v3751_v39 = vpop.f32.mrb[100].mxu1  ;;  %v3687_v55 = vpop.f32.mrb[100].mxu0 }
 0x1ca   : > { %v3752_v1 = vpop.f32.mrb[101].mxu1  ;;  %v3688_v9 = vpop.f32.mrb[101].mxu0 }
 0x1cb   : > { %v3753_v50 = vadd.f32 %v3752_v1, %v3751_v39  ;;  %v3754_v49 = vpop.f32.mrb[102].mxu1  ;;  %v3689_v14 = vadd.f32 %v3688_v9, %v3687_v55  ;;  %v3690_v43 = vpop.f32.mrb[102].mxu0 }
 0x1cc   : > { %v3755_v11 = vpop.f32.mrb[103].mxu1  ;;  %v3691_v46 = vpop.f32.mrb[103].mxu0 }
 0x1cd   : > { %v3756_v40 = vadd.f32 %v3755_v11, %v3754_v49  ;;  %v5137_v51 = vadd.f32 %v3753_v50, %v4984_v56  ;;  %v5140_v45 = vadd.f32 %v3689_v14, %v4980_v34  ;;  %v3692_v53 = vadd.f32 %v3691_v46, %v3690_v43 }
 0x1cf   : > { %v5144_v60 = vadd.f32 %v3756_v40, %v4990_v18  ;;  %v5149_v27 = vadd.f32 %v3692_v53, %v4987_v31 }
 0x1d1   : > { %v3757_v22 = vpop.f32.mrb[104].mxu1  ;;  %v3693_v15 = vpop.f32.mrb[104].mxu0 }
 0x1d2   : > { %v3758_v41 = vpop.f32.mrb[105].mxu1  ;;  %v3694_v56 = vpop.f32.mrb[105].mxu0 }
 0x1d3   : > { %v3759_v35 = vadd.f32 %v3758_v41, %v3757_v22  ;;  %v3760_v32 = vpop.f32.mrb[106].mxu1  ;;  %v3695_v34 = vadd.f32 %v3694_v56, %v3693_v15  ;;  %v3696_v47 = vpop.f32.mrb[106].mxu0 }
 0x1d4   : > { %v3761_v25 = vpop.f32.mrb[107].mxu1  ;;  %v3697_v8 = vpop.f32.mrb[107].mxu0 }
 0x1d5   : > { %v3762_v10 = vadd.f32 %v3761_v25, %v3760_v32  ;;  %v5153_v18 = vadd.f32 %v3759_v35, %v4996_v23  ;;  %v5156_v61 = vadd.f32 %v3695_v34, %v4993_v12  ;;  %v3698_v31 = vadd.f32 %v3697_v8, %v3696_v47 }
 0x1d7   : > { %v5159_v63 = vadd.f32 %v3762_v10, %v5003_v4  ;;  %v5162_v30 = vadd.f32 %v3698_v31, %v4999_v44 }
 0x1d9   : > { %5846 = vst [vmem:[#allocation2_spill] sm:$0xff] %v5162_v30  ;;  %v3763_v37 = vpop.f32.mrb[108].mxu1  ;;  %v3699_v39 = vpop.f32.mrb[108].mxu0 }
 0x1da   : > { %v3764_v55 = vpop.f32.mrb[109].mxu1  ;;  %v3700_v1 = vpop.f32.mrb[109].mxu0 }
 0x1db   : > { %v3765_v9 = vadd.f32 %v3764_v55, %v3763_v37  ;;  %v3766_v50 = vpop.f32.mrb[110].mxu1  ;;  %v3701_v49 = vadd.f32 %v3700_v1, %v3699_v39  ;;  %v3702_v14 = vpop.f32.mrb[110].mxu0 }
 0x1dc   : > { %v3767_v23 = vpop.f32.mrb[111].mxu1  ;;  %v3703_v43 = vpop.f32.mrb[111].mxu0 }
 0x1dd   : > { %v3768_v11 = vadd.f32 %v3767_v23, %v3766_v50  ;;  %v5165_v12 = vadd.f32 %v3765_v9, %v5020_v28  ;;  %v5168_v4 = vadd.f32 %v3701_v49, %v5017_v2  ;;  %v3704_v46 = vadd.f32 %v3703_v43, %v3702_v14  ;;  %v3260_v9 = vld [vmem:[%s4844_s7 + $0x18] sm:$0xf]  ;;  %v3255_v43 = vld [vmem:[%s4844_s7 + $0xc] sm:$0xf] }
 0x1df   : > { %v5171_v44 = vadd.f32 %v3768_v11, %v5026_v24  ;;  %v5174_v40 = vadd.f32 %v3704_v46, %v5023_v19 }
 0x1e1   : > { %5847 = vst [vmem:[#allocation3_spill] sm:$0xff] %v5174_v40  ;;  %v3769_v53 = vpop.f32.mrb[112].mxu1  ;;  %v3859_v42 = vpop.f32.mrb[112].mxu0 }
 0x1e2   : > { %v3770_v16 = vpop.f32.mrb[113].mxu1  ;;  %v2003_v22 = vadd.f32 %v3859_v42, %v5057_v52  ;;  %v1994_v41 = vpop.f32.mrb[113].mxu0 }
 0x1e3   : > { %v3771_v15 = vadd.f32 %v3770_v16, %v3769_v53  ;;  %v3772_v56 = vpop.f32.mrb[114].mxu1  ;;  %v1995_v28 = vadd.f32 %v1994_v41, %v5030_v62  ;;  %v3860_v35 = vpop.f32.mrb[114].mxu0 }
 0x1e4   : > { %v3773_v2 = vpop.f32.mrb[115].mxu1  ;;  %v3339_v32 = vpack.c.bf16 %v2003_v22, %v2003_v22  ;;  %v2006_v34 = vadd.f32 %v3860_v35, %v5067_v36  ;;  %v1997_v19 = vpop.f32.mrb[115].mxu0 }
 0x1e5   : > { %v5179_v24 = vadd.f32 %v3773_v2, %v3772_v56  ;;  %v5182_v47 = vadd.f32 %v3771_v15, %v5035_v59  ;;  %v3337_v25 = vpack.c.bf16 %v1995_v28, %v1995_v28  ;;  %v1998_v52 = vadd.f32 %v1997_v19, %v5041_v3  ;;  %v3263_v19 = vld [vmem:[%s4844_s7 + $0x20] sm:$0x1] }
 0x1e6   : > { %v2520_v8 = vshrl.u32 %v3339_v32, 16  ;;  %v2523_v62 = vshll.u32 %v3339_v32, 16  ;;  %v5185_v10 = vpack.c.bf16 %v2006_v34, %v2003_v22  ;;  %v3340_v31 = vpack.c.bf16 %v2006_v34, %v2006_v34 }
 0x1e7   : > { %v2503_v37 = vshrl.u32 %v3337_v25, 16  ;;  %v2506_v36 = vshll.u32 %v3337_v25, 16  ;;  %v5187_v39 = vpack.c.bf16 %v1998_v52, %v1995_v28  ;;  %v3338_v55 = vpack.c.bf16 %v1998_v52, %v1998_v52 }
 0x1e8   : > { %5848 = vst [vmem:[#allocation4_spill] sm:$0xff] %v5185_v10  ;;  %v2522_v1 = vrot.slane %v2520_v8, 7  ;;  %v5823_v59 = vunpack.c.l.bf16 %v5185_v10  ;;  %v2528_v49 = vshrl.u32 %v3340_v31, 16  ;;  %v2531_v11 = vshll.u32 %v3340_v31, 16 }
 0x1e9   : > { %5849 = vst [vmem:[#allocation5_spill] sm:$0xff] %v5187_v39  ;;  %v3775_v14 = vpop.f32.mrb[116].mxu1  ;;  %v2505_v23 = vrot.slane %v2503_v37, 7  ;;  %v5822_v46 = vunpack.c.l.bf16 %v5187_v39  ;;  %v5821_v53 = vunpack.c.h.bf16 %v5187_v39  ;;  %v3863_v42 = vpop.f32.mrb[116].mxu0  ;;  %v2511_v56 = vshrl.u32 %v3338_v55, 16 }
 0x1ea   : > { %v3776_v16 = vpop.f32.mrb[117].mxu1  ;;  %v2525_v22 = vor.u32 %v2523_v62, %v2522_v1  ;;  %v2526_v15 = vrot.slane %v2522_v1, 4  ;;  %v2530_v41 = vrot.slane %v2528_v49, 7  ;;  %v2010_v28 = vpop.f32.mrb[117].mxu0  ;;  %v2514_v52 = vshll.u32 %v3338_v55, 16 }
 0x1eb   : > { %v3778_v35 = vpop.f32.mrb[118].mxu1  ;;  %v2508_v2 = vor.u32 %v2506_v36, %v2505_v23  ;;  %v2509_v32 = vrot.slane %v2505_v23, 4  ;;  %v2169_v25 = vadd.f32 %v5821_v53, %v5822_v46  ;;  %v3864_v8 = vpop.f32.mrb[118].mxu0  ;;  %v2513_v1 = vrot.slane %v2511_v56, 7  ;;  %v3258_v53 = vld [vmem:[%s4844_s7 + $0x14] sm:$0x1] }
 0x1ec   : > { %v3779_v62 = vpop.f32.mrb[119].mxu1  ;;  %v2832_v31 = vsel %vm5194_vm9, %v2525_v22, %v3260_v9  ;;  %v2533_v37 = vor.u32 %v2531_v11, %v2530_v41  ;;  %v2535_v36 = vrot.slane %v2530_v41, 4  ;;  %v2013_v49 = vpop.f32.mrb[119].mxu0  ;;  %v2019_v55 = vadd.f32 %v3863_v42, %v5104_v21 }
 0x1ed   : > { %3261 = vst [vmem:[%s4844_s7 + $0x18] sm:$0xf] %v2832_v31  ;;  %v2825_v23 = vsel %vm5194_vm9, %v2508_v2, %v3255_v43  ;;  %v2170_v50 = vadd.f32 %v2169_v25, %v5823_v59  ;;  %v5221_v46 = vadd.f32 %v3776_v16, %v3775_v14  ;;  %v2516_v22 = vor.u32 %v2514_v52, %v2513_v1 }
 0x1ee   : > { %3256 = vst [vmem:[%s4844_s7 + $0xc] sm:$0xf] %v2825_v23  ;;  %v2534_v9 = vsel %vm5203_vm10, %v2526_v15, %v2533_v37  ;;  %v2836_v11 = vsel %vm4847_vm4, %v2535_v36, %v3263_v19  ;;  %v2518_v41 = vrot.slane %v2513_v1, 4  ;;  %v3343_v43 = vpack.c.bf16 %v2019_v55, %v2019_v55 }
 0x1ef   : > { %3262 = vst [vmem:[%s4844_s7 + $0x1c] sm:$0xf] %v2534_v9  ;;  %3264 = vst [vmem:[%s4844_s7 + $0x20] sm:$0x1] %v2836_v11  ;;  %v2011_v56 = vadd.f32 %v2010_v28, %v5077_v0  ;;  %v2022_v21 = vadd.f32 %v3864_v8, %v5111_v26  ;;  %v5232_v14 = vadd.f32 %v3779_v62, %v3778_v35  ;;  %v5854_v2 = vunpack.c.h.bf16 %v5185_v10  ;;  %v3270_v9 = vld [vmem:[%s4844_s7 + $0x30] sm:$0xf] }
 0x1f0   : > { %v2517_v42 = vsel %vm5203_vm10, %v2509_v32, %v2516_v22  ;;  %v2829_v16 = vsel %vm4847_vm4, %v2518_v41, %v3258_v53  ;;  %v2014_v15 = vadd.f32 %v2013_v49, %v5087_v5  ;;  %v2554_v52 = vshrl.u32 %v3343_v43, 16  ;;  %v3273_v49 = vld [vmem:[%s4844_s7 + $0x38] sm:$0x1] }
 0x1f1   : > { %v2171_v19 = vadd.f32 %v2170_v50, %v5854_v2  ;;  %v3781_v25 = vpop.f32.mrb[120].mxu1  ;;  %3257 = vst [vmem:[%s4844_s7 + $0x10] sm:$0xf] %v2517_v42  ;;  %3259 = vst [vmem:[%s4844_s7 + $0x14] sm:$0x1] %v2829_v16  ;;  %v2557_v0 = vshll.u32 %v3343_v43, 16  ;;  %v3341_v28 = vpack.c.bf16 %v2011_v56, %v2011_v56  ;;  %v5243_v26 = vpack.c.bf16 %v2022_v21, %v2019_v55 }
 0x1f2   : > { %v3867_v35 = vpop.f32.mrb[120].mxu0  ;;  %v3782_v8 = vpop.f32.mrb[121].mxu1  ;;  %v3344_v32 = vpack.c.bf16 %v2022_v21, %v2022_v21  ;;  %v5245_v62 = vpack.c.bf16 %v2014_v15, %v2011_v56  ;;  %v3342_v53 = vpack.c.bf16 %v2014_v15, %v2014_v15  ;;  %v2556_v37 = vrot.slane %v2554_v52, 7  ;;  %v3265_v15 = vld [vmem:[%s4844_s7 + $0x24] sm:$0xf] }
 0x1f3   : > { %5855 = vst [vmem:[#allocation6_spill] sm:$0xff] %v5243_v26  ;;  %v5248_v5 = vadd.f32 %v3867_v35, %v5137_v51  ;;  %v2026_v31 = vpop.f32.mrb[121].mxu0  ;;  %v3784_v50 = vpop.f32.mrb[122].mxu1  ;;  %v2537_v36 = vshrl.u32 %v3341_v28, 16  ;;  %v2540_v1 = vshll.u32 %v3341_v28, 16 }
 0x1f4   : > { %5856 = vst [vmem:[#allocation7_spill] sm:$0xff] %v5245_v62  ;;  %v3868_v23 = vpop.f32.mrb[122].mxu0  ;;  %v3785_v55 = vpop.f32.mrb[123].mxu1  ;;  %v2562_v22 = vshrl.u32 %v3344_v32, 16  ;;  %v2565_v41 = vshll.u32 %v3344_v32, 16  ;;  %v5824_v43 = vunpack.c.l.bf16 %v5245_v62  ;;  %v2559_v56 = vor.u32 %v2557_v0, %v2556_v37 }
 0x1f5   : > { %v2029_v51 = vpop.f32.mrb[123].mxu0  ;;  %v2560_v21 = vrot.slane %v2556_v37, 4  ;;  %v2539_v42 = vrot.slane %v2537_v36, 7  ;;  %v5827_v16 = vunpack.c.h.bf16 %v5245_v62  ;;  %v2545_v28 = vshrl.u32 %v3342_v53, 16 }
 0x1f6   : > { %v2564_v2 = vrot.slane %v2562_v22, 7  ;;  %v2172_v52 = vadd.f32 %v2171_v19, %v5824_v43  ;;  %v2548_v35 = vshll.u32 %v3342_v53, 16  ;;  %v2846_v59 = vsel %vm5194_vm9, %v2559_v56, %v3270_v9 }
 0x1f7   : > { %v2542_v32 = vor.u32 %v2540_v1, %v2539_v42  ;;  %v2543_v11 = vrot.slane %v2539_v42, 4  ;;  %v3347_v0 = vpack.c.bf16 %v5248_v5, %v5248_v5  ;;  %3271 = vst [vmem:[%s4844_s7 + $0x30] sm:$0xf] %v2846_v59  ;;  %v2547_v19 = vrot.slane %v2545_v28, 7 }
 0x1f8   : > { %v2567_v37 = vor.u32 %v2565_v41, %v2564_v2  ;;  %v2569_v36 = vrot.slane %v2564_v2, 4  ;;  %v2173_v22 = vadd.f32 %v2172_v52, %v5827_v16  ;;  %v5268_v42 = vadd.f32 %v3782_v8, %v3781_v25  ;;  %v3268_v16 = vld [vmem:[%s4844_s7 + $0x2c] sm:$0x1] }
 0x1f9   : > { %v3787_v53 = vpop.f32.mrb[124].mxu1  ;;  %v2839_v1 = vsel %vm5194_vm9, %v2542_v32, %v3265_v15  ;;  %v2588_v9 = vshrl.u32 %v3347_v0, 16  ;;  %v2591_v56 = vshll.u32 %v3347_v0, 16  ;;  %v3871_v43 = vpop.f32.mrb[124].mxu0  ;;  %v5857_v2 = vunpack.c.l.bf16 %v5243_v26 }
 0x1fa   : > { %v3788_v10 = vpop.f32.mrb[125].mxu1  ;;  %3266 = vst [vmem:[%s4844_s7 + $0x24] sm:$0xf] %v2839_v1  ;;  %v2568_v59 = vsel %vm5203_vm10, %v2560_v21, %v2567_v37  ;;  %v2850_v41 = vsel %vm4847_vm4, %v2569_v36, %v3273_v49  ;;  %v2550_v28 = vor.u32 %v2548_v35, %v2547_v19  ;;  %v5278_v15 = vpop.f32.mrb[125].mxu0  ;;  %v2552_v8 = vrot.slane %v2547_v19, 4 }
 0x1fb   : > { %v2174_v52 = vadd.f32 %v2173_v22, %v5857_v2  ;;  %v5280_v25 = vpop.f32.mrb[126].mxu1  ;;  %3272 = vst [vmem:[%s4844_s7 + $0x34] sm:$0xf] %v2568_v59  ;;  %3274 = vst [vmem:[%s4844_s7 + $0x38] sm:$0x1] %v2850_v41  ;;  %v5284_v32 = vrot.slane %v2588_v9, 7  ;;  %v2027_v21 = vadd.f32 %v2026_v31, %v5124_v58  ;;  %v2038_v49 = vadd.f32 %v3868_v23, %v5144_v60 }
 0x1fc   : > { %v5288_v0 = vpop.f32.mrb[126].mxu0  ;;  %v5290_v37 = vpop.f32.mrb[127].mxu1  ;;  %v2551_v35 = vsel %vm5203_vm10, %v2543_v11, %v2550_v28  ;;  %v3280_v36 = vld [vmem:[%s4844_s7 + $0x48] sm:$0xf]  ;;  %v5295_v22 = vadd.f32 %v3785_v55, %v3784_v50  ;;  %v2030_v1 = vadd.f32 %v2029_v51, %v5131_v13  ;;  %v5858_v19 = vunpack.c.h.bf16 %v5243_v26 }
 0x1fd   : > { %v5300_v59 = vpop.f32.mrb[127].mxu0  ;;  %3267 = vst [vmem:[%s4844_s7 + $0x28] sm:$0xf] %v2551_v35  ;;  %v2843_v58 = vsel %vm4847_vm4, %v2552_v8, %v3268_v16  ;;  %v2593_v60 = vor.u32 %v2591_v56, %v5284_v32  ;;  %v2594_v31 = vrot.slane %v5284_v32, 4  ;;  %v3345_v23 = vpack.c.bf16 %v2027_v21, %v2027_v21 }
 0x1fe   : > { %v2175_v9 = vadd.f32 %v2174_v52, %v5858_v19  ;;  %3269 = vst [vmem:[%s4844_s7 + $0x2c] sm:$0x1] %v2843_v58  ;;  %v5309_v50 = vpack.c.bf16 %v2038_v49, %v5248_v5  ;;  %v3348_v13 = vpack.c.bf16 %v2038_v49, %v2038_v49  ;;  %v5311_v55 = vpack.c.bf16 %v2030_v1, %v2027_v21  ;;  %v3283_v52 = vld [vmem:[%s4844_s7 + $0x50] sm:$0x1] }
 0x1ff   : > { %v3346_v11 = vpack.c.bf16 %v2030_v1, %v2030_v1  ;;  %v2860_v51 = vsel %vm5194_vm9, %v2593_v60, %v3280_v36  ;;  %v2571_v41 = vshrl.u32 %v3345_v23, 16  ;;  %v2574_v2 = vshll.u32 %v3345_v23, 16 }
 0x200   : > { %5859 = vst [vmem:[#allocation8_spill] sm:$0xff] %v5309_v50  ;;  %v2051_v16 = vadd.f32 %v3871_v43, %v5165_v12  ;;  %3281 = vst [vmem:[%s4844_s7 + $0x48] sm:$0xf] %v2860_v51  ;;  %v2596_v28 = vshrl.u32 %v3348_v13, 16  ;;  %v2599_v5 = vshll.u32 %v3348_v13, 16  ;;  %v5834_v21 = vunpack.c.l.bf16 %v5311_v55 }
 0x201   : > { %v5319_v8 = vpop.f32.mrb[128].mxu1  ;;  %v2573_v32 = vrot.slane %v2571_v41, 7  ;;  %v2579_v35 = vshrl.u32 %v3346_v11, 16  ;;  %v5323_v36 = vpop.f32.mrb[128].mxu0  ;;  %v3275_v12 = vld [vmem:[%s4844_s7 + $0x3c] sm:$0xf]  ;;  %v5328_v60 = vadd.f32 %v3788_v10, %v3787_v53  ;;  %v2043_v30 = vadd.f32 %v5278_v15, %v5153_v18 }
 0x202   : > { %v5325_v1 = vpop.f32.mrb[129].mxu1  ;;  %v2598_v43 = vrot.slane %v2596_v28, 7  ;;  %v2582_v19 = vshll.u32 %v3346_v11, 16  ;;  %v3351_v58 = vpack.c.bf16 %v2051_v16, %v2051_v16  ;;  %v5330_v23 = vpop.f32.mrb[129].mxu0  ;;  %v2176_v56 = vadd.f32 %v2175_v9, %v5834_v21  ;;  %v3278_v53 = vld [vmem:[%s4844_s7 + $0x44] sm:$0x1] }
 0x203   : > { %v5332_v13 = vpop.f32.mrb[130].mxu1  ;;  %v2576_v51 = vor.u32 %v2574_v2, %v2573_v32  ;;  %v2577_v41 = vrot.slane %v2573_v32, 4  ;;  %v2581_v49 = vrot.slane %v2579_v35, 7  ;;  %v5337_v26 = vpop.f32.mrb[130].mxu0  ;;  %v5860_v9 = vunpack.c.h.bf16 %v5311_v55 }
 0x204   : > { %v5339_v62 = vpop.f32.mrb[131].mxu1  ;;  %v2601_v11 = vor.u32 %v2599_v5, %v2598_v43  ;;  %v2603_v10 = vrot.slane %v2598_v43, 4  ;;  %v2622_v28 = vshrl.u32 %v3351_v58, 16  ;;  %v2625_v39 = vshll.u32 %v3351_v58, 16  ;;  %v5342_v2 = vpop.f32.mrb[131].mxu0 }
 0x205   : > { %v2853_v32 = vsel %vm5194_vm9, %v2576_v51, %v3275_v12  ;;  %v2177_v35 = vadd.f32 %v2176_v56, %v5860_v9  ;;  %v2584_v21 = vor.u32 %v2582_v19, %v2581_v49  ;;  %v2586_v40 = vrot.slane %v2581_v49, 4  ;;  %v3290_v19 = vld [vmem:[%s4844_s7 + $0x60] sm:$0xf] }
 0x206   : > { %3276 = vst [vmem:[%s4844_s7 + $0x3c] sm:$0xf] %v2853_v32  ;;  %v2602_v5 = vsel %vm5203_vm10, %v2594_v31, %v2601_v11  ;;  %v2864_v43 = vsel %vm4847_vm4, %v2603_v10, %v3283_v52  ;;  %v2624_v58 = vrot.slane %v2622_v28, 7  ;;  %v5861_v12 = vunpack.c.l.bf16 %v5309_v50 }
 0x207   : > { %3282 = vst [vmem:[%s4844_s7 + $0x4c] sm:$0xf] %v2602_v5  ;;  %3284 = vst [vmem:[%s4844_s7 + $0x50] sm:$0x1] %v2864_v43  ;;  %v2585_v56 = vsel %vm5203_vm10, %v2577_v41, %v2584_v21  ;;  %v2857_v49 = vsel %vm4847_vm4, %v2586_v40, %v3278_v53  ;;  %v2054_v31 = vadd.f32 %v5288_v0, %v5171_v44  ;;  %v5862_v44 = vunpack.c.h.bf16 %v5309_v50 }
 0x208   : > { %v2178_v51 = vadd.f32 %v2177_v35, %v5861_v12  ;;  %3277 = vst [vmem:[%s4844_s7 + $0x40] sm:$0xf] %v2585_v56  ;;  %3279 = vst [vmem:[%s4844_s7 + $0x44] sm:$0x1] %v2857_v49  ;;  %v2627_v52 = vor.u32 %v2625_v39, %v2624_v58  ;;  %v2628_v11 = vrot.slane %v2624_v58, 4  ;;  %v3349_v18 = vpack.c.bf16 %v2043_v30, %v2043_v30 }
 0x209   : > { %v5370_v15 = vadd.f32 %v5290_v37, %v5280_v25  ;;  %v5372_v10 = vpop.f32.mrb[132].mxu1  ;;  %v5374_v21 = vpack.c.bf16 %v2054_v31, %v2051_v16  ;;  %v3352_v41 = vpack.c.bf16 %v2054_v31, %v2054_v31  ;;  %v2046_v40 = vadd.f32 %v5300_v59, %v5159_v63  ;;  %v5380_v53 = vpop.f32.mrb[132].mxu0  ;;  %v3285_v49 = vld [vmem:[%s4844_s7 + $0x54] sm:$0xf] }
 0x20a   : > { %v2179_v0 = vadd.f32 %v2178_v51, %v5862_v44  ;;  %v5382_v39 = vpop.f32.mrb[133].mxu1  ;;  %v2874_v28 = vsel %vm5194_vm9, %v2627_v52, %v3290_v19  ;;  %v2605_v25 = vshrl.u32 %v3349_v18, 16  ;;  %v2608_v37 = vshll.u32 %v3349_v18, 16  ;;  %v5388_v32 = vpop.f32.mrb[133].mxu0 }
 0x20b   : > { %v1906_v16 = vadd.f32 %v5221_v46, %v5061_v48  ;;  %v5390_v9 = vpop.f32.mrb[134].mxu1  ;;  %3291 = vst [vmem:[%s4844_s7 + $0x60] sm:$0xf] %v2874_v28  ;;  %v5841_v63 = vunpack.c.l.bf16 %v5374_v21  ;;  %v2630_v35 = vshrl.u32 %v3352_v41, 16  ;;  %v2633_v5 = vshll.u32 %v3352_v41, 16  ;;  %v5395_v43 = vpop.f32.mrb[134].mxu0 }
 0x20c   : > { %v5397_v58 = vpop.f32.mrb[135].mxu1  ;;  %v2607_v12 = vrot.slane %v2605_v25, 7  ;;  %v5399_v51 = vpack.c.bf16 %v2046_v40, %v2043_v30  ;;  %v3350_v48 = vpack.c.bf16 %v2046_v40, %v2046_v40  ;;  %v5402_v56 = vpop.f32.mrb[135].mxu0  ;;  %v5407_v31 = vadd.f32 %v5325_v1, %v5319_v8  ;;  %v3293_v40 = vld [vmem:[%s4844_s7 + $0x68] sm:$0x1] }
 0x20d   : > { %v2067_v46 = vadd.f32 %v5323_v36, %v1906_v16  ;;  %v2632_v19 = vrot.slane %v2630_v35, 7  ;;  %v5411_v52 = vadd.f32 %v5330_v23, %v5182_v47  ;;  %v1909_v30 = vadd.f32 %v5232_v14, %v5073_v17 }
 0x20e   : > { %5863 = vst [vmem:[#allocation9_spill] sm:$0xff] %v5399_v51  ;;  %v2610_v18 = vor.u32 %v2608_v37, %v2607_v12  ;;  %v2611_v41 = vrot.slane %v2607_v12, 4  ;;  %v5835_v36 = vunpack.c.l.bf16 %v5399_v51  ;;  %v5836_v44 = vunpack.c.h.bf16 %v5399_v51  ;;  %v3288_v12 = vld [vmem:[%s4844_s7 + $0x5c] sm:$0x1] }
 0x20f   : > { %v2635_v28 = vor.u32 %v2633_v5, %v2632_v19  ;;  %v2637_v25 = vrot.slane %v2632_v19, 4  ;;  %v2613_v8 = vshrl.u32 %v3350_v48, 16  ;;  %v2616_v1 = vshll.u32 %v3350_v48, 16 }
 0x210   : > { %v2867_v47 = vsel %vm5194_vm9, %v2610_v18, %v3285_v49  ;;  %v2180_v17 = vadd.f32 %v2179_v0, %v5835_v36  ;;  %v3355_v14 = vpack.c.bf16 %v2067_v46, %v2067_v46  ;;  %v3353_v23 = vpack.c.bf16 %v5411_v52, %v5411_v52 }
 0x211   : > { %v5424_v37 = vpop.f32.mrb[136].mxu1  ;;  %3286 = vst [vmem:[%s4844_s7 + $0x54] sm:$0xf] %v2867_v47  ;;  %v2636_v16 = vsel %vm5203_vm10, %v2628_v11, %v2635_v28  ;;  %v2878_v35 = vsel %vm4847_vm4, %v2637_v25, %v3293_v40  ;;  %v2615_v5 = vrot.slane %v2613_v8, 7  ;;  %v2070_v48 = vadd.f32 %v5337_v26, %v1909_v30  ;;  %v5433_v49 = vpop.f32.mrb[136].mxu0 }
 0x212   : > { %v5435_v0 = vpop.f32.mrb[137].mxu1  ;;  %3292 = vst [vmem:[%s4844_s7 + $0x64] sm:$0xf] %v2636_v16  ;;  %3294 = vst [vmem:[%s4844_s7 + $0x68] sm:$0x1] %v2878_v35  ;;  %v2181_v19 = vadd.f32 %v2180_v17, %v5836_v44  ;;  %v2656_v18 = vshrl.u32 %v3355_v14, 16 }
 0x213   : > { %v2659_v47 = vshll.u32 %v3355_v14, 16  ;;  %v2639_v36 = vshrl.u32 %v3353_v23, 16  ;;  %v5441_v11 = vpop.f32.mrb[137].mxu0  ;;  %v5443_v40 = vpop.f32.mrb[138].mxu1  ;;  %v2618_v28 = vor.u32 %v2616_v1, %v2615_v5  ;;  %v2620_v26 = vrot.slane %v2615_v5, 4 }
 0x214   : > { %v2642_v30 = vshll.u32 %v3353_v23, 16  ;;  %v5445_v25 = vpack.c.bf16 %v2070_v48, %v2067_v46  ;;  %v5447_v8 = vpop.f32.mrb[138].mxu0  ;;  %v5449_v16 = vpop.f32.mrb[139].mxu1  ;;  %v2182_v17 = vadd.f32 %v2181_v19, %v5841_v63  ;;  %v2658_v14 = vrot.slane %v2656_v18, 7  ;;  %v3300_v23 = vld [vmem:[%s4844_s7 + $0x78] sm:$0xf] }
 0x215   : > { %v5453_v35 = vrot.slane %v2639_v36, 7  ;;  %v3356_v44 = vpack.c.bf16 %v2070_v48, %v2070_v48  ;;  %v5455_v59 = vpop.f32.mrb[139].mxu0  ;;  %v2619_v1 = vsel %vm5203_vm10, %v2611_v41, %v2618_v28  ;;  %v2871_v46 = vsel %vm4847_vm4, %v2620_v26, %v3288_v12  ;;  %v3295_v5 = vld [vmem:[%s4844_s7 + $0x6c] sm:$0xf]  ;;  %v3313_v63 = vld [vmem:[%s4844_s7 + $0x98] sm:$0x1] }
 0x216   : > { %v2155_v51 = vunpack.c.l.bf16 %v5445_v25  ;;  %v2156_v50 = vunpack.c.h.bf16 %v5445_v25  ;;  %3287 = vst [vmem:[%s4844_s7 + $0x58] sm:$0xf] %v2619_v1  ;;  %3289 = vst [vmem:[%s4844_s7 + $0x5c] sm:$0x1] %v2871_v46  ;;  %v2661_v36 = vor.u32 %v2659_v47, %v2658_v14  ;;  %v2662_v48 = vrot.slane %v2658_v14, 4 }
 0x217   : > { %v2644_v19 = vor.u32 %v2642_v30, %v5453_v35  ;;  %v2645_v18 = vrot.slane %v5453_v35, 4  ;;  %v2664_v41 = vshrl.u32 %v3356_v44, 16  ;;  %v2667_v28 = vshll.u32 %v3356_v44, 16 }
 0x218   : > { %v5471_v12 = vadd.f32 %v5339_v62, %v5332_v13  ;;  %v1901_v26 = vadd.f32 %v5179_v24, %v5048_v57  ;;  %v2888_v1 = vsel %vm5194_vm9, %v2661_v36, %v3300_v23  ;;  %v5864_v30 = vunpack.c.h.bf16 %v5374_v21 }
 0x219   : > { %v2881_v47 = vsel %vm5194_vm9, %v2644_v19, %v3295_v5  ;;  %v1922_v44 = vadd.f32 %v5328_v60, %v5108_v6  ;;  %v5483_v46 = vpop.f32.mrb[140].mxu1  ;;  %3301 = vst [vmem:[%s4844_s7 + $0x78] sm:$0xf] %v2888_v1  ;;  %v2666_v62 = vrot.slane %v2664_v41, 7  ;;  %v5490_v57 = vadd.f32 %v5382_v39, %v5372_v10  ;;  %v5494_v23 = vpop.f32.mrb[140].mxu0 }
 0x21a   : > { %v2183_v14 = vadd.f32 %v2182_v17, %v5864_v30  ;;  %3296 = vst [vmem:[%s4844_s7 + $0x6c] sm:$0xf] %v2881_v47  ;;  %v2062_v13 = vadd.f32 %v5342_v2, %v1901_v26  ;;  %v1914_v24 = vadd.f32 %v5268_v42, %v5081_v7  ;;  %v5496_v17 = vpop.f32.mrb[141].mxu1  ;;  %v3303_v5 = vld [vmem:[%s4844_s7 + $0x80] sm:$0x1]  ;;  %v1925_v60 = vadd.f32 %v5370_v15, %v5114_v33  ;;  %v5508_v39 = vpop.f32.mrb[141].mxu0 }
 0x21b   : > { %v2083_v6 = vadd.f32 %v5380_v53, %v1922_v44  ;;  %v5504_v2 = vadd.f32 %v5397_v58, %v5390_v9  ;;  %v1917_v10 = vadd.f32 %v5295_v22, %v5093_v29  ;;  %v5510_v7 = vpop.f32.mrb[142].mxu1  ;;  %v2669_v42 = vor.u32 %v2667_v28, %v2666_v62  ;;  %v5515_v33 = vpop.f32.mrb[142].mxu0 }
 0x21c   : > { %v2671_v36 = vrot.slane %v2666_v62, 4  ;;  %v5513_v53 = vpack.c.bf16 %v2062_v13, %v5411_v52  ;;  %v3354_v19 = vpack.c.bf16 %v2062_v13, %v2062_v13  ;;  %v5517_v15 = vpop.f32.mrb[143].mxu1  ;;  %v2075_v58 = vadd.f32 %v5388_v32, %v1914_v24  ;;  %v5522_v41 = vpop.f32.mrb[143].mxu0 }
 0x21d   : > { %v3359_v9 = vpack.c.bf16 %v2083_v6, %v2083_v6  ;;  %v2086_v29 = vadd.f32 %v5395_v43, %v1925_v60  ;;  %v2078_v22 = vadd.f32 %v5402_v56, %v1917_v10  ;;  %v2670_v28 = vsel %vm5203_vm10, %v2662_v48, %v2669_v42  ;;  %v3298_v42 = vld [vmem:[%s4844_s7 + $0x74] sm:$0x1] }
 0x21e   : > { %v2892_v52 = vsel %vm4847_vm4, %v2671_v36, %v3303_v5  ;;  %v2153_v26 = vunpack.c.l.bf16 %v5513_v53  ;;  %v2154_v1 = vunpack.c.h.bf16 %v5513_v53  ;;  %3302 = vst [vmem:[%s4844_s7 + $0x7c] sm:$0xf] %v2670_v28  ;;  %v2647_v32 = vshrl.u32 %v3354_v19, 16  ;;  %v3310_v36 = vld [vmem:[%s4844_s7 + $0x90] sm:$0xf] }
 0x21f   : > { %3304 = vst [vmem:[%s4844_s7 + $0x80] sm:$0x1] %v2892_v52  ;;  %v2650_v43 = vshll.u32 %v3354_v19, 16  ;;  %v2690_v47 = vshrl.u32 %v3359_v9, 16  ;;  %v2693_v56 = vshll.u32 %v3359_v9, 16  ;;  %v3357_v44 = vpack.c.bf16 %v2075_v58, %v2075_v58 }
 0x220   : > { %v2184_v30 = vadd.f32 %v2183_v14, %v2153_v26  ;;  %v5534_v48 = vpack.c.bf16 %v2086_v29, %v2083_v6  ;;  %v3360_v62 = vpack.c.bf16 %v2086_v29, %v2086_v29  ;;  %v2649_v13 = vrot.slane %v2647_v32, 7 }
 0x221   : > { %v2692_v24 = vrot.slane %v2690_v47, 7  ;;  %v5536_v5 = vpack.c.bf16 %v2078_v22, %v2075_v58  ;;  %v3358_v60 = vpack.c.bf16 %v2078_v22, %v2078_v22  ;;  %v2673_v19 = vshrl.u32 %v3357_v44, 16 }
 0x222   : > { %v2185_v10 = vadd.f32 %v2184_v30, %v2154_v1  ;;  %v2676_v9 = vshll.u32 %v3357_v44, 16  ;;  %v2159_v14 = vunpack.c.l.bf16 %v5534_v48  ;;  %v2652_v6 = vor.u32 %v2650_v43, %v2649_v13 }
 0x223   : > { %v2654_v29 = vrot.slane %v2649_v13, 4  ;;  %v2695_v28 = vor.u32 %v2693_v56, %v2692_v24  ;;  %v2696_v52 = vrot.slane %v2692_v24, 4  ;;  %v2675_v22 = vrot.slane %v2673_v19, 7  ;;  %v3305_v56 = vld [vmem:[%s4844_s7 + $0x84] sm:$0xf] }
 0x224   : > { %v2186_v58 = vadd.f32 %v2185_v10, %v2155_v51  ;;  %v2160_v32 = vunpack.c.h.bf16 %v5534_v48  ;;  %v2698_v47 = vshrl.u32 %v3360_v62, 16  ;;  %v2653_v30 = vsel %vm5203_vm10, %v2645_v18, %v2652_v6 }
 0x225   : > { %v2885_v44 = vsel %vm4847_vm4, %v2654_v29, %v3298_v42  ;;  %v2902_v43 = vsel %vm5194_vm9, %v2695_v28, %v3310_v36  ;;  %v2701_v13 = vshll.u32 %v3360_v62, 16  ;;  %3297 = vst [vmem:[%s4844_s7 + $0x70] sm:$0xf] %v2653_v30  ;;  %v2678_v24 = vor.u32 %v2676_v9, %v2675_v22 }
 0x226   : > { %3299 = vst [vmem:[%s4844_s7 + $0x74] sm:$0x1] %v2885_v44  ;;  %3311 = vst [vmem:[%s4844_s7 + $0x90] sm:$0xf] %v2902_v43  ;;  %v2679_v10 = vrot.slane %v2675_v22, 4  ;;  %v2700_v19 = vrot.slane %v2698_v47, 7  ;;  %v2157_v35 = vunpack.c.l.bf16 %v5536_v5  ;;  %v2158_v18 = vunpack.c.h.bf16 %v5536_v5 }
 0x227   : > { %v2187_v42 = vadd.f32 %v2186_v58, %v2156_v50  ;;  %v2681_v6 = vshrl.u32 %v3358_v60, 16  ;;  %v2684_v36 = vshll.u32 %v3358_v60, 16  ;;  %v2895_v62 = vsel %vm5194_vm9, %v2678_v24, %v3305_v56  ;;  %v3308_v43 = vld [vmem:[%s4844_s7 + $0x8c] sm:$0x1] }
 0x228   : > { %v2703_v29 = vor.u32 %v2701_v13, %v2700_v19  ;;  %v2705_v9 = vrot.slane %v2700_v19, 4  ;;  %v1938_v28 = vadd.f32 %v5490_v57, %v5140_v45  ;;  %3306 = vst [vmem:[%s4844_s7 + $0x84] sm:$0xf] %v2895_v62  ;;  %v3807_v58 = vadd.f32 %v5435_v0, %v5424_v37  ;;  %v3320_v62 = vld [vmem:[%s4844_s7 + $0xa8] sm:$0xf] }
 0x229   : > { %v2188_v22 = vadd.f32 %v2187_v42, %v2157_v35  ;;  %v2683_v47 = vrot.slane %v2681_v6, 7  ;;  %v1930_v60 = vadd.f32 %v5407_v31, %v5128_v20  ;;  %v1941_v57 = vadd.f32 %v5504_v2, %v5149_v27 }
 0x22a   : > { %v2704_v30 = vsel %vm5203_vm10, %v2696_v52, %v2703_v29  ;;  %v2906_v44 = vsel %vm4847_vm4, %v2705_v9, %v3313_v63  ;;  %v2099_v45 = vadd.f32 %v5433_v49, %v1938_v28  ;;  %v3810_v49 = vadd.f32 %v5449_v16, %v5443_v40 }
 0x22b   : > { %3312 = vst [vmem:[%s4844_s7 + $0x94] sm:$0xf] %v2704_v30  ;;  %3314 = vst [vmem:[%s4844_s7 + $0x98] sm:$0x1] %v2906_v44  ;;  %v2189_v37 = vadd.f32 %v2188_v22, %v2158_v18  ;;  %v2686_v20 = vor.u32 %v2684_v36, %v2683_v47  ;;  %v2688_v31 = vrot.slane %v2683_v47, 4  ;;  %v2091_v0 = vadd.f32 %v5441_v11, %v1930_v60 }
 0x22c   : > { %v3363_v52 = vpack.c.bf16 %v2099_v45, %v2099_v45  ;;  %v2102_v63 = vadd.f32 %v5447_v8, %v1941_v57  ;;  %v1933_v56 = vadd.f32 %v5471_v12, %v5134_v54  ;;  %v3315_v30 = vld [vmem:[%s4844_s7 + $0x9c] sm:$0xf]  ;;  %v3813_v44 = vadd.f32 %v5496_v17, %v5483_v46  ;;  %v3323_v57 = vld [vmem:[%s4844_s7 + $0xb0] sm:$0x1] }
 0x22d   : > { %v2190_v27 = vadd.f32 %v2189_v37, %v2159_v14  ;;  %v2687_v2 = vsel %vm5203_vm10, %v2679_v10, %v2686_v20  ;;  %v2899_v13 = vsel %vm4847_vm4, %v2688_v31, %v3308_v43  ;;  %v3361_v11 = vpack.c.bf16 %v2091_v0, %v2091_v0 }
 0x22e   : > { %3307 = vst [vmem:[%s4844_s7 + $0x88] sm:$0xf] %v2687_v2  ;;  %3309 = vst [vmem:[%s4844_s7 + $0x8c] sm:$0x1] %v2899_v13  ;;  %v2724_v8 = vshrl.u32 %v3363_v52, 16  ;;  %v5600_v24 = vpack.c.bf16 %v2102_v63, %v2099_v45  ;;  %v3364_v40 = vpack.c.bf16 %v2102_v63, %v2102_v63  ;;  %v2727_v16 = vshll.u32 %v3363_v52, 16 }
 0x22f   : > { %v2707_v54 = vshrl.u32 %v3361_v11, 16  ;;  %v2094_v12 = vadd.f32 %v5455_v59, %v1933_v56  ;;  %v2191_v19 = vadd.f32 %v2190_v27, %v2160_v32  ;;  %v2710_v42 = vshll.u32 %v3361_v11, 16 }
 0x230   : > { %v2726_v10 = vrot.slane %v2724_v8, 7  ;;  %v2163_v6 = vunpack.c.l.bf16 %v5600_v24  ;;  %v2732_v36 = vshrl.u32 %v3364_v40, 16  ;;  %v2735_v9 = vshll.u32 %v3364_v40, 16 }
 0x231   : > { %v2709_v29 = vrot.slane %v2707_v54, 7  ;;  %v5607_v28 = vpack.c.bf16 %v2094_v12, %v2091_v0  ;;  %v3362_v22 = vpack.c.bf16 %v2094_v12, %v2094_v12  ;;  %v1954_v27 = vadd.f32 %v3813_v44, %v5168_v4  ;;  %v3318_v4 = vld [vmem:[%s4844_s7 + $0xa4] sm:$0x1] }
 0x232   : > { %v2729_v47 = vor.u32 %v2727_v16, %v2726_v10  ;;  %v2730_v60 = vrot.slane %v2726_v10, 4  ;;  %v2734_v59 = vrot.slane %v2732_v36, 7  ;;  %v1946_v8 = vadd.f32 %v3807_v58, %v5156_v61  ;;  %v5865_v12 = vld [vmem:[#allocation2_spill] sm:$0xff] }
 0x233   : > { %v2712_v43 = vor.u32 %v2710_v42, %v2709_v29  ;;  %v2713_v45 = vrot.slane %v2709_v29, 4  ;;  %v2161_v37 = vunpack.c.l.bf16 %v5607_v28  ;;  %v2162_v20 = vunpack.c.h.bf16 %v5607_v28 }
 0x234   : > { %v2916_v31 = vsel %vm5194_vm9, %v2729_v47, %v3320_v62  ;;  %v2737_v0 = vor.u32 %v2735_v9, %v2734_v59  ;;  %v2739_v52 = vrot.slane %v2734_v59, 4  ;;  %v2715_v63 = vshrl.u32 %v3362_v22, 16  ;;  %v5866_v62 = vld [vmem:[#allocation3_spill] sm:$0xff] }
 0x235   : > { %3321 = vst [vmem:[%s4844_s7 + $0xa8] sm:$0xf] %v2916_v31  ;;  %v2909_v46 = vsel %vm5194_vm9, %v2712_v43, %v3315_v30  ;;  %v2192_v17 = vadd.f32 %v2191_v19, %v2161_v37  ;;  %v2718_v56 = vshll.u32 %v3362_v22, 16  ;;  %v2115_v16 = vadd.f32 %v5494_v23, %v1954_v27 }
 0x236   : > { %3316 = vst [vmem:[%s4844_s7 + $0x9c] sm:$0xf] %v2909_v46  ;;  %v2738_v2 = vsel %vm5203_vm10, %v2730_v60, %v2737_v0  ;;  %v2920_v13 = vsel %vm4847_vm4, %v2739_v52, %v3323_v57  ;;  %v2717_v11 = vrot.slane %v2715_v63, 7  ;;  %v3816_v54 = vadd.f32 %v5517_v15, %v5510_v7  ;;  %v3330_v0 = vld [vmem:[%s4844_s7 + $0xc0] sm:$0xf] }
 0x237   : > { %3322 = vst [vmem:[%s4844_s7 + $0xac] sm:$0xf] %v2738_v2  ;;  %3324 = vst [vmem:[%s4844_s7 + $0xb0] sm:$0x1] %v2920_v13  ;;  %v2193_v40 = vadd.f32 %v2192_v17, %v2162_v20  ;;  %v1949_v19 = vadd.f32 %v3810_v49, %v5865_v12  ;;  %v2107_v10 = vadd.f32 %v5508_v39, %v1946_v8  ;;  %v4036_v9 = vmov 0  }
 0x238   : > { %v2720_v61 = vor.u32 %v2718_v56, %v2717_v11  ;;  %v2722_v58 = vrot.slane %v2717_v11, 4  ;;  %v3367_v36 = vpack.c.bf16 %v2115_v16, %v2115_v16  ;;  %v1957_v29 = vadd.f32 %v3816_v54, %v5866_v62  ;;  %2311 = vst [vmem:[%s4844_s7] sm:$0xf] %v4036_v9  ;;  %2312 = vst [vmem:[%s4844_s7 + $0x4] sm:$0xf] %v4036_v9  ;;  %v3325_v17 = vld [vmem:[%s4844_s7 + $0xb4] sm:$0xf] }
 0x239   : > { %v2194_v42 = vadd.f32 %v2193_v40, %v2163_v6  ;;  %v2110_v23 = vadd.f32 %v5522_v41, %v1949_v19  ;;  %2313 = vst [vmem:[%s4844_s7 + $0x8] sm:$0x1] %v4036_v9  ;;  %3156 = vst [vmem:[%s4844_s7 + $0xcc] sm:$0xf] %v4036_v9  ;;  %v2164_v7 = vunpack.c.h.bf16 %v5600_v24  ;;  %v3365_v49 = vpack.c.bf16 %v2107_v10, %v2107_v10  ;;  %v3328_v19 = vld [vmem:[%s4844_s7 + $0xbc] sm:$0x1] }
 0x23a   : > { %3157 = vst [vmem:[%s4844_s7 + $0xd0] sm:$0xf] %v4036_v9  ;;  %3158 = vst [vmem:[%s4844_s7 + $0xd4] sm:$0x1] %v4036_v9  ;;  %v2721_v39 = vsel %vm5203_vm10, %v2713_v45, %v2720_v61  ;;  %v2913_v15 = vsel %vm4847_vm4, %v2722_v58, %v3318_v4  ;;  %v2758_v41 = vshrl.u32 %v3367_v36, 16  ;;  %v2118_v22 = vadd.f32 %v5515_v33, %v1957_v29 }
 0x23b   : > { %3317 = vst [vmem:[%s4844_s7 + $0xa0] sm:$0xf] %v2721_v39  ;;  %3319 = vst [vmem:[%s4844_s7 + $0xa4] sm:$0x1] %v2913_v15  ;;  %v5657_v47 = vpack.c.bf16 %v2110_v23, %v2107_v10  ;;  %v2761_v60 = vshll.u32 %v3367_v36, 16  ;;  %v2741_v30 = vshrl.u32 %v3365_v49, 16  ;;  %v2195_v59 = vadd.f32 %v2194_v42, %v2164_v7 }
 0x23c   : > { %v3366_v44 = vpack.c.bf16 %v2110_v23, %v2110_v23  ;;  %v2760_v43 = vrot.slane %v2758_v41, 7  ;;  %v5661_v45 = vpack.c.bf16 %v2118_v22, %v2115_v16  ;;  %v3368_v57 = vpack.c.bf16 %v2118_v22, %v2118_v22  ;;  %v3333_v58 = vld [vmem:[%s4844_s7 + $0xc8] sm:$0x1] }
 0x23d   : > { %v2165_v31 = vunpack.c.l.bf16 %v5657_v47  ;;  %v2743_v52 = vrot.slane %v2741_v30, 7  ;;  %v2744_v63 = vshll.u32 %v3365_v49, 16  ;;  %v2166_v2 = vunpack.c.h.bf16 %v5657_v47 }
 0x23e   : > { %v2749_v33 = vshrl.u32 %v3366_v44, 16  ;;  %v2763_v46 = vor.u32 %v2761_v60, %v2760_v43  ;;  %v2766_v27 = vshrl.u32 %v3368_v57, 16  ;;  %v2752_v13 = vshll.u32 %v3366_v44, 16 }
 0x23f   : > { %v2746_v56 = vor.u32 %v2744_v63, %v2743_v52  ;;  %v2167_v8 = vunpack.c.l.bf16 %v5661_v45  ;;  %v2196_v40 = vadd.f32 %v2195_v59, %v2165_v31  ;;  %v2769_v12 = vshll.u32 %v3368_v57, 16 }
 0x240   : > { %v2930_v11 = vsel %vm5194_vm9, %v2763_v46, %v3330_v0  ;;  %v2751_v4 = vrot.slane %v2749_v33, 7  ;;  %v2768_v54 = vrot.slane %v2766_v27, 7  ;;  %v2747_v61 = vrot.slane %v2743_v52, 4 }
 0x241   : > { %3331 = vst [vmem:[%s4844_s7 + $0xc0] sm:$0xf] %v2930_v11  ;;  %v2923_v16 = vsel %vm5194_vm9, %v2746_v56, %v3325_v17  ;;  %v2197_v10 = vadd.f32 %v2196_v40, %v2166_v2  ;;  %v2764_v62 = vrot.slane %v2760_v43, 4  ;;  %v2168_v9 = vunpack.c.h.bf16 %v5661_v45  ;;  %v5873_v56 = vld [vmem:[#allocation7_spill] sm:$0xff] }
 0x242   : > { %3326 = vst [vmem:[%s4844_s7 + $0xb4] sm:$0xf] %v2923_v16  ;;  %v2754_v42 = vor.u32 %v2752_v13, %v2751_v4  ;;  %v2756_v36 = vrot.slane %v2751_v4, 4  ;;  %v2771_v29 = vor.u32 %v2769_v12, %v2768_v54  ;;  %v2773_v23 = vrot.slane %v2768_v54, 4  ;;  %v5876_v54 = vld [vmem:[#allocation6_spill] sm:$0xff] }
 0x243   : > { %v2198_v3 = vadd.f32 %v2197_v10, %v2167_v8  ;;  %v5874_v27 = vunpack.c.l.bf16 %v5873_v56  ;;  %v5877_v12 = vunpack.c.l.bf16 %v5876_v54  ;;  %v5878_v10 = vunpack.c.h.bf16 %v5876_v54 }
 0x244   : > { %v2755_v39 = vsel %vm5203_vm10, %v2747_v61, %v2754_v42  ;;  %v2927_v15 = vsel %vm4847_vm4, %v2756_v36, %v3328_v19  ;;  %v2772_v49 = vsel %vm5203_vm10, %v2764_v62, %v2771_v29  ;;  %v2934_v41 = vsel %vm4847_vm4, %v2773_v23, %v3333_v58 }
 0x245   : > { %3327 = vst [vmem:[%s4844_s7 + $0xb8] sm:$0xf] %v2755_v39  ;;  %3329 = vst [vmem:[%s4844_s7 + $0xbc] sm:$0x1] %v2927_v15  ;;  %v2199_v22 = vadd.f32 %v2198_v3, %v2168_v9  ;;  %v5879_v29 = vunpack.c.l.bf16 %v5311_v55  ;;  %v5880_v39 = vunpack.c.h.bf16 %v5311_v55 }
 0x246   : > { %3332 = vst [vmem:[%s4844_s7 + $0xc4] sm:$0xf] %v2772_v49  ;;  %3334 = vst [vmem:[%s4844_s7 + $0xc8] sm:$0x1] %v2934_v41 }
 0x247   : > { %v2200_v47 = vrot.slane %v2199_v22, 4 }
 0x249   : > { %v2201_v60 = vadd.f32 %v2200_v47, %v2199_v22  ;;  %v5881_v22 = vld [vmem:[#allocation8_spill] sm:$0xff] }
 0x24a   : > { %v5882_v47 = vunpack.c.l.bf16 %v5881_v22 }
 0x24b   : > { %v2202_v30 = vrot.slane %v2201_v60, 2 }
 0x24d   : > { %v2203_v59 = vadd.f32 %v2202_v30, %v2201_v60 }
 0x24f   : > { %v2204_v44 = vrot.slane %v2203_v59, 1 }
 0x251   : > { %v2205_v43 = vadd.f32 %v2204_v44, %v2203_v59  ;;  %v5883_v44 = vunpack.c.h.bf16 %v5881_v22 }
 0x253   : > { %v2207_v34 = vmul.f32 0.00390625, %v2205_v43 }
 0x255   : > { %2309 = vst [vmem:[%s211_s9] sm:$0x1] %v2207_v34  ;;  %v2224_v38 = vsub.f32 %v2153_v26, %v2207_v34  ;;  %v5697_v45 = vsub.f32 %v2154_v1, %v2207_v34  ;;  %v5701_v57 = vsub.f32 %v2155_v51, %v2207_v34  ;;  %v5705_v0 = vsub.f32 %v2156_v50, %v2207_v34 }
 0x256   : > { %v5709_v52 = vsub.f32 %v2157_v35, %v2207_v34  ;;  %v5713_v63 = vsub.f32 %v2158_v18, %v2207_v34  ;;  %v5717_v53 = vsub.f32 %v2159_v14, %v2207_v34  ;;  %v5721_v51 = vsub.f32 %v2160_v32, %v2207_v34  ;;  %v5867_v35 = vld [vmem:[#allocation5_spill] sm:$0xff] }
 0x257   : > { %v5725_v50 = vsub.f32 %v2161_v37, %v2207_v34  ;;  %v5729_v25 = vsub.f32 %v2162_v20, %v2207_v34  ;;  %v5733_v26 = vsub.f32 %v2163_v6, %v2207_v34  ;;  %v5737_v1 = vsub.f32 %v2164_v7, %v2207_v34  ;;  %v5870_v6 = vld [vmem:[#allocation4_spill] sm:$0xff] }
 0x258   : > { %v5739_v5 = vsub.f32 %v2165_v31, %v2207_v34  ;;  %v5741_v48 = vsub.f32 %v2166_v2, %v2207_v34  ;;  %v5743_v14 = vsub.f32 %v2167_v8, %v2207_v34  ;;  %v5745_v32 = vsub.f32 %v2168_v9, %v2207_v34 }
 0x259   : > { %v5868_v18 = vunpack.c.l.bf16 %v5867_v35  ;;  %v5869_v37 = vunpack.c.h.bf16 %v5867_v35  ;;  %v5871_v33 = vunpack.c.l.bf16 %v5870_v6  ;;  %v5872_v31 = vunpack.c.h.bf16 %v5870_v6 }
 0x25a   : > { %v2212_v2 = vsub.f32 %v5874_v27, %v2207_v34  ;;  %v5875_v8 = vunpack.c.h.bf16 %v5873_v56  ;;  %v2214_v19 = vsub.f32 %v5877_v12, %v2207_v34  ;;  %v2215_v42 = vsub.f32 %v5878_v10, %v2207_v34 }
 0x25b   : > { %v2208_v28 = vsub.f32 %v5868_v18, %v2207_v34  ;;  %v2209_v20 = vsub.f32 %v5869_v37, %v2207_v34  ;;  %v2210_v46 = vsub.f32 %v5871_v33, %v2207_v34  ;;  %v2211_v17 = vsub.f32 %v5872_v31, %v2207_v34 }
 0x25c   : > { %v2213_v40 = vsub.f32 %v5875_v8, %v2207_v34  ;;  %v2244_v61 = vmul.f32 %v2212_v2, %v2212_v2  ;;  %v2216_v23 = vsub.f32 %v5879_v29, %v2207_v34  ;;  %v2246_v9 = vmul.f32 %v2214_v19, %v2214_v19 }
 0x25d   : > { %v2240_v24 = vmul.f32 %v2208_v28, %v2208_v28  ;;  %v2241_v7 = vmul.f32 %v2209_v20, %v2209_v20  ;;  %v2242_v13 = vmul.f32 %v2210_v46, %v2210_v46  ;;  %v2243_v4 = vmul.f32 %v2211_v17, %v2211_v17  ;;  %v5884_v28 = vld [vmem:[#allocation9_spill] sm:$0xff] }
 0x25e   : > { %v2245_v36 = vmul.f32 %v2213_v40, %v2213_v40  ;;  %v2217_v15 = vsub.f32 %v5880_v39, %v2207_v34  ;;  %v2247_v49 = vmul.f32 %v2215_v42, %v2215_v42  ;;  %v2218_v60 = vsub.f32 %v5882_v47, %v2207_v34 }
 0x25f   : > { %v2272_v11 = vadd.f32 %v2241_v7, %v2240_v24  ;;  %v2248_v30 = vmul.f32 %v2216_v23, %v2216_v23  ;;  %v2219_v43 = vsub.f32 %v5883_v44, %v2207_v34  ;;  %v5885_v37 = vunpack.c.l.bf16 %v5884_v28 }
 0x260   : > { %v2249_v35 = vmul.f32 %v2217_v15, %v2217_v15  ;;  %v2250_v6 = vmul.f32 %v2218_v60, %v2218_v60  ;;  %v5886_v55 = vunpack.c.h.bf16 %v5884_v28  ;;  %v5887_v31 = vunpack.c.l.bf16 %v5374_v21 }
 0x261   : > { %v2273_v16 = vadd.f32 %v2272_v11, %v2242_v13  ;;  %v2220_v20 = vsub.f32 %v5885_v37, %v2207_v34  ;;  %v2251_v24 = vmul.f32 %v2219_v43, %v2219_v43  ;;  %v5888_v2 = vunpack.c.h.bf16 %v5374_v21 }
 0x262   : > { %v2221_v46 = vsub.f32 %v5886_v55, %v2207_v34  ;;  %v2222_v17 = vsub.f32 %v5887_v31, %v2207_v34  ;;  %v2256_v12 = vmul.f32 %v2224_v38, %v2224_v38  ;;  %v2258_v10 = vmul.f32 %v5701_v57, %v5701_v57 }
 0x263   : > { %v2274_v58 = vadd.f32 %v2273_v16, %v2243_v4  ;;  %v2252_v56 = vmul.f32 %v2220_v20, %v2220_v20  ;;  %v2223_v13 = vsub.f32 %v5888_v2, %v2207_v34  ;;  %v2259_v21 = vmul.f32 %v5705_v0, %v5705_v0 }
 0x264   : > { %v2253_v11 = vmul.f32 %v2221_v46, %v2221_v46  ;;  %v2254_v40 = vmul.f32 %v2222_v17, %v2222_v17  ;;  %v2261_v38 = vmul.f32 %v5713_v63, %v5713_v63  ;;  %v2263_v57 = vmul.f32 %v5721_v51, %v5721_v51 }
 0x265   : > { %v2275_v62 = vadd.f32 %v2274_v58, %v2244_v61  ;;  %v2255_v16 = vmul.f32 %v2223_v13, %v2223_v13  ;;  %v2257_v61 = vmul.f32 %v5697_v45, %v5697_v45  ;;  %v2262_v45 = vmul.f32 %v5717_v53, %v5717_v53 }
 0x266   : > { %v2264_v0 = vmul.f32 %v5725_v50, %v5725_v50  ;;  %v2266_v63 = vmul.f32 %v5733_v26, %v5733_v26  ;;  %v2267_v53 = vmul.f32 %v5737_v1, %v5737_v1  ;;  %v2268_v51 = vmul.f32 %v5739_v5, %v5739_v5 }
 0x267   : > { %v2276_v3 = vadd.f32 %v2275_v62, %v2245_v36  ;;  %v2260_v36 = vmul.f32 %v5709_v52, %v5709_v52  ;;  %v2265_v52 = vmul.f32 %v5729_v25, %v5729_v25  ;;  %v2269_v50 = vmul.f32 %v5741_v48, %v5741_v48 }
 0x268   : > { %v2270_v25 = vmul.f32 %v5743_v14, %v5743_v14  ;;  %v2271_v26 = vmul.f32 %v5745_v32, %v5745_v32 }
 0x269   : > { %v2277_v41 = vadd.f32 %v2276_v3, %v2246_v9 }
 0x26b   : > { %v2278_v59 = vadd.f32 %v2277_v41, %v2247_v49 }
 0x26d   : > { %v2279_v18 = vadd.f32 %v2278_v59, %v2248_v30 }
 0x26f   : > { %v2280_v33 = vadd.f32 %v2279_v18, %v2249_v35 }
 0x271   : > { %v2281_v7 = vadd.f32 %v2280_v33, %v2250_v6 }
 0x273   : > { %v2282_v27 = vadd.f32 %v2281_v7, %v2251_v24 }
 0x275   : > { %v2283_v8 = vadd.f32 %v2282_v27, %v2252_v56 }
 0x277   : > { %v2284_v4 = vadd.f32 %v2283_v8, %v2253_v11 }
 0x279   : > { %v2285_v54 = vadd.f32 %v2284_v4, %v2254_v40 }
 0x27b   : > { %v2286_v19 = vadd.f32 %v2285_v54, %v2255_v16 }
 0x27d   : > { %v2287_v58 = vadd.f32 %v2286_v19, %v2256_v12 }
 0x27f   : > { %v2288_v42 = vadd.f32 %v2287_v58, %v2257_v61 }
 0x281   : > { %v2289_v34 = vadd.f32 %v2288_v42, %v2258_v10 }
 0x283   : > { %v2290_v62 = vadd.f32 %v2289_v34, %v2259_v21 }
 0x285   : > { %v2291_v29 = vadd.f32 %v2290_v62, %v2260_v36 }
 0x287   : > { %v2292_v23 = vadd.f32 %v2291_v29, %v2261_v38 }
 0x289   : > { %v2293_v9 = vadd.f32 %v2292_v23, %v2262_v45 }
 0x28b   : > { %v2294_v3 = vadd.f32 %v2293_v9, %v2263_v57 }
 0x28d   : > { %v2295_v39 = vadd.f32 %v2294_v3, %v2264_v0 }
 0x28f   : > { %v2296_v15 = vadd.f32 %v2295_v39, %v2265_v52 }
 0x291   : > { %v2297_v49 = vadd.f32 %v2296_v15, %v2266_v63 }
 0x293   : > { %v2298_v41 = vadd.f32 %v2297_v49, %v2267_v53 }
 0x295   : > { %v2299_v22 = vadd.f32 %v2298_v41, %v2268_v51 }
 0x297   : > { %v2300_v47 = vadd.f32 %v2299_v22, %v2269_v50 }
 0x299   : > { %v2301_v60 = vadd.f32 %v2300_v47, %v2270_v25 }
 0x29b   : > { %v2302_v30 = vadd.f32 %v2301_v60, %v2271_v26 }
 0x29d   : > { %v2303_v1 = vrot.slane %v2302_v30, 4 }
 0x29f   : > { %v2304_v59 = vadd.f32 %v2303_v1, %v2302_v30 }
 0x2a1   : > { %v2305_v44 = vrot.slane %v2304_v59, 2 }
 0x2a3   : > { %v2306_v43 = vadd.f32 %v2305_v44, %v2304_v59 }
 0x2a5   : > { %v2307_v35 = vrot.slane %v2306_v43, 1 }
 0x2a7   : > { %v2308_v5 = vadd.f32 %v2307_v35, %v2306_v43 }
 0x2a9   : > { %2310 = vst [vmem:[%s214_s12] sm:$0x1] %v2308_v5 }
 0x2aa PF: > { %s15_s15 = sadd.s32 1, %s4034_s15  }
 0x2ab   : > { %p12_p4 = scmp.ge.s32.totalorder %s15_s15, 4  }
 0x2ad   :  { %14 = sbr.rel (!%p12_p4) target bundleno = 1 (0x1), region = 84 }

</bundles_post_ra>
